<compile_context>
chip_gen: v5e
topology: v5e:2x2
jax: 0.10.0
libtpu: 0.0.40
codegen_flags: <defaults>
</compile_context>

<pallas_src>
import functools

import jax
import jax.numpy as jnp
from jax import lax
from jax.experimental import pallas as pl
from jax.experimental.pallas import tpu as pltpu

VMEM_SPEC = pl.BlockSpec(memory_space=pltpu.MemorySpace.VMEM)


def _gckd_kernel(ims_ref, imt_ref, queue_ref,
                 w1q_ref, b1q_ref, w2q_ref, b2q_ref,
                 w1k_ref, b1k_ref, w2k_ref, b2k_ref,
                 loss_ref, its_ref, gts_ref, newq_ref,
                 x_s,
                 *, temp, gama, adj_k, n_batch, k_valid):
    f32 = jnp.float32
    inv_t = 1.0 / temp

    # ---- F.normalize(im_q), F.normalize(im_k) (rsqrt on EUP) -------------
    xs = ims_ref[...]                                         # (N, C)
    xt = imt_ref[...]                                         # (N, C)
    q = xs * lax.rsqrt(jnp.maximum(jnp.sum(xs * xs, axis=1, keepdims=True), 1e-24))
    k = xt * lax.rsqrt(jnp.maximum(jnp.sum(xt * xt, axis=1, keepdims=True), 1e-24))

    # ---- instance-level InfoNCE (queue row-major, contract on C) ---------
    Q = queue_ref[...]                                        # (K_PAD, C)
    l_pos = jnp.sum(q * k, axis=1, keepdims=True) * inv_t     # (N, 1)
    l_neg = lax.dot_general(q, Q, (((1,), (1,)), ((), ())),
                            preferred_element_type=f32) * inv_t          # (N, K_PAD)
    n_rows, k_pad = l_neg.shape
    col_nk = lax.broadcasted_iota(jnp.int32, (n_rows, k_pad), 1)
    neg_masked = jnp.where(col_nk < k_valid, l_neg, -jnp.inf)  # mask padded rows
    m_i = jnp.maximum(jnp.max(neg_masked, axis=1, keepdims=True), l_pos)
    lse_i = m_i + jnp.log(jnp.exp(l_pos - m_i)
                          + jnp.sum(jnp.exp(neg_masked - m_i), axis=1, keepdims=True))
    loss_its = jnp.sum(lse_i - l_pos, axis=0, keepdims=True) * (1.0 / n_batch)  # (1,1)

    # ---- _dequeue_and_enqueue (ptr = 0): contiguous row store ------------
    newq_ref[...] = Q
    newq_ref[pl.ds(0, n_batch), :] = k

    # ---- graph branch: X = [q_or_k ; queue_rows] built once in VMEM ------
    M = n_batch + k_valid
    x_s[pl.ds(n_batch, k_valid), :] = queue_ref[pl.ds(0, k_valid), :]

    row_mm = lax.broadcasted_iota(jnp.int32, (M, M), 0)
    col_mm = lax.broadcasted_iota(jnp.int32, (M, M), 1)
    off_diag = (row_mm != col_mm).astype(f32)                 # 1 - I
    eye = 1.0 - off_diag
    col_f = col_mm.astype(f32)

    branches = ((q, w1q_ref, b1q_ref, w2q_ref, b2q_ref),
                (k, w1k_ref, b1k_ref, w2k_ref, b2k_ref))
    embs = []
    for feat, w1_ref, b1_ref, w2_ref, b2_ref in branches:
        x_s[pl.ds(0, n_batch), :] = feat
        X = x_s[...]                                          # (M, C)

        # cos_distance_softmax: softmax row-sum cancels -> sn = e / ||e||_2
        # (softmax row norms >= 1/sqrt(C) >> eps so the reference clamp never fires)
        e = jnp.exp(X - jnp.max(X, axis=1, keepdims=True))
        sn = e * lax.rsqrt(jnp.sum(e * e, axis=1, keepdims=True))
        dist = 1.0 - lax.dot_general(sn, sn, (((1,), (1,)), ((), ())),
                                     preferred_element_type=f32)          # (M, M)
        dist = dist * off_diag - eye                          # diag -> -1, as reference

        # in-kernel kNN: adj_k iterative row-min selects, first-index tie break
        adj = jnp.zeros((M, M), f32)
        for _ in range(adj_k):
            mn = jnp.min(dist, axis=1, keepdims=True)
            sel = jnp.min(jnp.where(dist == mn, col_f, float(M)),
                          axis=1, keepdims=True)
            pick = col_f == sel
            adj = jnp.where(pick, 1.0, adj)
            dist = jnp.where(pick, 3.0, dist)                 # 3.0 > any real distance

        # 2-layer GraphConv (norm='both'), f32 aggregation for parity
        d_in = jnp.maximum(jnp.sum(adj, axis=1, keepdims=True), 1.0)   # (M, 1)
        d_out = jnp.maximum(jnp.sum(adj, axis=0, keepdims=True), 1.0)  # (1, M)
        a_norm = adj * lax.rsqrt(d_in) * lax.rsqrt(d_out)

        h1 = jnp.dot(jnp.dot(a_norm, X, preferred_element_type=f32),
                     w1_ref[...], preferred_element_type=f32) + b1_ref[...]
        h1 = jnp.maximum(h1, 0.0)                             # ReLU between layers
        h2 = jnp.dot(jnp.dot(a_norm, h1, preferred_element_type=f32),
                     w2_ref[...], preferred_element_type=f32) + b2_ref[...]
        # GNN Normalize(power=2) row L2 norm (tiny clamp only to avoid 0/0)
        emb = h2 * lax.rsqrt(jnp.maximum(jnp.sum(h2 * h2, axis=1, keepdims=True),
                                         1e-24))
        embs.append(emb)

    # ---- graph-level InfoNCE ---------------------------------------------
    # (outer F.normalize on q_g / k_g is a no-op on the unit-norm GNN rows)
    q_g = embs[0][:n_batch, :]                                # (N, C)
    ek = embs[1]                                              # (M, C) = [k_g ; queue_g]
    logits = lax.dot_general(q_g, ek, (((1,), (1,)), ((), ())),
                             preferred_element_type=f32) * inv_t          # (N, M)
    r_nm = lax.broadcasted_iota(jnp.int32, (n_batch, M), 0)
    c_nm = lax.broadcasted_iota(jnp.int32, (n_batch, M), 1)
    is_pos = c_nm == r_nm
    valid = is_pos | (c_nm >= n_batch)                        # {l_pos} U {queue_g negs}
    l_posg = jnp.sum(jnp.where(is_pos, logits, 0.0), axis=1, keepdims=True)
    lg = jnp.where(valid, logits, -jnp.inf)
    m_g = jnp.max(lg, axis=1, keepdims=True)
    lse_g = m_g + jnp.log(jnp.sum(jnp.exp(lg - m_g), axis=1, keepdims=True))
    loss_gts = jnp.sum(lse_g - l_posg, axis=0, keepdims=True) * (1.0 / n_batch)  # (1,1)

    its_ref[...] = loss_its
    gts_ref[...] = loss_gts
    loss_ref[...] = loss_its + gama * loss_gts


def gckd_forward(ims, imt, queue_rows, gnn_q_params, gnn_k_params,
                 *, temp, gama, adj_k, momentum, k_valid):
    """GCKD.forward_st (symmetric=False): returns (loss, loss_its, loss_gts, new_queue)."""
    n, c = ims.shape
    k_pad = queue_rows.shape[0]
    m = n + k_valid

    # momentum update of the key GNN (no-op at init when params are equal)
    gnn_k_params = tuple(pk * momentum + pq * (1.0 - momentum)
                         for pq, pk in zip(gnn_q_params, gnn_k_params))

    kernel = functools.partial(_gckd_kernel, temp=temp, gama=gama, adj_k=adj_k,
                               n_batch=n, k_valid=k_valid)
    loss, loss_its, loss_gts, new_queue = pl.pallas_call(
        kernel,
        out_shape=(
            jax.ShapeDtypeStruct((1, 1), jnp.float32),        # loss
            jax.ShapeDtypeStruct((1, 1), jnp.float32),        # loss_its
            jax.ShapeDtypeStruct((1, 1), jnp.float32),        # loss_gts
            jax.ShapeDtypeStruct((k_pad, c), jnp.float32),    # updated queue (row-major)
        ),
        in_specs=[VMEM_SPEC] * 11,
        out_specs=(VMEM_SPEC, VMEM_SPEC, VMEM_SPEC, VMEM_SPEC),
        scratch_shapes=[pltpu.VMEM((m, c), jnp.float32)],     # X = [q_or_k ; queue]
    )(ims, imt, queue_rows, *gnn_q_params, *gnn_k_params)
    return loss[0, 0], loss_its[0, 0], loss_gts[0, 0], new_queue


if __name__ == "__main__":
    N, D, K_REAL, ADJ_K = 8, 128, 120, 4        # batch, t_dim, queue size, knn k
    K_PAD = 128                                 # sublane-padded queue rows
    TEMP, GAMA, MOM = 0.1, 1.0, 0.99

    key = jax.random.PRNGKey(0)
    ks = jax.random.split(key, 5)

    ims = jax.random.normal(ks[0], (N, D), jnp.float32)       # student features
    imt = jax.random.normal(ks[1], (N, D), jnp.float32)       # teacher features

    # MoCo queue: reference stores (t_dim, K) with unit columns; row-major
    # equivalent is (K, t_dim) with unit rows, padded to 128 rows (masked).
    qraw = jax.random.normal(ks[2], (K_REAL, D), jnp.float32)
    queue = qraw / jnp.linalg.norm(qraw, axis=1, keepdims=True)
    queue_pad = jnp.pad(queue, ((0, K_PAD - K_REAL), (0, 0)))  # (128, 128)

    w1 = jax.random.normal(ks[3], (D, D), jnp.float32) * 0.1
    b1 = jnp.zeros((1, D), jnp.float32)
    w2 = jax.random.normal(ks[4], (D, D), jnp.float32) * 0.1
    b2 = jnp.zeros((1, D), jnp.float32)
    gnn_q_params = (w1, b1, w2, b2)
    gnn_k_params = tuple(p for p in gnn_q_params)             # copied, as in __init__

    fwd = jax.jit(functools.partial(gckd_forward, temp=TEMP, gama=GAMA,
                                    adj_k=ADJ_K, momentum=MOM, k_valid=K_REAL))
    loss, loss_its, loss_gts, new_queue = fwd(ims, imt, queue_pad,
                                              gnn_q_params, gnn_k_params)
    jax.block_until_ready((loss, loss_its, loss_gts, new_queue))
    print("KERNEL_OK")
</pallas_src>

<mosaic_0001>
module attributes {stable_mosaic.version = 11 : i64} {
  func.func @_gckd_kernel(%arg0: memref<8x128xf32, #tpu.memory_space<vmem>>, %arg1: memref<8x128xf32, #tpu.memory_space<vmem>>, %arg2: memref<128x128xf32, #tpu.memory_space<vmem>>, %arg3: memref<128x128xf32, #tpu.memory_space<vmem>>, %arg4: memref<1x128xf32, #tpu.memory_space<vmem>>, %arg5: memref<128x128xf32, #tpu.memory_space<vmem>>, %arg6: memref<1x128xf32, #tpu.memory_space<vmem>>, %arg7: memref<128x128xf32, #tpu.memory_space<vmem>>, %arg8: memref<1x128xf32, #tpu.memory_space<vmem>>, %arg9: memref<128x128xf32, #tpu.memory_space<vmem>>, %arg10: memref<1x128xf32, #tpu.memory_space<vmem>>, %arg11: memref<1x1xf32, #tpu.memory_space<vmem>>, %arg12: memref<1x1xf32, #tpu.memory_space<vmem>>, %arg13: memref<1x1xf32, #tpu.memory_space<vmem>>, %arg14: memref<128x128xf32, #tpu.memory_space<vmem>>, %arg15: memref<128x128xf32, #tpu.memory_space<vmem>>) attributes {dimension_semantics = [], scalar_prefetch = 0 : i64, scratch_operands = 1 : i64, tpu.core_type = #tpu.core_type<tc>} {
    %c0 = arith.constant 0 : index
    %c0_0 = arith.constant 0 : index
    %0 = vector.load %arg0[%c0, %c0_0] : memref<8x128xf32, #tpu.memory_space<vmem>>, vector<8x128xf32>
    %c0_1 = arith.constant 0 : index
    %c0_2 = arith.constant 0 : index
    %1 = vector.load %arg1[%c0_1, %c0_2] : memref<8x128xf32, #tpu.memory_space<vmem>>, vector<8x128xf32>
    %2 = arith.mulf %0, %0 : vector<8x128xf32>
    %cst = arith.constant dense<0.000000e+00> : vector<8xf32>
    %3 = vector.multi_reduction <add>, %2, %cst [1] : vector<8x128xf32> to vector<8xf32>
    %4 = vector.shape_cast %3 : vector<8xf32> to vector<8x1xf32>
    %cst_3 = arith.constant 1.000000e-24 : f32
    %5 = vector.broadcast %cst_3 : f32 to vector<8x1xf32>
    %6 = arith.maximumf %4, %5 : vector<8x1xf32>
    %7 = math.rsqrt %6 : vector<8x1xf32>
    %8 = vector.broadcast %7 : vector<8x1xf32> to vector<8x128xf32>
    %9 = arith.mulf %0, %8 : vector<8x128xf32>
    %10 = arith.mulf %1, %1 : vector<8x128xf32>
    %cst_4 = arith.constant dense<0.000000e+00> : vector<8xf32>
    %11 = vector.multi_reduction <add>, %10, %cst_4 [1] : vector<8x128xf32> to vector<8xf32>
    %12 = vector.shape_cast %11 : vector<8xf32> to vector<8x1xf32>
    %cst_5 = arith.constant 1.000000e-24 : f32
    %13 = vector.broadcast %cst_5 : f32 to vector<8x1xf32>
    %14 = arith.maximumf %12, %13 : vector<8x1xf32>
    %15 = math.rsqrt %14 : vector<8x1xf32>
    %16 = vector.broadcast %15 : vector<8x1xf32> to vector<8x128xf32>
    %17 = arith.mulf %1, %16 : vector<8x128xf32>
    %c0_6 = arith.constant 0 : index
    %c0_7 = arith.constant 0 : index
    %18 = vector.load %arg2[%c0_6, %c0_7] : memref<128x128xf32, #tpu.memory_space<vmem>>, vector<128x128xf32>
    %19 = arith.mulf %9, %17 : vector<8x128xf32>
    %cst_8 = arith.constant dense<0.000000e+00> : vector<8xf32>
    %20 = vector.multi_reduction <add>, %19, %cst_8 [1] : vector<8x128xf32> to vector<8xf32>
    %21 = vector.shape_cast %20 : vector<8xf32> to vector<8x1xf32>
    %cst_9 = arith.constant 1.000000e+01 : f32
    %22 = vector.broadcast %cst_9 : f32 to vector<8x1xf32>
    %23 = arith.mulf %21, %22 : vector<8x1xf32>
    %cst_10 = arith.constant dense<0.000000e+00> : vector<8x128xf32>
    %24 = tpu.matmul %9, %18, %cst_10 {dimension_numbers = #tpu.dot_dimension_numbers<[1], [1], [0], [0], [0, 0, 1, 0], [], []>} : vector<8x128xf32>, vector<128x128xf32>, vector<8x128xf32> -> vector<8x128xf32>
    %cst_11 = arith.constant 1.000000e+01 : f32
    %25 = vector.broadcast %cst_11 : f32 to vector<8x128xf32>
    %26 = arith.mulf %24, %25 : vector<8x128xf32>
    %27 = tpu.iota {dimensions = array<i32: 1>} : vector<8x128xi32>
    %c120_i32 = arith.constant 120 : i32
    %28 = vector.broadcast %c120_i32 : i32 to vector<8x128xi32>
    %29 = arith.cmpi slt, %27, %28 : vector<8x128xi32>
    %cst_12 = arith.constant 0xFF800000 : f32
    %30 = vector.broadcast %cst_12 : f32 to vector<8x128xf32>
    %31 = arith.select %29, %26, %30 : vector<8x128xi1>, vector<8x128xf32>
    %cst_13 = arith.constant dense<0xFF800000> : vector<8xf32>
    %32 = vector.multi_reduction <maximumf>, %31, %cst_13 [1] : vector<8x128xf32> to vector<8xf32>
    %33 = vector.shape_cast %32 : vector<8xf32> to vector<8x1xf32>
    %34 = arith.maximumf %33, %23 : vector<8x1xf32>
    %35 = arith.subf %23, %34 : vector<8x1xf32>
    %36 = math.exp %35 : vector<8x1xf32>
    %37 = vector.broadcast %34 : vector<8x1xf32> to vector<8x128xf32>
    %38 = arith.subf %31, %37 : vector<8x128xf32>
    %39 = math.exp %38 : vector<8x128xf32>
    %cst_14 = arith.constant dense<0.000000e+00> : vector<8xf32>
    %40 = vector.multi_reduction <add>, %39, %cst_14 [1] : vector<8x128xf32> to vector<8xf32>
    %41 = vector.shape_cast %40 : vector<8xf32> to vector<8x1xf32>
    %42 = arith.addf %36, %41 : vector<8x1xf32>
    %43 = math.log %42 : vector<8x1xf32>
    %44 = arith.addf %34, %43 : vector<8x1xf32>
    %45 = arith.subf %44, %23 : vector<8x1xf32>
    %cst_15 = arith.constant dense<0.000000e+00> : vector<1xf32>
    %46 = vector.multi_reduction <add>, %45, %cst_15 [0] : vector<8x1xf32> to vector<1xf32>
    %47 = vector.shape_cast %46 : vector<1xf32> to vector<1x1xf32>
    %cst_16 = arith.constant 1.250000e-01 : f32
    %48 = vector.broadcast %cst_16 : f32 to vector<1x1xf32>
    %49 = arith.mulf %47, %48 : vector<1x1xf32>
    %c0_17 = arith.constant 0 : index
    %c0_18 = arith.constant 0 : index
    %50 = vector.load %arg14[%c0_17, %c0_18] : memref<128x128xf32, #tpu.memory_space<vmem>>, vector<128x128xf32>
    tpu.vector_store %arg14[%c0_17, %c0_18], %18 {strides = array<i32>} : memref<128x128xf32, #tpu.memory_space<vmem>>, vector<128x128xf32>,
    %c0_19 = arith.constant 0 : index
    %c0_20 = arith.constant 0 : index
    %51 = vector.load %arg14[%c0_19, %c0_20] : memref<128x128xf32, #tpu.memory_space<vmem>>, vector<8x128xf32>
    tpu.vector_store %arg14[%c0_19, %c0_20], %17 {strides = array<i32>} : memref<128x128xf32, #tpu.memory_space<vmem>>, vector<8x128xf32>,
    %c0_21 = arith.constant 0 : index
    %c0_22 = arith.constant 0 : index
    %52 = vector.load %arg2[%c0_21, %c0_22] : memref<128x128xf32, #tpu.memory_space<vmem>>, vector<120x128xf32>
    %c8 = arith.constant 8 : index
    %c0_23 = arith.constant 0 : index
    %53 = vector.load %arg15[%c8, %c0_23] : memref<128x128xf32, #tpu.memory_space<vmem>>, vector<120x128xf32>
    tpu.vector_store %arg15[%c8, %c0_23], %52 {strides = array<i32>} : memref<128x128xf32, #tpu.memory_space<vmem>>, vector<120x128xf32>,
    %54 = tpu.iota {dimensions = array<i32: 0>} : vector<128x128xi32>
    %55 = tpu.iota {dimensions = array<i32: 1>} : vector<128x128xi32>
    %56 = arith.cmpi ne, %54, %55 : vector<128x128xi32>
    %57 = arith.extui %56 : vector<128x128xi1> to vector<128x128xi32>
    %58 = arith.sitofp %57 : vector<128x128xi32> to vector<128x128xf32>
    %cst_24 = arith.constant 1.000000e+00 : f32
    %59 = vector.broadcast %cst_24 : f32 to vector<128x128xf32>
    %60 = arith.subf %59, %58 : vector<128x128xf32>
    %61 = arith.sitofp %55 : vector<128x128xi32> to vector<128x128xf32>
    %c0_25 = arith.constant 0 : index
    %c0_26 = arith.constant 0 : index
    %62 = vector.load %arg15[%c0_25, %c0_26] : memref<128x128xf32, #tpu.memory_space<vmem>>, vector<8x128xf32>
    tpu.vector_store %arg15[%c0_25, %c0_26], %9 {strides = array<i32>} : memref<128x128xf32, #tpu.memory_space<vmem>>, vector<8x128xf32>,
    %c0_27 = arith.constant 0 : index
    %c0_28 = arith.constant 0 : index
    %63 = vector.load %arg15[%c0_27, %c0_28] : memref<128x128xf32, #tpu.memory_space<vmem>>, vector<128x128xf32>
    %cst_29 = arith.constant dense<0xFF800000> : vector<128xf32>
    %64 = vector.multi_reduction <maximumf>, %63, %cst_29 [1] : vector<128x128xf32> to vector<128xf32>
    %65 = vector.shape_cast %64 : vector<128xf32> to vector<128x1xf32>
    %66 = vector.broadcast %65 : vector<128x1xf32> to vector<128x128xf32>
    %67 = arith.subf %63, %66 : vector<128x128xf32>
    %68 = math.exp %67 : vector<128x128xf32>
    %69 = arith.mulf %68, %68 : vector<128x128xf32>
    %cst_30 = arith.constant dense<0.000000e+00> : vector<128xf32>
    %70 = vector.multi_reduction <add>, %69, %cst_30 [1] : vector<128x128xf32> to vector<128xf32>
    %71 = vector.shape_cast %70 : vector<128xf32> to vector<128x1xf32>
    %72 = math.rsqrt %71 : vector<128x1xf32>
    %73 = vector.broadcast %72 : vector<128x1xf32> to vector<128x128xf32>
    %74 = arith.mulf %68, %73 : vector<128x128xf32>
    %cst_31 = arith.constant dense<0.000000e+00> : vector<128x128xf32>
    %75 = tpu.matmul %74, %74, %cst_31 {dimension_numbers = #tpu.dot_dimension_numbers<[1], [1], [0], [0], [0, 0, 1, 0], [], []>} : vector<128x128xf32>, vector<128x128xf32>, vector<128x128xf32> -> vector<128x128xf32>
    %cst_32 = arith.constant 1.000000e+00 : f32
    %76 = vector.broadcast %cst_32 : f32 to vector<128x128xf32>
    %77 = arith.subf %76, %75 : vector<128x128xf32>
    %78 = arith.mulf %77, %58 : vector<128x128xf32>
    %79 = arith.subf %78, %60 : vector<128x128xf32>
    %cst_33 = arith.constant 0.000000e+00 : f32
    %80 = vector.broadcast %cst_33 : f32 to vector<128x128xf32>
    %cst_34 = arith.constant dense<0x7F800000> : vector<128xf32>
    %81 = vector.multi_reduction <minimumf>, %79, %cst_34 [1] : vector<128x128xf32> to vector<128xf32>
    %82 = vector.shape_cast %81 : vector<128xf32> to vector<128x1xf32>
    %83 = vector.broadcast %82 : vector<128x1xf32> to vector<128x128xf32>
    %84 = arith.cmpf oeq, %79, %83 : vector<128x128xf32>
    %cst_35 = arith.constant 1.280000e+02 : f32
    %85 = vector.broadcast %cst_35 : f32 to vector<128x128xf32>
    %86 = arith.select %84, %61, %85 : vector<128x128xi1>, vector<128x128xf32>
    %cst_36 = arith.constant dense<0x7F800000> : vector<128xf32>
    %87 = vector.multi_reduction <minimumf>, %86, %cst_36 [1] : vector<128x128xf32> to vector<128xf32>
    %88 = vector.shape_cast %87 : vector<128xf32> to vector<128x1xf32>
    %89 = vector.broadcast %88 : vector<128x1xf32> to vector<128x128xf32>
    %90 = arith.cmpf oeq, %61, %89 : vector<128x128xf32>
    %cst_37 = arith.constant 1.000000e+00 : f32
    %91 = vector.broadcast %cst_37 : f32 to vector<128x128xf32>
    %92 = arith.select %90, %91, %80 : vector<128x128xi1>, vector<128x128xf32>
    %cst_38 = arith.constant 3.000000e+00 : f32
    %93 = vector.broadcast %cst_38 : f32 to vector<128x128xf32>
    %94 = arith.select %90, %93, %79 : vector<128x128xi1>, vector<128x128xf32>
    %cst_39 = arith.constant dense<0x7F800000> : vector<128xf32>
    %95 = vector.multi_reduction <minimumf>, %94, %cst_39 [1] : vector<128x128xf32> to vector<128xf32>
    %96 = vector.shape_cast %95 : vector<128xf32> to vector<128x1xf32>
    %97 = vector.broadcast %96 : vector<128x1xf32> to vector<128x128xf32>
    %98 = arith.cmpf oeq, %94, %97 : vector<128x128xf32>
    %cst_40 = arith.constant 1.280000e+02 : f32
    %99 = vector.broadcast %cst_40 : f32 to vector<128x128xf32>
    %100 = arith.select %98, %61, %99 : vector<128x128xi1>, vector<128x128xf32>
    %cst_41 = arith.constant dense<0x7F800000> : vector<128xf32>
    %101 = vector.multi_reduction <minimumf>, %100, %cst_41 [1] : vector<128x128xf32> to vector<128xf32>
    %102 = vector.shape_cast %101 : vector<128xf32> to vector<128x1xf32>
    %103 = vector.broadcast %102 : vector<128x1xf32> to vector<128x128xf32>
    %104 = arith.cmpf oeq, %61, %103 : vector<128x128xf32>
    %cst_42 = arith.constant 1.000000e+00 : f32
    %105 = vector.broadcast %cst_42 : f32 to vector<128x128xf32>
    %106 = arith.select %104, %105, %92 : vector<128x128xi1>, vector<128x128xf32>
    %cst_43 = arith.constant 3.000000e+00 : f32
    %107 = vector.broadcast %cst_43 : f32 to vector<128x128xf32>
    %108 = arith.select %104, %107, %94 : vector<128x128xi1>, vector<128x128xf32>
    %cst_44 = arith.constant dense<0x7F800000> : vector<128xf32>
    %109 = vector.multi_reduction <minimumf>, %108, %cst_44 [1] : vector<128x128xf32> to vector<128xf32>
    %110 = vector.shape_cast %109 : vector<128xf32> to vector<128x1xf32>
    %111 = vector.broadcast %110 : vector<128x1xf32> to vector<128x128xf32>
    %112 = arith.cmpf oeq, %108, %111 : vector<128x128xf32>
    %cst_45 = arith.constant 1.280000e+02 : f32
    %113 = vector.broadcast %cst_45 : f32 to vector<128x128xf32>
    %114 = arith.select %112, %61, %113 : vector<128x128xi1>, vector<128x128xf32>
    %cst_46 = arith.constant dense<0x7F800000> : vector<128xf32>
    %115 = vector.multi_reduction <minimumf>, %114, %cst_46 [1] : vector<128x128xf32> to vector<128xf32>
    %116 = vector.shape_cast %115 : vector<128xf32> to vector<128x1xf32>
    %117 = vector.broadcast %116 : vector<128x1xf32> to vector<128x128xf32>
    %118 = arith.cmpf oeq, %61, %117 : vector<128x128xf32>
    %cst_47 = arith.constant 1.000000e+00 : f32
    %119 = vector.broadcast %cst_47 : f32 to vector<128x128xf32>
    %120 = arith.select %118, %119, %106 : vector<128x128xi1>, vector<128x128xf32>
    %cst_48 = arith.constant 3.000000e+00 : f32
    %121 = vector.broadcast %cst_48 : f32 to vector<128x128xf32>
    %122 = arith.select %118, %121, %108 : vector<128x128xi1>, vector<128x128xf32>
    %cst_49 = arith.constant dense<0x7F800000> : vector<128xf32>
    %123 = vector.multi_reduction <minimumf>, %122, %cst_49 [1] : vector<128x128xf32> to vector<128xf32>
    %124 = vector.shape_cast %123 : vector<128xf32> to vector<128x1xf32>
    %125 = vector.broadcast %124 : vector<128x1xf32> to vector<128x128xf32>
    %126 = arith.cmpf oeq, %122, %125 : vector<128x128xf32>
    %cst_50 = arith.constant 1.280000e+02 : f32
    %127 = vector.broadcast %cst_50 : f32 to vector<128x128xf32>
    %128 = arith.select %126, %61, %127 : vector<128x128xi1>, vector<128x128xf32>
    %cst_51 = arith.constant dense<0x7F800000> : vector<128xf32>
    %129 = vector.multi_reduction <minimumf>, %128, %cst_51 [1] : vector<128x128xf32> to vector<128xf32>
    %130 = vector.shape_cast %129 : vector<128xf32> to vector<128x1xf32>
    %131 = vector.broadcast %130 : vector<128x1xf32> to vector<128x128xf32>
    %132 = arith.cmpf oeq, %61, %131 : vector<128x128xf32>
    %cst_52 = arith.constant 1.000000e+00 : f32
    %133 = vector.broadcast %cst_52 : f32 to vector<128x128xf32>
    %134 = arith.select %132, %133, %120 : vector<128x128xi1>, vector<128x128xf32>
    %cst_53 = arith.constant dense<0.000000e+00> : vector<128xf32>
    %135 = vector.multi_reduction <add>, %134, %cst_53 [1] : vector<128x128xf32> to vector<128xf32>
    %136 = vector.shape_cast %135 : vector<128xf32> to vector<128x1xf32>
    %cst_54 = arith.constant 1.000000e+00 : f32
    %137 = vector.broadcast %cst_54 : f32 to vector<128x1xf32>
    %138 = arith.maximumf %136, %137 : vector<128x1xf32>
    %cst_55 = arith.constant dense<0.000000e+00> : vector<128xf32>
    %139 = vector.multi_reduction <add>, %134, %cst_55 [0] : vector<128x128xf32> to vector<128xf32>
    %140 = vector.shape_cast %139 : vector<128xf32> to vector<1x128xf32>
    %cst_56 = arith.constant 1.000000e+00 : f32
    %141 = vector.broadcast %cst_56 : f32 to vector<1x128xf32>
    %142 = arith.maximumf %140, %141 : vector<1x128xf32>
    %143 = math.rsqrt %138 : vector<128x1xf32>
    %144 = vector.broadcast %143 : vector<128x1xf32> to vector<128x128xf32>
    %145 = arith.mulf %134, %144 : vector<128x128xf32>
    %146 = math.rsqrt %142 : vector<1x128xf32>
    %147 = vector.broadcast %146 : vector<1x128xf32> to vector<128x128xf32>
    %148 = arith.mulf %145, %147 : vector<128x128xf32>
    %cst_57 = arith.constant dense<0.000000e+00> : vector<128x128xf32>
    %149 = tpu.matmul %148, %63, %cst_57 {dimension_numbers = #tpu.dot_dimension_numbers<[1], [0], [0], [1], [0, 0, 1, 1], [], []>} : vector<128x128xf32>, vector<128x128xf32>, vector<128x128xf32> -> vector<128x128xf32>
    %c0_58 = arith.constant 0 : index
    %c0_59 = arith.constant 0 : index
    %150 = vector.load %arg3[%c0_58, %c0_59] : memref<128x128xf32, #tpu.memory_space<vmem>>, vector<128x128xf32>
    %cst_60 = arith.constant dense<0.000000e+00> : vector<128x128xf32>
    %151 = tpu.matmul %149, %150, %cst_60 {dimension_numbers = #tpu.dot_dimension_numbers<[1], [0], [0], [1], [0, 0, 1, 1], [], []>} : vector<128x128xf32>, vector<128x128xf32>, vector<128x128xf32> -> vector<128x128xf32>
    %c0_61 = arith.constant 0 : index
    %c0_62 = arith.constant 0 : index
    %152 = vector.load %arg4[%c0_61, %c0_62] : memref<1x128xf32, #tpu.memory_space<vmem>>, vector<1x128xf32>
    %153 = vector.broadcast %152 : vector<1x128xf32> to vector<128x128xf32>
    %154 = arith.addf %151, %153 : vector<128x128xf32>
    %cst_63 = arith.constant 0.000000e+00 : f32
    %155 = vector.broadcast %cst_63 : f32 to vector<128x128xf32>
    %156 = arith.maximumf %154, %155 : vector<128x128xf32>
    %cst_64 = arith.constant dense<0.000000e+00> : vector<128x128xf32>
    %157 = tpu.matmul %148, %156, %cst_64 {dimension_numbers = #tpu.dot_dimension_numbers<[1], [0], [0], [1], [0, 0, 1, 1], [], []>} : vector<128x128xf32>, vector<128x128xf32>, vector<128x128xf32> -> vector<128x128xf32>
    %c0_65 = arith.constant 0 : index
    %c0_66 = arith.constant 0 : index
    %158 = vector.load %arg5[%c0_65, %c0_66] : memref<128x128xf32, #tpu.memory_space<vmem>>, vector<128x128xf32>
    %cst_67 = arith.constant dense<0.000000e+00> : vector<128x128xf32>
    %159 = tpu.matmul %157, %158, %cst_67 {dimension_numbers = #tpu.dot_dimension_numbers<[1], [0], [0], [1], [0, 0, 1, 1], [], []>} : vector<128x128xf32>, vector<128x128xf32>, vector<128x128xf32> -> vector<128x128xf32>
    %c0_68 = arith.constant 0 : index
    %c0_69 = arith.constant 0 : index
    %160 = vector.load %arg6[%c0_68, %c0_69] : memref<1x128xf32, #tpu.memory_space<vmem>>, vector<1x128xf32>
    %161 = vector.broadcast %160 : vector<1x128xf32> to vector<128x128xf32>
    %162 = arith.addf %159, %161 : vector<128x128xf32>
    %163 = arith.mulf %162, %162 : vector<128x128xf32>
    %cst_70 = arith.constant dense<0.000000e+00> : vector<128xf32>
    %164 = vector.multi_reduction <add>, %163, %cst_70 [1] : vector<128x128xf32> to vector<128xf32>
    %165 = vector.shape_cast %164 : vector<128xf32> to vector<128x1xf32>
    %cst_71 = arith.constant 1.000000e-24 : f32
    %166 = vector.broadcast %cst_71 : f32 to vector<128x1xf32>
    %167 = arith.maximumf %165, %166 : vector<128x1xf32>
    %168 = math.rsqrt %167 : vector<128x1xf32>
    %169 = vector.broadcast %168 : vector<128x1xf32> to vector<128x128xf32>
    %170 = arith.mulf %162, %169 : vector<128x128xf32>
    %c0_72 = arith.constant 0 : index
    %c0_73 = arith.constant 0 : index
    %171 = vector.load %arg15[%c0_72, %c0_73] : memref<128x128xf32, #tpu.memory_space<vmem>>, vector<8x128xf32>
    tpu.vector_store %arg15[%c0_72, %c0_73], %17 {strides = array<i32>} : memref<128x128xf32, #tpu.memory_space<vmem>>, vector<8x128xf32>,
    %c0_74 = arith.constant 0 : index
    %c0_75 = arith.constant 0 : index
    %172 = vector.load %arg15[%c0_74, %c0_75] : memref<128x128xf32, #tpu.memory_space<vmem>>, vector<128x128xf32>
    %cst_76 = arith.constant dense<0xFF800000> : vector<128xf32>
    %173 = vector.multi_reduction <maximumf>, %172, %cst_76 [1] : vector<128x128xf32> to vector<128xf32>
    %174 = vector.shape_cast %173 : vector<128xf32> to vector<128x1xf32>
    %175 = vector.broadcast %174 : vector<128x1xf32> to vector<128x128xf32>
    %176 = arith.subf %172, %175 : vector<128x128xf32>
    %177 = math.exp %176 : vector<128x128xf32>
    %178 = arith.mulf %177, %177 : vector<128x128xf32>
    %cst_77 = arith.constant dense<0.000000e+00> : vector<128xf32>
    %179 = vector.multi_reduction <add>, %178, %cst_77 [1] : vector<128x128xf32> to vector<128xf32>
    %180 = vector.shape_cast %179 : vector<128xf32> to vector<128x1xf32>
    %181 = math.rsqrt %180 : vector<128x1xf32>
    %182 = vector.broadcast %181 : vector<128x1xf32> to vector<128x128xf32>
    %183 = arith.mulf %177, %182 : vector<128x128xf32>
    %cst_78 = arith.constant dense<0.000000e+00> : vector<128x128xf32>
    %184 = tpu.matmul %183, %183, %cst_78 {dimension_numbers = #tpu.dot_dimension_numbers<[1], [1], [0], [0], [0, 0, 1, 0], [], []>} : vector<128x128xf32>, vector<128x128xf32>, vector<128x128xf32> -> vector<128x128xf32>
    %cst_79 = arith.constant 1.000000e+00 : f32
    %185 = vector.broadcast %cst_79 : f32 to vector<128x128xf32>
    %186 = arith.subf %185, %184 : vector<128x128xf32>
    %187 = arith.mulf %186, %58 : vector<128x128xf32>
    %188 = arith.subf %187, %60 : vector<128x128xf32>
    %cst_80 = arith.constant 0.000000e+00 : f32
    %189 = vector.broadcast %cst_80 : f32 to vector<128x128xf32>
    %cst_81 = arith.constant dense<0x7F800000> : vector<128xf32>
    %190 = vector.multi_reduction <minimumf>, %188, %cst_81 [1] : vector<128x128xf32> to vector<128xf32>
    %191 = vector.shape_cast %190 : vector<128xf32> to vector<128x1xf32>
    %192 = vector.broadcast %191 : vector<128x1xf32> to vector<128x128xf32>
    %193 = arith.cmpf oeq, %188, %192 : vector<128x128xf32>
    %cst_82 = arith.constant 1.280000e+02 : f32
    %194 = vector.broadcast %cst_82 : f32 to vector<128x128xf32>
    %195 = arith.select %193, %61, %194 : vector<128x128xi1>, vector<128x128xf32>
    %cst_83 = arith.constant dense<0x7F800000> : vector<128xf32>
    %196 = vector.multi_reduction <minimumf>, %195, %cst_83 [1] : vector<128x128xf32> to vector<128xf32>
    %197 = vector.shape_cast %196 : vector<128xf32> to vector<128x1xf32>
    %198 = vector.broadcast %197 : vector<128x1xf32> to vector<128x128xf32>
    %199 = arith.cmpf oeq, %61, %198 : vector<128x128xf32>
    %cst_84 = arith.constant 1.000000e+00 : f32
    %200 = vector.broadcast %cst_84 : f32 to vector<128x128xf32>
    %201 = arith.select %199, %200, %189 : vector<128x128xi1>, vector<128x128xf32>
    %cst_85 = arith.constant 3.000000e+00 : f32
    %202 = vector.broadcast %cst_85 : f32 to vector<128x128xf32>
    %203 = arith.select %199, %202, %188 : vector<128x128xi1>, vector<128x128xf32>
    %cst_86 = arith.constant dense<0x7F800000> : vector<128xf32>
    %204 = vector.multi_reduction <minimumf>, %203, %cst_86 [1] : vector<128x128xf32> to vector<128xf32>
    %205 = vector.shape_cast %204 : vector<128xf32> to vector<128x1xf32>
    %206 = vector.broadcast %205 : vector<128x1xf32> to vector<128x128xf32>
    %207 = arith.cmpf oeq, %203, %206 : vector<128x128xf32>
    %cst_87 = arith.constant 1.280000e+02 : f32
    %208 = vector.broadcast %cst_87 : f32 to vector<128x128xf32>
    %209 = arith.select %207, %61, %208 : vector<128x128xi1>, vector<128x128xf32>
    %cst_88 = arith.constant dense<0x7F800000> : vector<128xf32>
    %210 = vector.multi_reduction <minimumf>, %209, %cst_88 [1] : vector<128x128xf32> to vector<128xf32>
    %211 = vector.shape_cast %210 : vector<128xf32> to vector<128x1xf32>
    %212 = vector.broadcast %211 : vector<128x1xf32> to vector<128x128xf32>
    %213 = arith.cmpf oeq, %61, %212 : vector<128x128xf32>
    %cst_89 = arith.constant 1.000000e+00 : f32
    %214 = vector.broadcast %cst_89 : f32 to vector<128x128xf32>
    %215 = arith.select %213, %214, %201 : vector<128x128xi1>, vector<128x128xf32>
    %cst_90 = arith.constant 3.000000e+00 : f32
    %216 = vector.broadcast %cst_90 : f32 to vector<128x128xf32>
    %217 = arith.select %213, %216, %203 : vector<128x128xi1>, vector<128x128xf32>
    %cst_91 = arith.constant dense<0x7F800000> : vector<128xf32>
    %218 = vector.multi_reduction <minimumf>, %217, %cst_91 [1] : vector<128x128xf32> to vector<128xf32>
    %219 = vector.shape_cast %218 : vector<128xf32> to vector<128x1xf32>
    %220 = vector.broadcast %219 : vector<128x1xf32> to vector<128x128xf32>
    %221 = arith.cmpf oeq, %217, %220 : vector<128x128xf32>
    %cst_92 = arith.constant 1.280000e+02 : f32
    %222 = vector.broadcast %cst_92 : f32 to vector<128x128xf32>
    %223 = arith.select %221, %61, %222 : vector<128x128xi1>, vector<128x128xf32>
    %cst_93 = arith.constant dense<0x7F800000> : vector<128xf32>
    %224 = vector.multi_reduction <minimumf>, %223, %cst_93 [1] : vector<128x128xf32> to vector<128xf32>
    %225 = vector.shape_cast %224 : vector<128xf32> to vector<128x1xf32>
    %226 = vector.broadcast %225 : vector<128x1xf32> to vector<128x128xf32>
    %227 = arith.cmpf oeq, %61, %226 : vector<128x128xf32>
    %cst_94 = arith.constant 1.000000e+00 : f32
    %228 = vector.broadcast %cst_94 : f32 to vector<128x128xf32>
    %229 = arith.select %227, %228, %215 : vector<128x128xi1>, vector<128x128xf32>
    %cst_95 = arith.constant 3.000000e+00 : f32
    %230 = vector.broadcast %cst_95 : f32 to vector<128x128xf32>
    %231 = arith.select %227, %230, %217 : vector<128x128xi1>, vector<128x128xf32>
    %cst_96 = arith.constant dense<0x7F800000> : vector<128xf32>
    %232 = vector.multi_reduction <minimumf>, %231, %cst_96 [1] : vector<128x128xf32> to vector<128xf32>
    %233 = vector.shape_cast %232 : vector<128xf32> to vector<128x1xf32>
    %234 = vector.broadcast %233 : vector<128x1xf32> to vector<128x128xf32>
    %235 = arith.cmpf oeq, %231, %234 : vector<128x128xf32>
    %cst_97 = arith.constant 1.280000e+02 : f32
    %236 = vector.broadcast %cst_97 : f32 to vector<128x128xf32>
    %237 = arith.select %235, %61, %236 : vector<128x128xi1>, vector<128x128xf32>
    %cst_98 = arith.constant dense<0x7F800000> : vector<128xf32>
    %238 = vector.multi_reduction <minimumf>, %237, %cst_98 [1] : vector<128x128xf32> to vector<128xf32>
    %239 = vector.shape_cast %238 : vector<128xf32> to vector<128x1xf32>
    %240 = vector.broadcast %239 : vector<128x1xf32> to vector<128x128xf32>
    %241 = arith.cmpf oeq, %61, %240 : vector<128x128xf32>
    %cst_99 = arith.constant 1.000000e+00 : f32
    %242 = vector.broadcast %cst_99 : f32 to vector<128x128xf32>
    %243 = arith.select %241, %242, %229 : vector<128x128xi1>, vector<128x128xf32>
    %cst_100 = arith.constant dense<0.000000e+00> : vector<128xf32>
    %244 = vector.multi_reduction <add>, %243, %cst_100 [1] : vector<128x128xf32> to vector<128xf32>
    %245 = vector.shape_cast %244 : vector<128xf32> to vector<128x1xf32>
    %cst_101 = arith.constant 1.000000e+00 : f32
    %246 = vector.broadcast %cst_101 : f32 to vector<128x1xf32>
    %247 = arith.maximumf %245, %246 : vector<128x1xf32>
    %cst_102 = arith.constant dense<0.000000e+00> : vector<128xf32>
    %248 = vector.multi_reduction <add>, %243, %cst_102 [0] : vector<128x128xf32> to vector<128xf32>
    %249 = vector.shape_cast %248 : vector<128xf32> to vector<1x128xf32>
    %cst_103 = arith.constant 1.000000e+00 : f32
    %250 = vector.broadcast %cst_103 : f32 to vector<1x128xf32>
    %251 = arith.maximumf %249, %250 : vector<1x128xf32>
    %252 = math.rsqrt %247 : vector<128x1xf32>
    %253 = vector.broadcast %252 : vector<128x1xf32> to vector<128x128xf32>
    %254 = arith.mulf %243, %253 : vector<128x128xf32>
    %255 = math.rsqrt %251 : vector<1x128xf32>
    %256 = vector.broadcast %255 : vector<1x128xf32> to vector<128x128xf32>
    %257 = arith.mulf %254, %256 : vector<128x128xf32>
    %cst_104 = arith.constant dense<0.000000e+00> : vector<128x128xf32>
    %258 = tpu.matmul %257, %172, %cst_104 {dimension_numbers = #tpu.dot_dimension_numbers<[1], [0], [0], [1], [0, 0, 1, 1], [], []>} : vector<128x128xf32>, vector<128x128xf32>, vector<128x128xf32> -> vector<128x128xf32>
    %c0_105 = arith.constant 0 : index
    %c0_106 = arith.constant 0 : index
    %259 = vector.load %arg7[%c0_105, %c0_106] : memref<128x128xf32, #tpu.memory_space<vmem>>, vector<128x128xf32>
    %cst_107 = arith.constant dense<0.000000e+00> : vector<128x128xf32>
    %260 = tpu.matmul %258, %259, %cst_107 {dimension_numbers = #tpu.dot_dimension_numbers<[1], [0], [0], [1], [0, 0, 1, 1], [], []>} : vector<128x128xf32>, vector<128x128xf32>, vector<128x128xf32> -> vector<128x128xf32>
    %c0_108 = arith.constant 0 : index
    %c0_109 = arith.constant 0 : index
    %261 = vector.load %arg8[%c0_108, %c0_109] : memref<1x128xf32, #tpu.memory_space<vmem>>, vector<1x128xf32>
    %262 = vector.broadcast %261 : vector<1x128xf32> to vector<128x128xf32>
    %263 = arith.addf %260, %262 : vector<128x128xf32>
    %cst_110 = arith.constant 0.000000e+00 : f32
    %264 = vector.broadcast %cst_110 : f32 to vector<128x128xf32>
    %265 = arith.maximumf %263, %264 : vector<128x128xf32>
    %cst_111 = arith.constant dense<0.000000e+00> : vector<128x128xf32>
    %266 = tpu.matmul %257, %265, %cst_111 {dimension_numbers = #tpu.dot_dimension_numbers<[1], [0], [0], [1], [0, 0, 1, 1], [], []>} : vector<128x128xf32>, vector<128x128xf32>, vector<128x128xf32> -> vector<128x128xf32>
    %c0_112 = arith.constant 0 : index
    %c0_113 = arith.constant 0 : index
    %267 = vector.load %arg9[%c0_112, %c0_113] : memref<128x128xf32, #tpu.memory_space<vmem>>, vector<128x128xf32>
    %cst_114 = arith.constant dense<0.000000e+00> : vector<128x128xf32>
    %268 = tpu.matmul %266, %267, %cst_114 {dimension_numbers = #tpu.dot_dimension_numbers<[1], [0], [0], [1], [0, 0, 1, 1], [], []>} : vector<128x128xf32>, vector<128x128xf32>, vector<128x128xf32> -> vector<128x128xf32>
    %c0_115 = arith.constant 0 : index
    %c0_116 = arith.constant 0 : index
    %269 = vector.load %arg10[%c0_115, %c0_116] : memref<1x128xf32, #tpu.memory_space<vmem>>, vector<1x128xf32>
    %270 = vector.broadcast %269 : vector<1x128xf32> to vector<128x128xf32>
    %271 = arith.addf %268, %270 : vector<128x128xf32>
    %272 = arith.mulf %271, %271 : vector<128x128xf32>
    %cst_117 = arith.constant dense<0.000000e+00> : vector<128xf32>
    %273 = vector.multi_reduction <add>, %272, %cst_117 [1] : vector<128x128xf32> to vector<128xf32>
    %274 = vector.shape_cast %273 : vector<128xf32> to vector<128x1xf32>
    %cst_118 = arith.constant 1.000000e-24 : f32
    %275 = vector.broadcast %cst_118 : f32 to vector<128x1xf32>
    %276 = arith.maximumf %274, %275 : vector<128x1xf32>
    %277 = math.rsqrt %276 : vector<128x1xf32>
    %278 = vector.broadcast %277 : vector<128x1xf32> to vector<128x128xf32>
    %279 = arith.mulf %271, %278 : vector<128x128xf32>
    %280 = vector.extract_strided_slice %170 {offsets = [0, 0], sizes = [8, 128], strides = [1, 1]} : vector<128x128xf32> to vector<8x128xf32>
    %cst_119 = arith.constant dense<0.000000e+00> : vector<8x128xf32>
    %281 = tpu.matmul %280, %279, %cst_119 {dimension_numbers = #tpu.dot_dimension_numbers<[1], [1], [0], [0], [0, 0, 1, 0], [], []>} : vector<8x128xf32>, vector<128x128xf32>, vector<8x128xf32> -> vector<8x128xf32>
    %cst_120 = arith.constant 1.000000e+01 : f32
    %282 = vector.broadcast %cst_120 : f32 to vector<8x128xf32>
    %283 = arith.mulf %281, %282 : vector<8x128xf32>
    %284 = tpu.iota {dimensions = array<i32: 0>} : vector<8x128xi32>
    %285 = tpu.iota {dimensions = array<i32: 1>} : vector<8x128xi32>
    %286 = arith.cmpi eq, %285, %284 : vector<8x128xi32>
    %c8_i32 = arith.constant 8 : i32
    %287 = vector.broadcast %c8_i32 : i32 to vector<8x128xi32>
    %288 = arith.cmpi sge, %285, %287 : vector<8x128xi32>
    %289 = arith.ori %286, %288 : vector<8x128xi1>
    %cst_121 = arith.constant 0.000000e+00 : f32
    %290 = vector.broadcast %cst_121 : f32 to vector<8x128xf32>
    %291 = arith.select %286, %283, %290 : vector<8x128xi1>, vector<8x128xf32>
    %cst_122 = arith.constant dense<0.000000e+00> : vector<8xf32>
    %292 = vector.multi_reduction <add>, %291, %cst_122 [1] : vector<8x128xf32> to vector<8xf32>
    %293 = vector.shape_cast %292 : vector<8xf32> to vector<8x1xf32>
    %cst_123 = arith.constant 0xFF800000 : f32
    %294 = vector.broadcast %cst_123 : f32 to vector<8x128xf32>
    %295 = arith.select %289, %283, %294 : vector<8x128xi1>, vector<8x128xf32>
    %cst_124 = arith.constant dense<0xFF800000> : vector<8xf32>
    %296 = vector.multi_reduction <maximumf>, %295, %cst_124 [1] : vector<8x128xf32> to vector<8xf32>
    %297 = vector.shape_cast %296 : vector<8xf32> to vector<8x1xf32>
    %298 = vector.broadcast %297 : vector<8x1xf32> to vector<8x128xf32>
    %299 = arith.subf %295, %298 : vector<8x128xf32>
    %300 = math.exp %299 : vector<8x128xf32>
    %cst_125 = arith.constant dense<0.000000e+00> : vector<8xf32>
    %301 = vector.multi_reduction <add>, %300, %cst_125 [1] : vector<8x128xf32> to vector<8xf32>
    %302 = vector.shape_cast %301 : vector<8xf32> to vector<8x1xf32>
    %303 = math.log %302 : vector<8x1xf32>
    %304 = arith.addf %297, %303 : vector<8x1xf32>
    %305 = arith.subf %304, %293 : vector<8x1xf32>
    %cst_126 = arith.constant dense<0.000000e+00> : vector<1xf32>
    %306 = vector.multi_reduction <add>, %305, %cst_126 [0] : vector<8x1xf32> to vector<1xf32>
    %307 = vector.shape_cast %306 : vector<1xf32> to vector<1x1xf32>
    %cst_127 = arith.constant 1.250000e-01 : f32
    %308 = vector.broadcast %cst_127 : f32 to vector<1x1xf32>
    %309 = arith.mulf %307, %308 : vector<1x1xf32>
    %c0_128 = arith.constant 0 : index
    %c0_129 = arith.constant 0 : index
    %310 = vector.load %arg12[%c0_128, %c0_129] : memref<1x1xf32, #tpu.memory_space<vmem>>, vector<1x1xf32>
    tpu.vector_store %arg12[%c0_128, %c0_129], %49 {strides = array<i32>} : memref<1x1xf32, #tpu.memory_space<vmem>>, vector<1x1xf32>,
    %c0_130 = arith.constant 0 : index
    %c0_131 = arith.constant 0 : index
    %311 = vector.load %arg13[%c0_130, %c0_131] : memref<1x1xf32, #tpu.memory_space<vmem>>, vector<1x1xf32>
    tpu.vector_store %arg13[%c0_130, %c0_131], %309 {strides = array<i32>} : memref<1x1xf32, #tpu.memory_space<vmem>>, vector<1x1xf32>,
    %cst_132 = arith.constant 1.000000e+00 : f32
    %312 = vector.broadcast %cst_132 : f32 to vector<1x1xf32>
    %313 = arith.mulf %312, %309 : vector<1x1xf32>
    %314 = arith.addf %49, %313 : vector<1x1xf32>
    %c0_133 = arith.constant 0 : index
    %c0_134 = arith.constant 0 : index
    %315 = vector.load %arg11[%c0_133, %c0_134] : memref<1x1xf32, #tpu.memory_space<vmem>>, vector<1x1xf32>
    tpu.vector_store %arg11[%c0_133, %c0_134], %314 {strides = array<i32>} : memref<1x1xf32, #tpu.memory_space<vmem>>, vector<1x1xf32>,
    return
  }
}

</mosaic_0001>

<bundles_post_ra>
// kernel: gckd_forward.1
= control target key start
LH: loop header
LB: loop body
LE: loop exit
PB: predicated region body
PF: predicated region fallthrough
CT: control target
= control target key end

     0   :  { %20 = vsyncpa [#allocation4], 0  ;;  %s7843_s0 = inlined_call_operand.vmem [shape: f32[8,128], index: 0, kind: input, shape index: {}]   ;;  %s7844_s1 = inlined_call_operand.vmem [shape: f32[8,128], index: 1, kind: input, shape index: {}]   ;;  %s7845_s2 = inlined_call_operand.vmem [shape: f32[128,128], index: 2, kind: input, shape index: {}]   ;;  %s7846_s3 = inlined_call_operand.vmem [shape: f32[128,128], index: 3, kind: input, shape index: {}]   ;;  %s7847_s4 = inlined_call_operand.vmem [shape: f32[1,128], index: 4, kind: input, shape index: {}]   ;;  %s7848_s5 = inlined_call_operand.vmem [shape: f32[128,128], index: 5, kind: input, shape index: {}]   ;;  %s7849_s6 = inlined_call_operand.vmem [shape: f32[1,128], index: 6, kind: input, shape index: {}]   ;;  %s7850_s7 = inlined_call_operand.vmem [shape: f32[128,128], index: 7, kind: input, shape index: {}]   ;;  %s7851_s8 = inlined_call_operand.vmem [shape: f32[1,128], index: 8, kind: input, shape index: {}]   ;;  %s7852_s9 = inlined_call_operand.vmem [shape: f32[128,128], index: 9, kind: input, shape index: {}]   ;;  %s7853_s10 = inlined_call_operand.vmem [shape: f32[1,128], index: 10, kind: input, shape index: {}]   ;;  %s7854_s11 = inlined_call_operand.hbm [shape: f32[1,1], index: 11, kind: output, shape index: {0}]   ;;  %s7855_s12 = inlined_call_operand.hbm [shape: f32[1,1], index: 12, kind: output, shape index: {1}]   ;;  %s7856_s13 = inlined_call_operand.hbm [shape: f32[1,1], index: 13, kind: output, shape index: {2}]   ;;  %s7857_s14 = inlined_call_operand.hbm [shape: f32[128,128], index: 14, kind: output, shape index: {3}]  }
   0x1   :  { %21 = vsyncpa [#allocation6], 0  ;;  %v4300_v0 = vld [vmem:[%s7845_s2 + $0x68] sm:$0xff]  ;;  %v4305_v1 = vld [vmem:[%s7843_s0] sm:$0xff] }
   0x2   :  { %319 = vmax.xlane.f32.xlu1 %v4300_v0  ;;  %v47_v2 = vmul.f32 %v4305_v1, %v4305_v1  ;;  %v4313_v3 = vld [vmem:[%s7845_s2 + $0x58] sm:$0xff]  ;;  %v4318_v4 = vld [vmem:[%s7845_s2 + $0x70] sm:$0xff]  ;;  %158 = vst [vmem:[#allocation8 + $0x68] sm:$0xff] %v4300_v0  ;;  %v4324_v5 = vld [vmem:[%s7845_s2 + $0x60] sm:$0xff] }
   0x3   :  { %315 = vmax.xlane.f32.xlu2 %v4313_v3  ;;  %159 = vst [vmem:[#allocation8 + $0x70] sm:$0xff] %v4318_v4  ;;  %3810 = vmatpush.msra.mxu2 %v4318_v4  ;;  %v4333_v6 = vld [vmem:[%s7845_s2 + $0x50] sm:$0xff]  ;;  %v4340_v7 = vld [vmem:[%s7845_s2 + $0x48] sm:$0xff]  ;;  %v4346_v8 = vld [vmem:[%s7845_s2 + $0x40] sm:$0xff] }
   0x4   :  { %48 = vadd.xlane.f32.xlu0 %v47_v2  ;;  %157 = vst [vmem:[#allocation8 + $0x60] sm:$0xff] %v4324_v5  ;;  %v4353_v9 = vld [vmem:[%s7845_s2 + $0x38] sm:$0xff] }
   0x5   :  { %156 = vst [vmem:[#allocation8 + $0x58] sm:$0xff] %v4313_v3  ;;  %3811 = vmatpush.msra.mxu2 %v4300_v0 }
   0x6   :  { %155 = vst [vmem:[#allocation8 + $0x50] sm:$0xff] %v4333_v6 }
   0x7   :  { %154 = vst [vmem:[#allocation8 + $0x48] sm:$0xff] %v4340_v7  ;;  %3812 = vmatpush.msra.mxu2 %v4324_v5 }
   0x8   :  { %153 = vst [vmem:[#allocation8 + $0x40] sm:$0xff] %v4346_v8 }
   0x9   :  { %22 = vsyncpa [#allocation9], 0  ;;  %v4359_v10 = vld [vmem:[%s7845_s2 + $0x30] sm:$0xff]  ;;  %152 = vst [vmem:[#allocation8 + $0x38] sm:$0xff] %v4353_v9  ;;  %3813 = vmatpush.msra.mxu2 %v4313_v3  ;;  %v92_v11 = vld [vmem:[%s7845_s2 + $0x78] sm:$0xff]  ;;  %s3747_s19 = sshll.u32 %s7855_s12, 4  ;;  %s3748_s19 = int_to_ptr.hbm [resolvable:$true] %s3747_s19 }
   0xa   :  { %317 = vmax.xlane.f32.xlu1 %v4324_v5  ;;  %151 = vst [vmem:[#allocation8 + $0x30] sm:$0xff] %v4359_v10  ;;  %v4371_v12 = vld [vmem:[%s7845_s2 + $0x28] sm:$0xff]  ;;  %97 = vmatpush.xpose.msra.mxu0 %v92_v11  ;;  %v4378_v13 = vld [vmem:[%s7845_s2 + $0x20] sm:$0xff]  ;;  %v4385_v14 = vld [vmem:[%s7845_s2 + $0x18] sm:$0xff]  ;;  %s3768_s22 = sshll.u32 %s7857_s14, 4  ;;  %s4217_s23 = smov [#allocation8]   ;;  %s3769_s22 = int_to_ptr.hbm [resolvable:$true] %s3768_s22 }
   0xb   :  { %313 = vmax.xlane.f32.xlu2 %v4333_v6  ;;  %160 = vst [vmem:[#allocation8 + $0x78] sm:$0xff] %v92_v11  ;;  %3814 = vmatpush.msra.mxu2 %v4333_v6  ;;  %v4391_v15 = vld [vmem:[%s7845_s2 + $0x10] sm:$0xff]  ;;  %v4398_v16 = vld [vmem:[%s7845_s2 + $0x8] sm:$0xff]  ;;  %v4423_v17 = vld [vmem:[%s7845_s2] sm:$0xff]  ;;  %s3766_s24 = sshll.u32 %s4217_s23, 4  ;;  %s4218_s25 = smov 128   ;;  %s3767_s24 = int_to_ptr.vmem [resolvable:$true] %s3766_s24 }
   0xc   :  { %321 = vmax.xlane.f32.xlu0 %v4318_v4  ;;  %150 = vst [vmem:[#allocation8 + $0x28] sm:$0xff] %v4371_v12  ;;  %s4219_s26 = smov 8   ;;  %s4220_s12 = smov [#allocation7]  }
   0xd   :  { %149 = vst [vmem:[#allocation8 + $0x20] sm:$0xff] %v4378_v13  ;;  %3815 = vmatpush.msra.mxu2 %v4340_v7  ;;  %s3756_s14 = sshll.u32 %s4220_s12, 4  ;;  %s3758_s27 = sshll.u32 %s7856_s13, 4  ;;  %s3757_s14 = int_to_ptr.vmem [resolvable:$true] %s3756_s14  ;;  %s3759_s27 = int_to_ptr.hbm [resolvable:$true] %s3758_s27 }
   0xe   :  { %148 = vst [vmem:[#allocation8 + $0x18] sm:$0xff] %v4385_v14  ;;  %98 = vmatpush.xpose.msra.mxu0 %v4318_v4  ;;  %s3736_s30 = sshll.u32 %s7854_s11, 4  ;;  %s3737_s30 = int_to_ptr.hbm [resolvable:$true] %s3736_s30 }
   0xf   :  { %147 = vst [vmem:[#allocation8 + $0x10] sm:$0xff] %v4391_v15  ;;  %3816 = vmatpush.msra.mxu2 %v4346_v8 }
  0x10   :  { %146 = vst [vmem:[#allocation8 + $0x8] sm:$0xff] %v4398_v16 }
  0x11   :  { %3817 = vmatpush.msra.mxu2 %v4353_v9 }
  0x12   :  { %309 = vmax.xlane.f32.xlu1 %v4346_v8  ;;  %99 = vmatpush.xpose.msra.mxu0 %v4300_v0 }
  0x13   :  { %307 = vmax.xlane.f32.xlu2 %v4353_v9  ;;  %3818 = vmatpush.msra.mxu2 %v4359_v10 }
  0x14   :  { %311 = vmax.xlane.f32.xlu0 %v4340_v7 }
  0x15   :  { %3819 = vmatpush.msra.mxu2 %v4371_v12 }
  0x16   :  { %100 = vmatpush.xpose.msra.mxu0 %v4324_v5 }
  0x17   :  { %3820 = vmatpush.msra.mxu2 %v4378_v13 }
  0x19   :  { %3821 = vmatpush.msra.mxu2 %v4385_v14 }
  0x1a   :  { %303 = vmax.xlane.f32.xlu1 %v4371_v12  ;;  %101 = vmatpush.xpose.msra.mxu0 %v4313_v3 }
  0x1b   :  { %301 = vmax.xlane.f32.xlu2 %v4378_v13  ;;  %3822 = vmatpush.msra.mxu2 %v4391_v15 }
  0x1c   :  { %305 = vmax.xlane.f32.xlu0 %v4359_v10 }
  0x1d   :  { %3823 = vmatpush.msra.mxu2 %v4398_v16 }
  0x1e   :  { %102 = vmatpush.xpose.msra.mxu0 %v4333_v6 }
  0x1f   :  { %3824 = vmatpush.msra.mxu2 %v4423_v17 }
  0x22   :  { %297 = vmax.xlane.f32.xlu1 %v4391_v15  ;;  %103 = vmatpush.xpose.msra.mxu0 %v4340_v7 }
  0x23   :  { %295 = vmax.xlane.f32.xlu2 %v4398_v16 }
  0x24   :  { %299 = vmax.xlane.f32.xlu0 %v4385_v14 }
  0x26   :  { %104 = vmatpush.xpose.msra.mxu0 %v4346_v8 }
  0x2a   :  { %293 = vmax.xlane.f32.xlu1 %v4423_v17  ;;  %105 = vmatpush.xpose.msra.mxu0 %v4353_v9 }
  0x2e   :  { %106 = vmatpush.xpose.msra.mxu0 %v4359_v10 }
  0x32   :  { %107 = vmatpush.xpose.msra.mxu0 %v4371_v12 }
  0x36   :  { %108 = vmatpush.xpose.msra.mxu0 %v4378_v13 }
  0x3a   :  { %109 = vmatpush.xpose.msra.mxu0 %v4385_v14 }
  0x3e   :  { %110 = vmatpush.xpose.msra.mxu0 %v4391_v15 }
  0x42   :  { %111 = vmatpush.xpose.msra.mxu0 %v4398_v16 }
  0x46   :  { %112 = vmatpush.xpose.msra.mxu0 %v4423_v17 }
  0x75   :  { %v320_v18 = vpop.xlane.xlu1 %319 }
  0x76   :  { %v337_v19 = vsub.f32 %v4300_v0, %v320_v18  ;;  %v316_v20 = vpop.xlane.xlu2 %315 }
  0x77   :  { %v49_v21 = vpop.xlane.xlu0 %48  ;;  %v335_v22 = vsub.f32 %v4313_v3, %v316_v20 }
  0x78   :  { %v367_v23 = vmul.f32 1.442695, %v337_v19  ;;  %v50_v24 = vmax.f32 %v49_v21, 1e-24 }
  0x79   :  { %v363_v25 = vmul.f32 1.442695, %v335_v22 }
  0x7a   :  { %3853 = vpow2.f32 %v367_v23  ;;  %vm57_vm1 = vweird.f32 %v50_v24 }
  0x7b   :  { %3855 = vrsqrt.f32 %v50_v24 }
  0x7c   :  { %3857 = vpow2.f32 %v363_v25 }
  0x7d   :  { %v318_v26 = vpop.xlane.xlu1 %317 }
  0x7e   :  { %v336_v27 = vsub.f32 %v4324_v5, %v318_v26  ;;  %v314_v29 = vpop.xlane.xlu2 %313 }
  0x7f   :  { %v322_v28 = vpop.xlane.xlu0 %321  ;;  %v334_v44 = vsub.f32 %v4333_v6, %v314_v29 }
  0x80   :  { %v4444_v30 = vpop.eup %3853  ;;  %v365_v31 = vmul.f32 1.442695, %v336_v27  ;;  %v338_v32 = vsub.f32 %v4318_v4, %v322_v28 }
  0x81   :  { %v3856_v33 = vpop.eup %3855  ;;  %v385_v34 = vmul.f32 %v4444_v30, %v4444_v30  ;;  %v361_v56 = vmul.f32 1.442695, %v334_v44 }
  0x82   :  { %v52_v35 = vmul.f32 %v3856_v33, %v50_v24  ;;  %3859 = vpow2.f32 %v365_v31  ;;  %v369_v36 = vmul.f32 1.442695, %v338_v32  ;;  %v4449_v37 = vpop.eup %3857  ;;  %vm58_vm0 = vweird.f32 %v3856_v33 }
  0x83   :  { %415 = vadd.xlane.f32.xlu2 %v385_v34  ;;  %v383_v43 = vmul.f32 %v4449_v37, %v4449_v37  ;;  %vm59_vm2 = vmor %vm57_vm1, %vm58_vm0 }
  0x84   :  { %v53_v38 = vmul.f32 %v3856_v33, %v52_v35  ;;  %3861 = vpow2.f32 %v369_v36 }
  0x85   :  { %v310_v39 = vpop.xlane.xlu1 %309 }
  0x86   :  { %v54_v40 = vmul.f32 0.5, %v53_v38  ;;  %v332_v41 = vsub.f32 %v4346_v8, %v310_v39  ;;  %v308_v50 = vpop.xlane.xlu2 %307 }
  0x87   :  { %v312_v42 = vpop.xlane.xlu0 %311  ;;  %v331_v2 = vsub.f32 %v4353_v9, %v308_v50 }
  0x88   :  { %v4455_v45 = vpop.eup %3859  ;;  %v55_v46 = vsub.f32 1.5, %v54_v40  ;;  %v357_v47 = vmul.f32 1.442695, %v332_v41  ;;  %v333_v48 = vsub.f32 %v4340_v7, %v312_v42 }
  0x89   :  { %v384_v49 = vmul.f32 %v4455_v45, %v4455_v45  ;;  %v355_v21 = vmul.f32 1.442695, %v331_v2 }
  0x8a   :  { %v4460_v51 = vpop.eup %3861  ;;  %v56_v52 = vmul.f32 %v3856_v33, %v55_v46  ;;  %3863 = vpow2.f32 %v357_v47  ;;  %v359_v53 = vmul.f32 1.442695, %v333_v48 }
  0x8b   :  { %411 = vadd.xlane.f32.xlu2 %v383_v43  ;;  %413 = vadd.xlane.f32.xlu1 %v384_v49  ;;  %v386_v54 = vmul.f32 %v4460_v51, %v4460_v51 }
  0x8c   :  { %v60_v55 = vsel %vm59_vm2, %v3856_v33, %v56_v52  ;;  %3865 = vpow2.f32 %v359_v53 }
  0x8d   :  { %v4465_v57 = vmul.f32 %v60_v55, %v4305_v1  ;;  %v304_v58 = vpop.xlane.xlu1 %303  ;;  %417 = vadd.xlane.f32.xlu0 %v386_v54  ;;  %3867 = vpow2.f32 %v361_v56 }
  0x8e   :  { %v329_v59 = vsub.f32 %v4371_v12, %v304_v58  ;;  %v302_v20 = vpop.xlane.xlu2 %301 }
  0x8f   :  { %7916 = vst [vmem:[#allocation13_spill] sm:$0xff] %v4465_v57  ;;  %113 = vmatmul.f32.vlgmr.msra.gmra.mxu0 %v4465_v57  ;;  %3825 = vmatpush.msra.mxu2 %v4465_v57  ;;  %v306_v60 = vpop.xlane.xlu0 %305  ;;  %v328_v29 = vsub.f32 %v4378_v13, %v302_v20 }
  0x90   :  { %v4470_v61 = vpop.eup %3863  ;;  %v351_v62 = vmul.f32 1.442695, %v329_v59  ;;  %v330_v63 = vsub.f32 %v4359_v10, %v306_v60 }
  0x91   :  { %v380_v1 = vmul.f32 %v4470_v61, %v4470_v61  ;;  %v349_v36 = vmul.f32 1.442695, %v328_v29 }
  0x92   :  { %v4476_v11 = vpop.eup %3865  ;;  %3869 = vpow2.f32 %v351_v62  ;;  %v353_v18 = vmul.f32 1.442695, %v330_v63 }
  0x93   :  { %405 = vadd.xlane.f32.xlu2 %v380_v1  ;;  %v381_v19 = vmul.f32 %v4476_v11, %v4476_v11  ;;  %v4481_v23 = vpop.eup %3867 }
  0x94   :  { %3871 = vpow2.f32 %v353_v18  ;;  %v382_v32 = vmul.f32 %v4481_v23, %v4481_v23 }
  0x95   :  { %v298_v22 = vpop.xlane.xlu1 %297  ;;  %291 = vmax.xlane.f32.xlu0 %v4465_v57  ;;  %407 = vadd.xlane.f32.xlu1 %v381_v19  ;;  %3873 = vpow2.f32 %v355_v21 }
  0x96   :  { %v326_v24 = vsub.f32 %v4391_v15, %v298_v22  ;;  %v296_v39 = vpop.xlane.xlu2 %295 }
  0x97   :  { %v300_v25 = vpop.xlane.xlu0 %299  ;;  %v325_v44 = vsub.f32 %v4398_v16, %v296_v39 }
  0x98   :  { %v4484_v26 = vpop.eup %3869  ;;  %v345_v27 = vmul.f32 1.442695, %v326_v24  ;;  %v327_v28 = vsub.f32 %v4385_v14, %v300_v25 }
  0x99   :  { %v377_v31 = vmul.f32 %v4484_v26, %v4484_v26  ;;  %v343_v50 = vmul.f32 1.442695, %v325_v44 }
  0x9a   :  { %v4492_v33 = vpop.eup %3871  ;;  %3875 = vpow2.f32 %v345_v27  ;;  %v347_v34 = vmul.f32 1.442695, %v327_v28 }
  0x9b   :  { %399 = vadd.xlane.f32.xlu2 %v377_v31  ;;  %v378_v35 = vmul.f32 %v4492_v33, %v4492_v33  ;;  %v4496_v40 = vpop.eup %3873 }
  0x9c   :  { %3877 = vpow2.f32 %v347_v34  ;;  %v379_v47 = vmul.f32 %v4496_v40, %v4496_v40 }
  0x9d   :  { %409 = vadd.xlane.f32.xlu0 %v382_v32  ;;  %401 = vadd.xlane.f32.xlu1 %v378_v35  ;;  %v294_v38 = vpop.xlane.xlu1 %293  ;;  %3879 = vpow2.f32 %v349_v36 }
  0x9e   :  { %v324_v41 = vsub.f32 %v4423_v17, %v294_v38 }
  0xa0   :  { %v4499_v42 = vpop.eup %3875  ;;  %v341_v43 = vmul.f32 1.442695, %v324_v41 }
  0xa1   :  { %v374_v46 = vmul.f32 %v4499_v42, %v4499_v42 }
  0xa2   :  { %v4506_v48 = vpop.eup %3877  ;;  %3881 = vpow2.f32 %v341_v43 }
  0xa3   :  { %393 = vadd.xlane.f32.xlu2 %v374_v46  ;;  %v375_v49 = vmul.f32 %v4506_v48, %v4506_v48  ;;  %v4510_v52 = vpop.eup %3879  ;;  %3883 = vpow2.f32 %v343_v50 }
  0xa4   :  { %v376_v54 = vmul.f32 %v4510_v52, %v4510_v52 }
  0xa5   :  { %403 = vadd.xlane.f32.xlu0 %v379_v47  ;;  %395 = vadd.xlane.f32.xlu1 %v375_v49 }
  0xa8   :  { %v4512_v53 = vpop.eup %3881 }
  0xa9   :  { %v372_v55 = vmul.f32 %v4512_v53, %v4512_v53  ;;  %v4518_v56 = vpop.eup %3883 }
  0xaa   :  { %v373_v58 = vmul.f32 %v4518_v56, %v4518_v56 }
  0xad   :  { %397 = vadd.xlane.f32.xlu0 %v376_v54  ;;  %389 = vadd.xlane.f32.xlu1 %v372_v55 }
  0xb5   :  { %391 = vadd.xlane.f32.xlu0 %v373_v58 }
  0xf6   :  { %v416_v59 = vpop.xlane.xlu2 %415 }
  0xf7   :  { %3885 = vrsqrt.f32 %v416_v59  ;;  %vm565_vm3 = vweird.f32 %v416_v59 }
  0xfd   :  { %v4522_v60 = vpop.eup %3885 }
  0xfe   :  { %v4524_v62 = vpop.xlane.xlu2 %411  ;;  %v414_v63 = vpop.xlane.xlu1 %413  ;;  %v560_v2 = vmul.f32 %v4522_v60, %v416_v59  ;;  %vm566_vm4 = vweird.f32 %v4522_v60 }
  0xff   :  { %3887 = vrsqrt.f32 %v4524_v62  ;;  %vm4551_vm7 = vmor %vm565_vm3, %vm566_vm4  ;;  %vm555_vm9 = vweird.f32 %v414_v63  ;;  %vm545_vm12 = vweird.f32 %v4524_v62 }
 0x100   :  { %3889 = vrsqrt.f32 %v414_v63  ;;  %v418_v1 = vpop.xlane.xlu0 %417  ;;  %v561_v18 = vmul.f32 %v4522_v60, %v560_v2 }
 0x101   :  { %3891 = vrsqrt.f32 %v418_v1  ;;  %vm575_vm6 = vweird.f32 %v418_v1 }
 0x102   :  { %v562_v22 = vmul.f32 0.5, %v561_v18 }
 0x104   :  { %v563_v36 = vsub.f32 1.5, %v562_v22 }
 0x105   :  { %v4529_v19 = vpop.eup %3887 }
 0x106   :  { %v4531_v20 = vpop.eup %3889  ;;  %v4534_v25 = vpop.xlane.xlu2 %405  ;;  %v540_v27 = vmul.f32 %v4529_v19, %v4524_v62  ;;  %v564_v47 = vmul.f32 %v4522_v60, %v563_v36  ;;  %vm546_vm13 = vweird.f32 %v4529_v19 }
 0x107   :  { %v3892_v21 = vpop.eup %3891  ;;  %v550_v24 = vmul.f32 %v4531_v20, %v414_v63  ;;  %vm556_vm10 = vweird.f32 %v4531_v20  ;;  %vm547_vm14 = vmor %vm545_vm12, %vm546_vm13 }
 0x108   :  { %v570_v28 = vmul.f32 %v3892_v21, %v418_v1  ;;  %v4538_v29 = vpop.xlane.xlu1 %407  ;;  %v292_v31 = vpop.xlane.xlu0 %291  ;;  %v541_v39 = vmul.f32 %v4529_v19, %v540_v27  ;;  %vm576_vm5 = vweird.f32 %v3892_v21  ;;  %v568_v27 = vsel %vm4551_vm7, %v4522_v60, %v564_v47  ;;  %vm4578_vm11 = vmor %vm555_vm9, %vm556_vm10 }
 0x109   :  { %v551_v32 = vmul.f32 %v4531_v20, %v550_v24  ;;  %3893 = vrsqrt.f32 %v4538_v29  ;;  %v323_v34 = vsub.f32 %v4465_v57, %v292_v31  ;;  %vm577_vm8 = vmor %vm575_vm6, %vm576_vm5  ;;  %v4586_v60 = vmul.f32 %v4444_v30, %v568_v27 }
 0x10a   :  { %v571_v35 = vmul.f32 %v3892_v21, %v570_v28  ;;  %3895 = vrsqrt.f32 %v4534_v25  ;;  %v542_v49 = vmul.f32 0.5, %v541_v39  ;;  %vm525_vm1 = vweird.f32 %v4538_v29 }
 0x10b   :  { %v339_v38 = vmul.f32 1.442695, %v323_v34  ;;  %v552_v41 = vmul.f32 0.5, %v551_v32  ;;  %vm515_vm5 = vweird.f32 %v4534_v25 }
 0x10c   :  { %v572_v43 = vmul.f32 0.5, %v571_v35  ;;  %v543_v28 = vsub.f32 1.5, %v542_v49 }
 0x10d   :  { %3897 = vpow2.f32 %v339_v38  ;;  %v553_v50 = vsub.f32 1.5, %v552_v41 }
 0x10e   :  { %v573_v44 = vsub.f32 1.5, %v572_v43  ;;  %v4571_v32 = vpop.xlane.xlu2 %399  ;;  %v544_v41 = vmul.f32 %v4529_v19, %v543_v28 }
 0x10f   :  { %v4546_v46 = vpop.eup %3893 }
 0x110   :  { %v4549_v54 = vpop.xlane.xlu1 %401  ;;  %v410_v55 = vpop.xlane.xlu0 %409  ;;  %v574_v58 = vmul.f32 %v3892_v21, %v573_v44  ;;  %v520_v18 = vmul.f32 %v4546_v46, %v4538_v29  ;;  %vm526_vm2 = vweird.f32 %v4546_v46 }
 0x111   :  { %v4555_v59 = vpop.eup %3895  ;;  %3899 = vrsqrt.f32 %v410_v55  ;;  %vm535_vm15 = vweird.f32 %v410_v55  ;;  %vm4632_vm4 = vmor %vm525_vm1, %vm526_vm2 }
 0x112   :  { %v578_v22 = vsel %vm577_vm8, %v3892_v21, %v574_v58  ;;  %3901 = vrsqrt.f32 %v4549_v54  ;;  %v510_v31 = vmul.f32 %v4555_v59, %v4534_v25  ;;  %v554_v21 = vmul.f32 %v4531_v20, %v553_v50 }
 0x113   :  { %v4560_v24 = vpop.eup %3897  ;;  %v4564_v1 = vmul.f32 %v4460_v51, %v578_v22  ;;  %v521_v34 = vmul.f32 %v4546_v46, %v520_v18  ;;  %3903 = vrsqrt.f32 %v4571_v32  ;;  %vm516_vm6 = vweird.f32 %v4555_v59 }
 0x114   :  { %v371_v63 = vmul.f32 %v4560_v24, %v4560_v24  ;;  %v511_v36 = vmul.f32 %v4555_v59, %v510_v31  ;;  %v558_v39 = vsel %vm4578_vm11, %v4531_v20, %v554_v21  ;;  %v548_v20 = vsel %vm547_vm14, %v4529_v19, %v544_v41  ;;  %vm4648_vm7 = vmor %vm515_vm5, %vm516_vm6 }
 0x115   :  { %595 = vmatpush.xpose.msra.mxu1 %v4564_v1  ;;  %v522_v62 = vmul.f32 0.5, %v521_v34  ;;  %v4600_v47 = vmul.f32 %v4455_v45, %v558_v39  ;;  %v4611_v45 = vmul.f32 %v4449_v37, %v548_v20  ;;  %vm495_vm11 = vweird.f32 %v4549_v54 }
 0x116   :  { %387 = vadd.xlane.f32.xlu2 %v371_v63  ;;  %v512_v49 = vmul.f32 0.5, %v511_v36  ;;  %v4620_v21 = vpop.xlane.xlu2 %393  ;;  %vm485_vm14 = vweird.f32 %v4571_v32 }
 0x117   :  { %v3900_v35 = vpop.eup %3899  ;;  %v523_v2 = vsub.f32 1.5, %v522_v62 }
 0x118   :  { %v4589_v38 = vpop.xlane.xlu0 %403  ;;  %v4595_v43 = vpop.eup %3901  ;;  %v530_v44 = vmul.f32 %v3900_v35, %v410_v55  ;;  %vm536_vm0 = vweird.f32 %v3900_v35  ;;  %v513_v19 = vsub.f32 1.5, %v512_v49 }
 0x119   :  { %596 = vmatpush.xpose.msra.mxu1 %v4586_v60  ;;  %3905 = vrsqrt.f32 %v4589_v38  ;;  %v490_v50 = vmul.f32 %v4595_v43, %v4549_v54  ;;  %v4605_v58 = vpop.eup %3903  ;;  %v4607_v22 = vpop.xlane.xlu1 %395  ;;  %vm537_vm3 = vmor %vm535_vm15, %vm536_vm0  ;;  %v524_v51 = vmul.f32 %v4546_v46, %v523_v2  ;;  %vm505_vm8 = vweird.f32 %v4589_v38 }
 0x11a   :  { %v531_v30 = vmul.f32 %v3900_v35, %v530_v44  ;;  %v480_v31 = vmul.f32 %v4605_v58, %v4571_v32  ;;  %3907 = vrsqrt.f32 %v4607_v22  ;;  %v514_v29 = vmul.f32 %v4555_v59, %v513_v19 }
 0x11b   :  { %v491_v63 = vmul.f32 %v4595_v43, %v490_v50  ;;  %v528_v25 = vsel %vm4632_vm4, %v4546_v46, %v524_v51  ;;  %vm496_vm12 = vweird.f32 %v4595_v43  ;;  %vm486_vm15 = vweird.f32 %v4605_v58 }
 0x11c   :  { %v532_v18 = vmul.f32 0.5, %v531_v30  ;;  %v481_v62 = vmul.f32 %v4605_v58, %v480_v31  ;;  %v4662_v46 = vmul.f32 %v4476_v11, %v528_v25  ;;  %v518_v19 = vsel %vm4648_vm7, %v4555_v59, %v514_v29  ;;  %vm4699_vm13 = vmor %vm495_vm11, %vm496_vm12 }
 0x11d   :  { %597 = vmatpush.xpose.msra.mxu1 %v4600_v47  ;;  %v492_v44 = vmul.f32 0.5, %v491_v63  ;;  %vm4714_vm0 = vmor %vm485_vm14, %vm486_vm15  ;;  %vm465_vm4 = vweird.f32 %v4607_v22  ;;  %vm455_vm7 = vweird.f32 %v4620_v21 }
 0x11e   :  { %v533_v27 = vsub.f32 1.5, %v532_v18  ;;  %v482_v2 = vmul.f32 0.5, %v481_v62 }
 0x11f   :  { %v4615_v28 = vpop.eup %3905  ;;  %v493_v18 = vsub.f32 1.5, %v492_v44 }
 0x120   :  { %v4623_v55 = vpop.xlane.xlu0 %397  ;;  %v500_v37 = vmul.f32 %v4615_v28, %v4589_v38  ;;  %v534_v34 = vmul.f32 %v3900_v35, %v533_v27  ;;  %v4652_v20 = vpop.eup %3907  ;;  %vm506_vm9 = vweird.f32 %v4615_v28  ;;  %v483_v36 = vsub.f32 1.5, %v482_v2 }
 0x121   :  { %598 = vmatpush.xpose.msra.mxu1 %v4611_v45  ;;  %3909 = vrsqrt.f32 %v4623_v55  ;;  %v460_v63 = vmul.f32 %v4652_v20, %v4607_v22  ;;  %vm4680_vm10 = vmor %vm505_vm8, %vm506_vm9  ;;  %v494_v54 = vmul.f32 %v4595_v43, %v493_v18  ;;  %vm475_vm1 = vweird.f32 %v4623_v55 }
 0x122   :  { %3911 = vrsqrt.f32 %v4620_v21  ;;  %v501_v39 = vmul.f32 %v4615_v28, %v500_v37  ;;  %v538_v41 = vsel %vm537_vm3, %v3900_v35, %v534_v34  ;;  %v4671_v37 = vpop.xlane.xlu1 %389  ;;  %vm466_vm5 = vweird.f32 %v4652_v20 }
 0x123   :  { %v4642_v30 = vmul.f32 %v4481_v23, %v538_v41  ;;  %v4691_v41 = vmul.f32 %v4470_v61, %v518_v19  ;;  %v461_v38 = vmul.f32 %v4652_v20, %v460_v63  ;;  %v498_v18 = vsel %vm4699_vm13, %v4595_v43, %v494_v54  ;;  %vm467_vm6 = vmor %vm465_vm4, %vm466_vm5 }
 0x124   :  { %v502_v49 = vmul.f32 0.5, %v501_v39  ;;  %v4722_v63 = vmul.f32 %v4492_v33, %v498_v18  ;;  %vm435_vm13 = vweird.f32 %v4671_v37 }
 0x125   :  { %599 = vmatpush.xpose.msra.mxu1 %v4642_v30  ;;  %v462_v50 = vmul.f32 0.5, %v461_v38 }
 0x126   :  { %v503_v35 = vsub.f32 1.5, %v502_v49 }
 0x127   :  { %v4657_v23 = vpop.eup %3909  ;;  %v463_v43 = vsub.f32 1.5, %v462_v50 }
 0x128   :  { %v4659_v27 = vpop.xlane.xlu0 %391  ;;  %v4667_v31 = vpop.eup %3911  ;;  %v470_v34 = vmul.f32 %v4657_v23, %v4623_v55  ;;  %v504_v51 = vmul.f32 %v4615_v28, %v503_v35  ;;  %vm476_vm2 = vweird.f32 %v4657_v23 }
 0x129   :  { %3913 = vrsqrt.f32 %v4659_v27  ;;  %600 = vmatpush.xpose.msra.mxu1 %v4662_v46  ;;  %v450_v39 = vmul.f32 %v4667_v31, %v4620_v21  ;;  %vm477_vm3 = vmor %vm475_vm1, %vm476_vm2  ;;  %v464_v38 = vmul.f32 %v4652_v20, %v463_v43  ;;  %vm456_vm8 = vweird.f32 %v4667_v31 }
 0x12a   :  { %v471_v59 = vmul.f32 %v4657_v23, %v470_v34  ;;  %3915 = vrsqrt.f32 %v4671_v37  ;;  %v508_v44 = vsel %vm4680_vm10, %v4615_v28, %v504_v51  ;;  %v484_v28 = vmul.f32 %v4605_v58, %v483_v36  ;;  %vm457_vm9 = vmor %vm455_vm7, %vm456_vm8 }
 0x12b   :  { %v451_v49 = vmul.f32 %v4667_v31, %v450_v39  ;;  %v4707_v25 = vmul.f32 %v4496_v40, %v508_v44  ;;  %vm445_vm10 = vweird.f32 %v4659_v27 }
 0x12c   :  { %v472_v62 = vmul.f32 0.5, %v471_v59  ;;  %v488_v34 = vsel %vm4714_vm0, %v4605_v58, %v484_v28 }
 0x12d   :  { %601 = vmatpush.xpose.msra.mxu1 %v4691_v41  ;;  %v452_v40 = vmul.f32 0.5, %v451_v49  ;;  %v4733_v33 = vmul.f32 %v4484_v26, %v488_v34  ;;  %v468_v26 = vsel %vm467_vm6, %v4652_v20, %v464_v38 }
 0x12e   :  { %v473_v35 = vsub.f32 1.5, %v472_v62 }
 0x12f   :  { %v3914_v61 = vpop.eup %3913  ;;  %v453_v55 = vsub.f32 1.5, %v452_v40 }
 0x130   :  { %v440_v2 = vmul.f32 %v3914_v61, %v4659_v27  ;;  %v3916_v19 = vpop.eup %3915  ;;  %v474_v59 = vmul.f32 %v4657_v23, %v473_v35  ;;  %vm446_vm11 = vweird.f32 %v3914_v61 }
 0x131   :  { %602 = vmatpush.xpose.msra.mxu1 %v4707_v25  ;;  %v430_v51 = vmul.f32 %v3916_v19, %v4671_v37  ;;  %v454_v54 = vmul.f32 %v4667_v31, %v453_v55  ;;  %vm447_vm12 = vmor %vm445_vm10, %vm446_vm11  ;;  %vm436_vm14 = vweird.f32 %v3916_v19 }
 0x132   :  { %v441_v11 = vmul.f32 %v3914_v61, %v440_v2  ;;  %v478_v58 = vsel %vm477_vm3, %v4657_v23, %v474_v59  ;;  %v583_v23 = vmul.f32 %v4506_v48, %v468_v26  ;;  %vm437_vm15 = vmor %vm435_vm13, %vm436_vm14 }
 0x133   :  { %v431_v36 = vmul.f32 %v3916_v19, %v430_v51  ;;  %v4741_v22 = vmul.f32 %v4510_v52, %v478_v58  ;;  %v458_v29 = vsel %vm457_vm9, %v4667_v31, %v454_v54 }
 0x134   :  { %v442_v39 = vmul.f32 0.5, %v441_v11  ;;  %v582_v52 = vmul.f32 %v4499_v42, %v458_v29 }
 0x135   :  { %603 = vmatpush.xpose.msra.mxu1 %v4722_v63  ;;  %v432_v62 = vmul.f32 0.5, %v431_v36 }
 0x136   :  { %v443_v44 = vsub.f32 1.5, %v442_v39 }
 0x137   :  { %v433_v21 = vsub.f32 1.5, %v432_v62 }
 0x138   :  { %v444_v49 = vmul.f32 %v3914_v61, %v443_v44 }
 0x139   :  { %604 = vmatpush.xpose.msra.mxu1 %v4733_v33  ;;  %v434_v28 = vmul.f32 %v3916_v19, %v433_v21 }
 0x13a   :  { %v448_v20 = vsel %vm447_vm12, %v3914_v61, %v444_v49 }
 0x13b   :  { %v581_v27 = vmul.f32 %v4518_v56, %v448_v20  ;;  %v438_v50 = vsel %vm437_vm15, %v3916_v19, %v434_v28 }
 0x13c   :  { %v580_v48 = vmul.f32 %v4512_v53, %v438_v50 }
 0x13d   :  { %605 = vmatpush.xpose.msra.mxu1 %v4741_v22 }
 0x141   :  { %606 = vmatpush.xpose.msra.mxu1 %v583_v23 }
 0x145   :  { %607 = vmatpush.xpose.msra.mxu1 %v582_v52 }
 0x149   :  { %608 = vmatpush.xpose.msra.mxu1 %v581_v27 }
 0x14d   :  { %609 = vmatpush.xpose.msra.mxu1 %v580_v48 }
 0x189   :  { %v388_v31 = vpop.xlane.xlu2 %387 }
 0x18a   :  { %3917 = vrsqrt.f32 %v388_v31  ;;  %vm425_vm1 = vweird.f32 %v388_v31 }
 0x190   :  { %v3918_v35 = vpop.eup %3917 }
 0x191   :  { %v420_v2 = vmul.f32 %v3918_v35, %v388_v31  ;;  %vm426_vm0 = vweird.f32 %v3918_v35 }
 0x192   :  { %vm427_vm2 = vmor %vm425_vm1, %vm426_vm0 }
 0x193   :  { %v421_v18 = vmul.f32 %v3918_v35, %v420_v2 }
 0x195   :  { %v422_v37 = vmul.f32 0.5, %v421_v18 }
 0x197   :  { %v423_v32 = vsub.f32 1.5, %v422_v37 }
 0x199   :  { %v424_v42 = vmul.f32 %v3918_v35, %v423_v32 }
 0x19b   :  { %v428_v61 = vsel %vm427_vm2, %v3918_v35, %v424_v42 }
 0x19c   :  { %v579_v40 = vmul.f32 %v4560_v24, %v428_v61 }
 0x19e   :  { %610 = vmatpush.xpose.msra.mxu1 %v579_v40 }
 0x1a1   :  { %611 = vmatmul.f32.vlgmr.msra.gmra.mxu1 %v579_v40 }
 0x1a2   :  { %1540 = vmatpush.msrb.mxu1 %v4318_v4 }
 0x1a4   :  { %1541 = vmatpush.msrb.mxu1 %v4300_v0 }
 0x1a6   :  { %1542 = vmatpush.msrb.mxu1 %v4324_v5 }
 0x1a8   :  { %1543 = vmatpush.msrb.mxu1 %v4313_v3 }
 0x1a9   :  { %614 = vmatmul.f32.gmra.mxu1 %v580_v48 }
 0x1aa   :  { %1544 = vmatpush.msrb.mxu1 %v4333_v6 }
 0x1ac   :  { %1545 = vmatpush.msrb.mxu1 %v4340_v7 }
 0x1ae   :  { %1546 = vmatpush.msrb.mxu1 %v4346_v8 }
 0x1b0   :  { %1547 = vmatpush.msrb.mxu1 %v4353_v9 }
 0x1b1   :  { %617 = vmatmul.f32.gmra.mxu1 %v581_v27 }
 0x1b2   :  { %1548 = vmatpush.msrb.mxu1 %v4359_v10 }
 0x1b4   :  { %1549 = vmatpush.msrb.mxu1 %v4371_v12 }
 0x1b6   :  { %1550 = vmatpush.msrb.mxu1 %v4378_v13 }
 0x1b8   :  { %1551 = vmatpush.msrb.mxu1 %v4385_v14 }
 0x1b9   :  { %620 = vmatmul.f32.gmra.mxu1 %v582_v52 }
 0x1ba   :  { %1552 = vmatpush.msrb.mxu1 %v4391_v15 }
 0x1bc   :  { %1553 = vmatpush.msrb.mxu1 %v4398_v16 }
 0x1be   :  { %1554 = vmatpush.msrb.mxu1 %v4423_v17 }
 0x1c0   :  { %1555 = vmatpush.msrb.mxu1 %v4465_v57 }
 0x1c1   :  { %623 = vmatmul.f32.gmra.mxu1 %v583_v23 }
 0x1c2   :  { %3122 = vmatpush.msra.mxu1 %v4318_v4 }
 0x1c4   :  { %3123 = vmatpush.msra.mxu1 %v4300_v0  ;;  %v118_v0 = vlaneseq }
 0x1c6   :  { %3124 = vmatpush.msra.mxu1 %v4324_v5  ;;  %v4797_v4 = vand.u32 127, %v118_v0  ;;  %v7875_v5 = vmov 0.0  }
 0x1c8   :  { %3125 = vmatpush.msra.mxu1 %v4313_v3  ;;  %v4795_v3 = vshrl.u32 %v118_v0, 7  ;;  %7932 = vst [vmem:[#allocation15_spill] sm:$0xff] %v4797_v4 }
 0x1c9   :  { %626 = vmatmul.f32.gmra.mxu1 %v4741_v22 }
 0x1ca   :  { %3126 = vmatpush.msra.mxu1 %v4333_v6  ;;  %7931 = vst [vmem:[#allocation14_spill] sm:$0xff] %v4795_v3  ;;  %vm209_vm3 = vcmp.ne.s32.totalorder %v4795_v3, %v4797_v4  ;;  %v197_v19 = vadd.s32 32, %v4795_v3  ;;  %v198_v55 = vadd.s32 40, %v4795_v3  ;;  %v199_v62 = vadd.s32 48, %v4795_v3 }
 0x1cb   :  { %v4803_v6 = vsel %vm209_vm3, 1.0, %v7875_v5  ;;  %v200_v49 = vadd.s32 56, %v4795_v3  ;;  %v201_v31 = vadd.s32 64, %v4795_v3  ;;  %v202_v61 = vadd.s32 72, %v4795_v3 }
 0x1cc   :  { %3127 = vmatpush.msra.mxu1 %v4340_v7  ;;  %v194_v7 = vadd.s32 8, %v4795_v3  ;;  %vm213_vm7 = vcmp.ne.s32.totalorder %v197_v19, %v4797_v4  ;;  %vm214_vm8 = vcmp.ne.s32.totalorder %v198_v55, %v4797_v4  ;;  %vm215_vm9 = vcmp.ne.s32.totalorder %v199_v62, %v4797_v4 }
 0x1cd   :  { %v4850_v59 = vsel %vm213_vm7, 1.0, %v7875_v5  ;;  %v4862_v22 = vsel %vm214_vm8, 1.0, %v7875_v5  ;;  %v4874_v29 = vsel %vm215_vm9, 1.0, %v7875_v5  ;;  %vm216_vm10 = vcmp.ne.s32.totalorder %v200_v49, %v4797_v4 }
 0x1ce   :  { %3128 = vmatpush.msra.mxu1 %v4346_v8  ;;  %vm210_vm4 = vcmp.ne.s32.totalorder %v194_v7, %v4797_v4  ;;  %v7872_v39 = vsub.f32 1.0, %v4850_v59  ;;  %v7870_v54 = vsub.f32 1.0, %v4862_v22  ;;  %v7869_v28 = vsub.f32 1.0, %v4874_v29 }
 0x1cf   :  { %v4886_v48 = vsel %vm216_vm10, 1.0, %v7875_v5  ;;  %vm217_vm11 = vcmp.ne.s32.totalorder %v201_v31, %v4797_v4  ;;  %vm218_vm12 = vcmp.ne.s32.totalorder %v202_v61, %v4797_v4  ;;  %v207_v61 = vadd.s32 112, %v4795_v3 }
 0x1d0   :  { %3129 = vmatpush.msra.mxu1 %v4353_v9  ;;  %v7867_v18 = vsub.f32 1.0, %v4886_v48  ;;  %v4898_v42 = vsel %vm217_vm11, 1.0, %v7875_v5 }
 0x1d1   :  { %629 = vmatmul.f32.gmra.mxu1 %v4733_v33  ;;  %v7865_v7 = vsub.f32 1.0, %v4898_v42  ;;  %vm223_vm1 = vcmp.ne.s32.totalorder %v207_v61, %v4797_v4 }
 0x1d2   :  { %3130 = vmatpush.msra.mxu1 %v4359_v10  ;;  %v7879_v10 = vsub.f32 1.0, %v4803_v6 }
 0x1d4   :  { %3131 = vmatpush.msra.mxu1 %v4371_v12 }
 0x1d6   :  { %3132 = vmatpush.msra.mxu1 %v4378_v13 }
 0x1d8   :  { %3133 = vmatpush.msra.mxu1 %v4385_v14  ;;  %v4814_v14 = vsel %vm210_vm4, 1.0, %v7875_v5 }
 0x1d9   :  { %632 = vmatmul.f32.gmra.mxu1 %v4722_v63  ;;  %v7878_v53 = vsub.f32 1.0, %v4814_v14 }
 0x1da   :  { %3134 = vmatpush.msra.mxu1 %v4391_v15  ;;  %v195_v15 = vadd.s32 16, %v4795_v3 }
 0x1dc   :  { %3135 = vmatpush.msra.mxu1 %v4398_v16  ;;  %vm211_vm5 = vcmp.ne.s32.totalorder %v195_v15, %v4797_v4  ;;  %v203_v15 = vadd.s32 80, %v4795_v3 }
 0x1de   :  { %3136 = vmatpush.msra.mxu1 %v4423_v17  ;;  %vm219_vm13 = vcmp.ne.s32.totalorder %v203_v15, %v4797_v4 }
 0x1e1   :  { %635 = vmatmul.f32.gmra.mxu1 %v4707_v25 }
 0x1e9   :  { %638 = vmatmul.f32.gmra.mxu1 %v4691_v41 }
 0x1f1   :  { %641 = vmatmul.f32.gmra.mxu1 %v4662_v46 }
 0x1f9   :  { %644 = vmatmul.f32.gmra.mxu1 %v4642_v30 }
 0x201   :  { %647 = vmatmul.f32.gmra.mxu1 %v4611_v45 }
 0x209   :  { %650 = vmatmul.f32.gmra.mxu1 %v4600_v47 }
 0x211   :  { %653 = vmatmul.f32.gmra.mxu1 %v4586_v60  ;;  %v196_v60 = vadd.s32 24, %v4795_v3 }
 0x213   :  { %vm212_vm6 = vcmp.ne.s32.totalorder %v196_v60, %v4797_v4 }
 0x214   :  { %v4838_v25 = vsel %vm212_vm6, 1.0, %v7875_v5 }
 0x215   :  { %v7874_v43 = vsub.f32 1.0, %v4838_v25 }
 0x219   :  { %656 = vmatmul.f32.gmra.mxu1 %v4564_v1  ;;  %v4826_v1 = vsel %vm211_vm5, 1.0, %v7875_v5 }
 0x21a   :  { %v7877_v30 = vsub.f32 1.0, %v4826_v1 }
 0x21e   :  { %v612_v8 = vpop.f32.mrf.mxu1 }
 0x21f   :  { %v660_v9 = vsub.f32 1.0, %v612_v8 }
 0x221   :  { %v676_v12 = vmul.f32 %v4803_v6, %v660_v9 }
 0x223   :  { %v4811_v13 = vsub.f32 %v676_v12, %v7879_v10  ;;  %v4910_v12 = vsel %vm218_vm12, 1.0, %v7875_v5 }
 0x224   :  { %7933 = vst [vmem:[#allocation16_spill] sm:$0xff] %v4910_v12 }
 0x225   :  { %708 = vmin.xlane.f32.xlu0 %v4811_v13 }
 0x226   :  { %v615_v16 = vpop.f32.mrf.mxu1 }
 0x227   :  { %v661_v17 = vsub.f32 1.0, %v615_v16 }
 0x229   :  { %v677_v56 = vmul.f32 %v4814_v14, %v661_v17 }
 0x22b   :  { %v4823_v24 = vsub.f32 %v677_v56, %v7878_v53  ;;  %v7864_v56 = vsub.f32 1.0, %v4910_v12  ;;  %v5737_v53 = vld [vmem:[#allocation8 + $0x8] sm:$0xff] }
 0x22d   :  { %710 = vmin.xlane.f32.xlu1 %v4823_v24 }
 0x22e   :  { %v618_v47 = vpop.f32.mrf.mxu1 }
 0x22f   :  { %v662_v45 = vsub.f32 1.0, %v618_v47 }
 0x231   :  { %v678_v46 = vmul.f32 %v4826_v1, %v662_v45  ;;  %v4922_v45 = vsel %vm219_vm13, 1.0, %v7875_v5 }
 0x232   :  { %7934 = vst [vmem:[#allocation17_spill] sm:$0xff] %v4922_v45 }
 0x233   :  { %v4835_v41 = vsub.f32 %v678_v46, %v7877_v30  ;;  %v204_v46 = vadd.s32 88, %v4795_v3 }
 0x235   :  { %712 = vmin.xlane.f32.xlu0 %v4835_v41  ;;  %vm220_vm14 = vcmp.ne.s32.totalorder %v204_v46, %v4797_v4 }
 0x236   :  { %v621_v63 = vpop.f32.mrf.mxu1 }
 0x237   :  { %v663_v34 = vsub.f32 1.0, %v621_v63 }
 0x239   :  { %v679_v51 = vmul.f32 %v4838_v25, %v663_v34  ;;  %v7863_v34 = vsub.f32 1.0, %v4922_v45 }
 0x23b   :  { %v4847_v11 = vsub.f32 %v679_v51, %v7874_v43 }
 0x23d   :  { %714 = vmin.xlane.f32.xlu1 %v4847_v11 }
 0x23e   :  { %v624_v33 = vpop.f32.mrf.mxu1 }
 0x23f   :  { %v664_v36 = vsub.f32 1.0, %v624_v33  ;;  %v4934_v33 = vsel %vm220_vm14, 1.0, %v7875_v5 }
 0x240   :  { %7935 = vst [vmem:[#allocation18_spill] sm:$0xff] %v4934_v33 }
 0x241   :  { %v680_v58 = vmul.f32 %v4850_v59, %v664_v36  ;;  %v205_v36 = vadd.s32 96, %v4795_v3 }
 0x243   :  { %v4859_v38 = vsub.f32 %v680_v58, %v7872_v39  ;;  %vm221_vm15 = vcmp.ne.s32.totalorder %v205_v36, %v4797_v4 }
 0x244   :  { %v4946_v49 = vsel %vm221_vm15, 1.0, %v7875_v5 }
 0x245   :  { %716 = vmin.xlane.f32.xlu2 %v4859_v38  ;;  %7936 = vst [vmem:[#allocation19_spill] sm:$0xff] %v4946_v49  ;;  %v7861_v31 = vsub.f32 1.0, %v4946_v49 }
 0x246   :  { %v627_v44 = vpop.f32.mrf.mxu1 }
 0x247   :  { %v665_v26 = vsub.f32 1.0, %v627_v44  ;;  %v7862_v44 = vsub.f32 1.0, %v4934_v33 }
 0x249   :  { %v681_v23 = vmul.f32 %v4862_v22, %v665_v26 }
 0x24b   :  { %v4871_v21 = vsub.f32 %v681_v23, %v7870_v54 }
 0x24d   :  { %718 = vmin.xlane.f32.xlu2 %v4871_v21 }
 0x24e   :  { %v630_v52 = vpop.f32.mrf.mxu1 }
 0x24f   :  { %v666_v20 = vsub.f32 1.0, %v630_v52  ;;  %v206_v52 = vadd.s32 104, %v4795_v3 }
 0x251   :  { %v682_v27 = vmul.f32 %v4874_v29, %v666_v20  ;;  %vm222_vm0 = vcmp.ne.s32.totalorder %v206_v52, %v4797_v4 }
 0x253   :  { %v4883_v50 = vsub.f32 %v682_v27, %v7869_v28 }
 0x255   :  { %720 = vmin.xlane.f32.xlu0 %v4883_v50 }
 0x256   :  { %v633_v35 = vpop.f32.mrf.mxu1 }
 0x257   :  { %v667_v2 = vsub.f32 1.0, %v633_v35 }
 0x259   :  { %v683_v37 = vmul.f32 %v4886_v48, %v667_v2 }
 0x25b   :  { %v4895_v32 = vsub.f32 %v683_v37, %v7867_v18  ;;  %v4958_v37 = vsel %vm222_vm0, 1.0, %v7875_v5 }
 0x25c   :  { %7937 = vst [vmem:[#allocation20_spill] sm:$0xff] %v4958_v37 }
 0x25d   :  { %722 = vmin.xlane.f32.xlu1 %v4895_v32 }
 0x25e   :  { %v636_v40 = vpop.f32.mrf.mxu1 }
 0x25f   :  { %v668_v0 = vsub.f32 1.0, %v636_v40 }
 0x261   :  { %v684_v8 = vmul.f32 %v4898_v42, %v668_v0 }
 0x263   :  { %v4907_v9 = vsub.f32 %v684_v8, %v7865_v7  ;;  %v7860_v8 = vsub.f32 1.0, %v4958_v37 }
 0x265   :  { %724 = vmin.xlane.f32.xlu2 %v4907_v9 }
 0x266   :  { %v639_v16 = vpop.f32.mrf.mxu1 }
 0x267   :  { %v669_v17 = vsub.f32 1.0, %v639_v16 }
 0x269   :  { %v685_v60 = vmul.f32 %v4910_v12, %v669_v17  ;;  %v4970_v17 = vsel %vm223_vm1, 1.0, %v7875_v5 }
 0x26a   :  { %7938 = vst [vmem:[#allocation21_spill] sm:$0xff] %v4970_v17 }
 0x26b   :  { %v4919_v47 = vsub.f32 %v685_v60, %v7864_v56  ;;  %v208_v60 = vadd.s32 120, %v4795_v3 }
 0x26d   :  { %726 = vmin.xlane.f32.xlu0 %v4919_v47  ;;  %vm224_vm2 = vcmp.ne.s32.totalorder %v208_v60, %v4797_v4 }
 0x26e   :  { %v642_v19 = vpop.f32.mrf.mxu1 }
 0x26f   :  { %v670_v63 = vsub.f32 1.0, %v642_v19 }
 0x271   :  { %v686_v51 = vmul.f32 %v4922_v45, %v670_v63  ;;  %v7859_v63 = vsub.f32 1.0, %v4970_v17 }
 0x273   :  { %v4931_v55 = vsub.f32 %v686_v51, %v7863_v34 }
 0x275   :  { %728 = vmin.xlane.f32.xlu1 %v4931_v55 }
 0x276   :  { %v645_v58 = vpop.f32.mrf.mxu1 }
 0x277   :  { %v671_v62 = vsub.f32 1.0, %v645_v58  ;;  %v4982_v58 = vsel %vm224_vm2, 1.0, %v7875_v5 }
 0x278   :  { %7939 = vst [vmem:[#allocation22_spill] sm:$0xff] %v4982_v58 }
 0x279   :  { %v687_v26 = vmul.f32 %v4934_v33, %v671_v62 }
 0x27b   :  { %v4943_v23 = vsub.f32 %v687_v26, %v7862_v44  ;;  %v4986_v26 = vcvt.s32.f32 %v4797_v4 }
 0x27d   :  { %730 = vmin.xlane.f32.xlu2 %v4943_v23  ;;  %7940 = vst [vmem:[#allocation23_spill] sm:$0xff] %v4986_v26 }
 0x27e   :  { %v648_v20 = vpop.f32.mrf.mxu1 }
 0x27f   :  { %v672_v27 = vsub.f32 1.0, %v648_v20  ;;  %v7858_v20 = vsub.f32 1.0, %v4982_v58 }
 0x281   :  { %v688_v35 = vmul.f32 %v4946_v49, %v672_v27 }
 0x283   :  { %v4955_v2 = vsub.f32 %v688_v35, %v7861_v31 }
 0x285   :  { %732 = vmin.xlane.f32.xlu0 %v4955_v2 }
 0x286   :  { %v651_v40 = vpop.f32.mrf.mxu1 }
 0x287   :  { %v673_v0 = vsub.f32 1.0, %v651_v40 }
 0x289   :  { %v689_v15 = vmul.f32 %v4958_v37, %v673_v0 }
 0x28b   :  { %v4967_v16 = vsub.f32 %v689_v15, %v7860_v8 }
 0x28d   :  { %734 = vmin.xlane.f32.xlu1 %v4967_v16 }
 0x28e   :  { %v654_v46 = vpop.f32.mrf.mxu1 }
 0x28f   :  { %v674_v19 = vsub.f32 1.0, %v654_v46 }
 0x291   :  { %v690_v51 = vmul.f32 %v4970_v17, %v674_v19 }
 0x293   :  { %v4979_v36 = vsub.f32 %v690_v51, %v7859_v63 }
 0x295   :  { %736 = vmin.xlane.f32.xlu2 %v4979_v36 }
 0x296   :  { %v657_v62 = vpop.f32.mrf.mxu1 }
 0x297   :  { %v675_v52 = vsub.f32 1.0, %v657_v62 }
 0x298   :  { %v709_v27 = vpop.xlane.xlu0 %708 }
 0x299   :  { %v691_v35 = vmul.f32 %v4982_v58, %v675_v52  ;;  %vm740_vm3 = vcmp.eq.f32.partialorder %v4811_v13, %v709_v27 }
 0x29a   :  { %v756_v61 = vsel %vm740_vm3, %v4986_v26, 128.0 }
 0x29b   :  { %772 = vmin.xlane.f32.xlu1 %v756_v61  ;;  %v4994_v40 = vsub.f32 %v691_v35, %v7858_v20 }
 0x29d   :  { %738 = vmin.xlane.f32.xlu0 %v4994_v40 }
 0x2a0   :  { %v711_v0 = vpop.xlane.xlu1 %710 }
 0x2a1   :  { %vm741_vm4 = vcmp.eq.f32.partialorder %v4823_v24, %v711_v0 }
 0x2a2   :  { %v757_v15 = vsel %vm741_vm4, %v4986_v26, 128.0 }
 0x2a3   :  { %774 = vmin.xlane.f32.xlu2 %v757_v15 }
 0x2a8   :  { %v713_v60 = vpop.xlane.xlu0 %712 }
 0x2a9   :  { %vm742_vm5 = vcmp.eq.f32.partialorder %v4835_v41, %v713_v60 }
 0x2aa   :  { %v758_v46 = vsel %vm742_vm5, %v4986_v26, 128.0 }
 0x2ab   :  { %776 = vmin.xlane.f32.xlu1 %v758_v46 }
 0x2b0   :  { %v715_v19 = vpop.xlane.xlu1 %714 }
 0x2b1   :  { %vm743_vm6 = vcmp.eq.f32.partialorder %v4847_v11, %v715_v19 }
 0x2b2   :  { %v759_v51 = vsel %vm743_vm6, %v4986_v26, 128.0 }
 0x2b3   :  { %778 = vmin.xlane.f32.xlu2 %v759_v51 }
 0x2b8   :  { %v717_v62 = vpop.xlane.xlu2 %716 }
 0x2b9   :  { %vm744_vm7 = vcmp.eq.f32.partialorder %v4859_v38, %v717_v62 }
 0x2ba   :  { %v760_v52 = vsel %vm744_vm7, %v4986_v26, 128.0 }
 0x2bb   :  { %780 = vmin.xlane.f32.xlu0 %v760_v52 }
 0x2c0   :  { %v719_v27 = vpop.xlane.xlu2 %718 }
 0x2c1   :  { %vm745_vm8 = vcmp.eq.f32.partialorder %v4871_v21, %v719_v27 }
 0x2c2   :  { %v761_v35 = vsel %vm745_vm8, %v4986_v26, 128.0 }
 0x2c3   :  { %782 = vmin.xlane.f32.xlu0 %v761_v35 }
 0x2c8   :  { %v721_v61 = vpop.xlane.xlu0 %720 }
 0x2c9   :  { %vm746_vm9 = vcmp.eq.f32.partialorder %v4883_v50, %v721_v61 }
 0x2ca   :  { %v762_v0 = vsel %vm746_vm9, %v4986_v26, 128.0 }
 0x2cb   :  { %784 = vmin.xlane.f32.xlu1 %v762_v0 }
 0x2d0   :  { %v723_v15 = vpop.xlane.xlu1 %722 }
 0x2d1   :  { %vm747_vm10 = vcmp.eq.f32.partialorder %v4895_v32, %v723_v15 }
 0x2d2   :  { %v763_v60 = vsel %vm747_vm10, %v4986_v26, 128.0 }
 0x2d3   :  { %786 = vmin.xlane.f32.xlu2 %v763_v60 }
 0x2d8   :  { %v725_v46 = vpop.xlane.xlu2 %724 }
 0x2d9   :  { %vm748_vm11 = vcmp.eq.f32.partialorder %v4907_v9, %v725_v46 }
 0x2da   :  { %v764_v19 = vsel %vm748_vm11, %v4986_v26, 128.0 }
 0x2db   :  { %788 = vmin.xlane.f32.xlu0 %v764_v19 }
 0x2e0   :  { %v727_v51 = vpop.xlane.xlu0 %726 }
 0x2e1   :  { %vm749_vm12 = vcmp.eq.f32.partialorder %v4919_v47, %v727_v51 }
 0x2e2   :  { %v765_v62 = vsel %vm749_vm12, %v4986_v26, 128.0 }
 0x2e3   :  { %790 = vmin.xlane.f32.xlu1 %v765_v62 }
 0x2e8   :  { %v729_v52 = vpop.xlane.xlu1 %728 }
 0x2e9   :  { %vm750_vm13 = vcmp.eq.f32.partialorder %v4931_v55, %v729_v52 }
 0x2ea   :  { %v766_v27 = vsel %vm750_vm13, %v4986_v26, 128.0 }
 0x2eb   :  { %792 = vmin.xlane.f32.xlu2 %v766_v27 }
 0x2f0   :  { %v731_v35 = vpop.xlane.xlu2 %730 }
 0x2f1   :  { %vm751_vm14 = vcmp.eq.f32.partialorder %v4943_v23, %v731_v35 }
 0x2f2   :  { %v767_v61 = vsel %vm751_vm14, %v4986_v26, 128.0 }
 0x2f3   :  { %794 = vmin.xlane.f32.xlu0 %v767_v61 }
 0x2f8   :  { %v733_v0 = vpop.xlane.xlu0 %732 }
 0x2f9   :  { %vm752_vm15 = vcmp.eq.f32.partialorder %v4955_v2, %v733_v0 }
 0x2fa   :  { %v768_v15 = vsel %vm752_vm15, %v4986_v26, 128.0 }
 0x2fb   :  { %796 = vmin.xlane.f32.xlu1 %v768_v15 }
 0x300   :  { %v735_v60 = vpop.xlane.xlu1 %734 }
 0x301   :  { %vm753_vm0 = vcmp.eq.f32.partialorder %v4967_v16, %v735_v60 }
 0x302   :  { %v769_v46 = vsel %vm753_vm0, %v4986_v26, 128.0 }
 0x303   :  { %798 = vmin.xlane.f32.xlu2 %v769_v46 }
 0x308   :  { %v737_v19 = vpop.xlane.xlu2 %736 }
 0x309   :  { %vm754_vm1 = vcmp.eq.f32.partialorder %v4979_v36, %v737_v19 }
 0x30a   :  { %v770_v51 = vsel %vm754_vm1, %v4986_v26, 128.0 }
 0x30b   :  { %800 = vmin.xlane.f32.xlu0 %v770_v51 }
 0x30e   :  { %v5025_v62 = vpop.xlane.xlu1 %772 }
 0x30f   :  { %vm804_vm2 = vcmp.eq.f32.partialorder %v4986_v26, %v5025_v62 }
 0x310   :  { %v739_v52 = vpop.xlane.xlu0 %738  ;;  %v5033_v27 = vsel %vm804_vm2, 3.0, %v4811_v13 }
 0x311   :  { %852 = vmin.xlane.f32.xlu2 %v5033_v27  ;;  %vm755_vm3 = vcmp.eq.f32.partialorder %v4994_v40, %v739_v52 }
 0x312   :  { %v771_v35 = vsel %vm755_vm3, %v4986_v26, 128.0 }
 0x313   :  { %802 = vmin.xlane.f32.xlu1 %v771_v35 }
 0x316   :  { %v5038_v61 = vpop.xlane.xlu2 %774 }
 0x317   :  { %vm805_vm4 = vcmp.eq.f32.partialorder %v4986_v26, %v5038_v61 }
 0x318   :  { %v5046_v0 = vsel %vm805_vm4, 3.0, %v4823_v24  ;;  %v821_v62 = vsel %vm805_vm4, 1.0, %v7875_v5 }
 0x319   :  { %854 = vmin.xlane.f32.xlu0 %v5046_v0 }
 0x31e   :  { %v5049_v13 = vpop.xlane.xlu1 %776 }
 0x31f   :  { %vm806_vm5 = vcmp.eq.f32.partialorder %v4986_v26, %v5049_v13 }
 0x320   :  { %v5057_v15 = vsel %vm806_vm5, 3.0, %v4835_v41 }
 0x321   :  { %856 = vmin.xlane.f32.xlu2 %v5057_v15 }
 0x326   :  { %v5060_v60 = vpop.xlane.xlu2 %778 }
 0x327   :  { %vm807_vm6 = vcmp.eq.f32.partialorder %v4986_v26, %v5060_v60 }
 0x328   :  { %v5068_v24 = vsel %vm807_vm6, 3.0, %v4847_v11 }
 0x329   :  { %858 = vmin.xlane.f32.xlu0 %v5068_v24 }
 0x32e   :  { %v5071_v46 = vpop.xlane.xlu0 %780 }
 0x32f   :  { %vm808_vm7 = vcmp.eq.f32.partialorder %v4986_v26, %v5071_v46 }
 0x330   :  { %v5079_v41 = vsel %vm808_vm7, 3.0, %v4859_v38 }
 0x331   :  { %860 = vmin.xlane.f32.xlu1 %v5079_v41 }
 0x336   :  { %v5082_v19 = vpop.xlane.xlu0 %782 }
 0x337   :  { %vm809_vm8 = vcmp.eq.f32.partialorder %v4986_v26, %v5082_v19 }
 0x338   :  { %v5090_v11 = vsel %vm809_vm8, 3.0, %v4871_v21 }
 0x339   :  { %862 = vmin.xlane.f32.xlu1 %v5090_v11 }
 0x33e   :  { %v5093_v51 = vpop.xlane.xlu1 %784 }
 0x33f   :  { %vm810_vm9 = vcmp.eq.f32.partialorder %v4986_v26, %v5093_v51 }
 0x340   :  { %v5101_v38 = vsel %vm810_vm9, 3.0, %v4883_v50 }
 0x341   :  { %864 = vmin.xlane.f32.xlu2 %v5101_v38 }
 0x346   :  { %v5104_v52 = vpop.xlane.xlu2 %786 }
 0x347   :  { %vm811_vm10 = vcmp.eq.f32.partialorder %v4986_v26, %v5104_v52 }
 0x348   :  { %v5112_v21 = vsel %vm811_vm10, 3.0, %v4895_v32 }
 0x349   :  { %866 = vmin.xlane.f32.xlu0 %v5112_v21 }
 0x34e   :  { %v5115_v35 = vpop.xlane.xlu0 %788 }
 0x34f   :  { %vm812_vm11 = vcmp.eq.f32.partialorder %v4986_v26, %v5115_v35 }
 0x350   :  { %v5123_v50 = vsel %vm812_vm11, 3.0, %v4907_v9 }
 0x351   :  { %868 = vmin.xlane.f32.xlu1 %v5123_v50 }
 0x356   :  { %v5126_v20 = vpop.xlane.xlu1 %790 }
 0x357   :  { %vm813_vm12 = vcmp.eq.f32.partialorder %v4986_v26, %v5126_v20 }
 0x358   :  { %v5134_v32 = vsel %vm813_vm12, 3.0, %v4919_v47 }
 0x359   :  { %870 = vmin.xlane.f32.xlu2 %v5134_v32 }
 0x35e   :  { %v5137_v63 = vpop.xlane.xlu2 %792 }
 0x35f   :  { %vm814_vm13 = vcmp.eq.f32.partialorder %v4986_v26, %v5137_v63 }
 0x360   :  { %v5145_v9 = vsel %vm814_vm13, 3.0, %v4931_v55 }
 0x361   :  { %872 = vmin.xlane.f32.xlu0 %v5145_v9 }
 0x366   :  { %v5148_v8 = vpop.xlane.xlu0 %794 }
 0x367   :  { %vm815_vm14 = vcmp.eq.f32.partialorder %v4986_v26, %v5148_v8 }
 0x368   :  { %v5156_v47 = vsel %vm815_vm14, 3.0, %v4943_v23 }
 0x369   :  { %874 = vmin.xlane.f32.xlu1 %v5156_v47 }
 0x36e   :  { %v5159_v31 = vpop.xlane.xlu1 %796 }
 0x36f   :  { %vm7871_vm15 = vcmp.eq.f32.partialorder %v4986_v26, %v5159_v31 }
 0x370   :  { %v5167_v55 = vsel %vm7871_vm15, 3.0, %v4955_v2 }
 0x371   :  { %876 = vmin.xlane.f32.xlu2 %v5167_v55 }
 0x376   :  { %v5170_v44 = vpop.xlane.xlu2 %798 }
 0x377   :  { %vm7866_vm0 = vcmp.eq.f32.partialorder %v4986_v26, %v5170_v44 }
 0x378   :  { %v5178_v23 = vsel %vm7866_vm0, 3.0, %v4967_v16 }
 0x379   :  { %878 = vmin.xlane.f32.xlu0 %v5178_v23 }
 0x37e   :  { %v5181_v34 = vpop.xlane.xlu0 %800 }
 0x37f   :  { %vm7868_vm1 = vcmp.eq.f32.partialorder %v4986_v26, %v5181_v34 }
 0x380   :  { %v5189_v2 = vsel %vm7868_vm1, 3.0, %v4979_v36 }
 0x381   :  { %880 = vmin.xlane.f32.xlu1 %v5189_v2 }
 0x384   :  { %v853_v56 = vpop.xlane.xlu2 %852 }
 0x385   :  { %vm884_vm3 = vcmp.eq.f32.partialorder %v5033_v27, %v853_v56 }
 0x386   :  { %v5193_v16 = vpop.xlane.xlu1 %802  ;;  %v900_v7 = vsel %vm884_vm3, %v4986_v26, 128.0 }
 0x387   :  { %vm7873_vm0 = vcmp.eq.f32.partialorder %v4986_v26, %v5193_v16  ;;  %916 = vmin.xlane.f32.xlu0 %v900_v7 }
 0x388   :  { %v5202_v18 = vsel %vm7873_vm0, 3.0, %v4994_v40 }
 0x389   :  { %882 = vmin.xlane.f32.xlu2 %v5202_v18 }
 0x38c   :  { %v855_v36 = vpop.xlane.xlu0 %854 }
 0x38d   :  { %vm885_vm1 = vcmp.eq.f32.partialorder %v5046_v0, %v855_v36 }
 0x38e   :  { %v901_v56 = vsel %vm885_vm1, %v4986_v26, 128.0 }
 0x38f   :  { %918 = vmin.xlane.f32.xlu1 %v901_v56 }
 0x394   :  { %v857_v28 = vpop.xlane.xlu2 %856 }
 0x395   :  { %vm886_vm3 = vcmp.eq.f32.partialorder %v5057_v15, %v857_v28 }
 0x396   :  { %v902_v54 = vsel %vm886_vm3, %v4986_v26, 128.0 }
 0x397   :  { %920 = vmin.xlane.f32.xlu0 %v902_v54 }
 0x39c   :  { %v859_v7 = vpop.xlane.xlu0 %858 }
 0x39d   :  { %vm887_vm15 = vcmp.eq.f32.partialorder %v5068_v24, %v859_v7 }
 0x39e   :  { %v903_v40 = vsel %vm887_vm15, %v4986_v26, 128.0 }
 0x39f   :  { %922 = vmin.xlane.f32.xlu1 %v903_v40 }
 0x3a4   :  { %v861_v39 = vpop.xlane.xlu1 %860 }
 0x3a5   :  { %vm888_vm0 = vcmp.eq.f32.partialorder %v5079_v41, %v861_v39 }
 0x3a6   :  { %v904_v36 = vsel %vm888_vm0, %v4986_v26, 128.0 }
 0x3a7   :  { %924 = vmin.xlane.f32.xlu2 %v904_v36 }
 0x3ac   :  { %v863_v43 = vpop.xlane.xlu1 %862 }
 0x3ad   :  { %vm889_vm1 = vcmp.eq.f32.partialorder %v5090_v11, %v863_v43 }
 0x3ae   :  { %v905_v28 = vsel %vm889_vm1, %v4986_v26, 128.0 }
 0x3af   :  { %926 = vmin.xlane.f32.xlu2 %v905_v28 }
 0x3b4   :  { %v865_v56 = vpop.xlane.xlu2 %864 }
 0x3b5   :  { %vm890_vm3 = vcmp.eq.f32.partialorder %v5101_v38, %v865_v56 }
 0x3b6   :  { %v906_v54 = vsel %vm890_vm3, %v4986_v26, 128.0 }
 0x3b7   :  { %928 = vmin.xlane.f32.xlu0 %v906_v54 }
 0x3bc   :  { %v867_v7 = vpop.xlane.xlu0 %866 }
 0x3bd   :  { %vm891_vm15 = vcmp.eq.f32.partialorder %v5112_v21, %v867_v7 }
 0x3be   :  { %v907_v39 = vsel %vm891_vm15, %v4986_v26, 128.0 }
 0x3bf   :  { %930 = vmin.xlane.f32.xlu1 %v907_v39 }
 0x3c4   :  { %v869_v40 = vpop.xlane.xlu1 %868 }
 0x3c5   :  { %vm892_vm0 = vcmp.eq.f32.partialorder %v5123_v50, %v869_v40 }
 0x3c6   :  { %v908_v43 = vsel %vm892_vm0, %v4986_v26, 128.0 }
 0x3c7   :  { %932 = vmin.xlane.f32.xlu2 %v908_v43 }
 0x3cc   :  { %v871_v36 = vpop.xlane.xlu2 %870 }
 0x3cd   :  { %vm893_vm1 = vcmp.eq.f32.partialorder %v5134_v32, %v871_v36 }
 0x3ce   :  { %v909_v28 = vsel %vm893_vm1, %v4986_v26, 128.0 }
 0x3cf   :  { %934 = vmin.xlane.f32.xlu0 %v909_v28 }
 0x3d4   :  { %v873_v56 = vpop.xlane.xlu0 %872 }
 0x3d5   :  { %vm894_vm3 = vcmp.eq.f32.partialorder %v5145_v9, %v873_v56 }
 0x3d6   :  { %v910_v54 = vsel %vm894_vm3, %v4986_v26, 128.0 }
 0x3d7   :  { %936 = vmin.xlane.f32.xlu1 %v910_v54 }
 0x3dc   :  { %v875_v7 = vpop.xlane.xlu1 %874 }
 0x3dd   :  { %vm895_vm15 = vcmp.eq.f32.partialorder %v5156_v47, %v875_v7 }
 0x3de   :  { %v911_v39 = vsel %vm895_vm15, %v4986_v26, 128.0 }
 0x3df   :  { %938 = vmin.xlane.f32.xlu2 %v911_v39  ;;  %v820_v39 = vsel %vm804_vm2, 1.0, %v7875_v5 }
 0x3e4   :  { %v877_v40 = vpop.xlane.xlu2 %876 }
 0x3e5   :  { %vm896_vm0 = vcmp.eq.f32.partialorder %v5167_v55, %v877_v40 }
 0x3e6   :  { %v912_v43 = vsel %vm896_vm0, %v4986_v26, 128.0 }
 0x3e7   :  { %940 = vmin.xlane.f32.xlu0 %v912_v43 }
 0x3ec   :  { %v879_v36 = vpop.xlane.xlu0 %878 }
 0x3ed   :  { %vm897_vm1 = vcmp.eq.f32.partialorder %v5178_v23, %v879_v36 }
 0x3ee   :  { %v913_v28 = vsel %vm897_vm1, %v4986_v26, 128.0 }
 0x3ef   :  { %942 = vmin.xlane.f32.xlu1 %v913_v28 }
 0x3f4   :  { %v881_v56 = vpop.xlane.xlu1 %880 }
 0x3f5   :  { %vm898_vm3 = vcmp.eq.f32.partialorder %v5189_v2, %v881_v56 }
 0x3f6   :  { %v914_v54 = vsel %vm898_vm3, %v4986_v26, 128.0 }
 0x3f7   :  { %944 = vmin.xlane.f32.xlu2 %v914_v54 }
 0x3fa   :  { %v917_v7 = vpop.xlane.xlu0 %916 }
 0x3fb   :  { %vm948_vm15 = vcmp.eq.f32.partialorder %v4986_v26, %v917_v7 }
 0x3fc   :  { %v5238_v40 = vsel %vm948_vm15, 1.0, %v820_v39  ;;  %v883_v43 = vpop.xlane.xlu2 %882  ;;  %v5241_v36 = vsel %vm948_vm15, 3.0, %v5033_v27  ;;  %v822_v39 = vsel %vm806_vm5, 1.0, %v7875_v5 }
 0x3fd   :  { %996 = vmin.xlane.f32.xlu1 %v5241_v36  ;;  %vm899_vm0 = vcmp.eq.f32.partialorder %v5202_v18, %v883_v43 }
 0x3fe   :  { %v915_v28 = vsel %vm899_vm0, %v4986_v26, 128.0  ;;  %vm7943_vm0 = vcmp.eq.f32.partialorder %v4986_v26, %v5181_v34 }
 0x3ff   :  { %946 = vmin.xlane.f32.xlu0 %v915_v28 }
 0x402   :  { %v919_v56 = vpop.xlane.xlu1 %918 }
 0x403   :  { %vm949_vm2 = vcmp.eq.f32.partialorder %v4986_v26, %v919_v56 }
 0x404   :  { %v5251_v54 = vsel %vm949_vm2, 1.0, %v821_v62  ;;  %v5254_v27 = vsel %vm949_vm2, 3.0, %v5046_v0  ;;  %v823_v0 = vsel %vm807_vm6, 1.0, %v7875_v5 }
 0x405   :  { %998 = vmin.xlane.f32.xlu2 %v5254_v27 }
 0x40a   :  { %v921_v7 = vpop.xlane.xlu0 %920 }
 0x40b   :  { %vm950_vm1 = vcmp.eq.f32.partialorder %v4986_v26, %v921_v7 }
 0x40c   :  { %v5262_v43 = vsel %vm950_vm1, 1.0, %v822_v39  ;;  %v5265_v61 = vsel %vm950_vm1, 3.0, %v5057_v15  ;;  %v824_v15 = vsel %vm808_vm7, 1.0, %v7875_v5 }
 0x40d   :  { %1000 = vmin.xlane.f32.xlu1 %v5265_v61 }
 0x412   :  { %v923_v28 = vpop.xlane.xlu1 %922 }
 0x413   :  { %vm951_vm4 = vcmp.eq.f32.partialorder %v4986_v26, %v923_v28 }
 0x414   :  { %v5273_v56 = vsel %vm951_vm4, 1.0, %v823_v0  ;;  %v5276_v13 = vsel %vm951_vm4, 3.0, %v5068_v24  ;;  %v825_v24 = vsel %vm809_vm8, 1.0, %v7875_v5  ;;  %vm7944_vm4 = vcmp.eq.f32.partialorder %v4986_v26, %v5193_v16 }
 0x415   :  { %1002 = vmin.xlane.f32.xlu2 %v5276_v13  ;;  %v835_v34 = vsel %vm7944_vm4, 1.0, %v7875_v5 }
 0x41a   :  { %v925_v62 = vpop.xlane.xlu2 %924 }
 0x41b   :  { %vm952_vm5 = vcmp.eq.f32.partialorder %v4986_v26, %v925_v62 }
 0x41c   :  { %v5284_v7 = vsel %vm952_vm5, 1.0, %v824_v15  ;;  %v5287_v60 = vsel %vm952_vm5, 3.0, %v5079_v41  ;;  %v826_v41 = vsel %vm810_vm9, 1.0, %v7875_v5 }
 0x41d   :  { %1004 = vmin.xlane.f32.xlu0 %v5287_v60 }
 0x422   :  { %v927_v39 = vpop.xlane.xlu2 %926 }
 0x423   :  { %vm953_vm6 = vcmp.eq.f32.partialorder %v4986_v26, %v927_v39 }
 0x424   :  { %v5295_v28 = vsel %vm953_vm6, 1.0, %v825_v24  ;;  %v5298_v46 = vsel %vm953_vm6, 3.0, %v5090_v11  ;;  %v827_v11 = vsel %vm811_vm10, 1.0, %v7875_v5 }
 0x425   :  { %1006 = vmin.xlane.f32.xlu0 %v5298_v46 }
 0x42a   :  { %v929_v0 = vpop.xlane.xlu0 %928 }
 0x42b   :  { %vm954_vm7 = vcmp.eq.f32.partialorder %v4986_v26, %v929_v0 }
 0x42c   :  { %v5306_v62 = vsel %vm954_vm7, 1.0, %v826_v41  ;;  %v5309_v19 = vsel %vm954_vm7, 3.0, %v5101_v38  ;;  %v828_v38 = vsel %vm812_vm11, 1.0, %v7875_v5 }
 0x42d   :  { %1008 = vmin.xlane.f32.xlu1 %v5309_v19 }
 0x432   :  { %v931_v15 = vpop.xlane.xlu1 %930 }
 0x433   :  { %vm955_vm8 = vcmp.eq.f32.partialorder %v4986_v26, %v931_v15 }
 0x434   :  { %v5317_v39 = vsel %vm955_vm8, 1.0, %v827_v11  ;;  %v5320_v51 = vsel %vm955_vm8, 3.0, %v5112_v21  ;;  %v829_v21 = vsel %vm813_vm12, 1.0, %v7875_v5 }
 0x435   :  { %1010 = vmin.xlane.f32.xlu2 %v5320_v51 }
 0x43a   :  { %v933_v24 = vpop.xlane.xlu2 %932 }
 0x43b   :  { %vm956_vm9 = vcmp.eq.f32.partialorder %v4986_v26, %v933_v24 }
 0x43c   :  { %v5328_v0 = vsel %vm956_vm9, 1.0, %v828_v38  ;;  %v5331_v52 = vsel %vm956_vm9, 3.0, %v5123_v50  ;;  %v830_v50 = vsel %vm814_vm13, 1.0, %v7875_v5  ;;  %vm7941_vm13 = vcmp.eq.f32.partialorder %v4986_v26, %v5159_v31 }
 0x43d   :  { %1012 = vmin.xlane.f32.xlu0 %v5331_v52 }
 0x442   :  { %v935_v41 = vpop.xlane.xlu0 %934 }
 0x443   :  { %vm957_vm10 = vcmp.eq.f32.partialorder %v4986_v26, %v935_v41 }
 0x444   :  { %v5339_v15 = vsel %vm957_vm10, 1.0, %v829_v21  ;;  %v5342_v35 = vsel %vm957_vm10, 3.0, %v5134_v32  ;;  %v831_v32 = vsel %vm815_vm14, 1.0, %v7875_v5  ;;  %vm7942_vm14 = vcmp.eq.f32.partialorder %v4986_v26, %v5170_v44 }
 0x445   :  { %1014 = vmin.xlane.f32.xlu1 %v5342_v35 }
 0x44a   :  { %v937_v11 = vpop.xlane.xlu1 %936 }
 0x44b   :  { %vm958_vm11 = vcmp.eq.f32.partialorder %v4986_v26, %v937_v11 }
 0x44c   :  { %v5350_v24 = vsel %vm958_vm11, 1.0, %v830_v50  ;;  %v5353_v20 = vsel %vm958_vm11, 3.0, %v5145_v9  ;;  %v832_v9 = vsel %vm7941_vm13, 1.0, %v7875_v5 }
 0x44d   :  { %1016 = vmin.xlane.f32.xlu2 %v5353_v20 }
 0x452   :  { %v939_v38 = vpop.xlane.xlu2 %938 }
 0x453   :  { %vm959_vm12 = vcmp.eq.f32.partialorder %v4986_v26, %v939_v38 }
 0x454   :  { %v5361_v41 = vsel %vm959_vm12, 1.0, %v831_v32  ;;  %v5364_v63 = vsel %vm959_vm12, 3.0, %v5156_v47  ;;  %v833_v47 = vsel %vm7942_vm14, 1.0, %v7875_v5 }
 0x455   :  { %1018 = vmin.xlane.f32.xlu0 %v5364_v63 }
 0x45a   :  { %v941_v21 = vpop.xlane.xlu0 %940 }
 0x45b   :  { %vm960_vm3 = vcmp.eq.f32.partialorder %v4986_v26, %v941_v21 }
 0x45c   :  { %v5372_v11 = vsel %vm960_vm3, 1.0, %v832_v9  ;;  %v5375_v8 = vsel %vm960_vm3, 3.0, %v5167_v55  ;;  %v834_v55 = vsel %vm7943_vm0, 1.0, %v7875_v5 }
 0x45d   :  { %1020 = vmin.xlane.f32.xlu1 %v5375_v8 }
 0x462   :  { %v943_v50 = vpop.xlane.xlu1 %942 }
 0x463   :  { %vm961_vm15 = vcmp.eq.f32.partialorder %v4986_v26, %v943_v50 }
 0x464   :  { %v5383_v38 = vsel %vm961_vm15, 1.0, %v833_v47  ;;  %v5386_v31 = vsel %vm961_vm15, 3.0, %v5178_v23 }
 0x465   :  { %1022 = vmin.xlane.f32.xlu2 %v5386_v31 }
 0x46a   :  { %v945_v32 = vpop.xlane.xlu2 %944 }
 0x46b   :  { %vm962_vm2 = vcmp.eq.f32.partialorder %v4986_v26, %v945_v32 }
 0x46c   :  { %v5394_v21 = vsel %vm962_vm2, 1.0, %v834_v55  ;;  %v5397_v44 = vsel %vm962_vm2, 3.0, %v5189_v2 }
 0x46d   :  { %1024 = vmin.xlane.f32.xlu0 %v5397_v44 }
 0x470   :  { %v997_v9 = vpop.xlane.xlu1 %996 }
 0x471   :  { %vm1028_vm1 = vcmp.eq.f32.partialorder %v5241_v36, %v997_v9 }
 0x472   :  { %v947_v23 = vpop.xlane.xlu0 %946  ;;  %v1044_v50 = vsel %vm1028_vm1, %v4986_v26, 128.0 }
 0x473   :  { %vm963_vm5 = vcmp.eq.f32.partialorder %v4986_v26, %v947_v23  ;;  %1060 = vmin.xlane.f32.xlu2 %v1044_v50 }
 0x474   :  { %v5407_v47 = vsel %vm963_vm5, 1.0, %v835_v34  ;;  %v5410_v2 = vsel %vm963_vm5, 3.0, %v5202_v18 }
 0x475   :  { %1026 = vmin.xlane.f32.xlu1 %v5410_v2 }
 0x478   :  { %v999_v32 = vpop.xlane.xlu2 %998 }
 0x479   :  { %vm1029_vm6 = vcmp.eq.f32.partialorder %v5254_v27, %v999_v32 }
 0x47a   :  { %v1045_v55 = vsel %vm1029_vm6, %v4986_v26, 128.0 }
 0x47b   :  { %1062 = vmin.xlane.f32.xlu0 %v1045_v55 }
 0x480   :  { %v1001_v9 = vpop.xlane.xlu1 %1000 }
 0x481   :  { %vm1030_vm7 = vcmp.eq.f32.partialorder %v5265_v61, %v1001_v9 }
 0x482   :  { %v1046_v16 = vsel %vm1030_vm7, %v4986_v26, 128.0 }
 0x483   :  { %1064 = vmin.xlane.f32.xlu2 %v1046_v16 }
 0x488   :  { %v1003_v23 = vpop.xlane.xlu2 %1002 }
 0x489   :  { %vm1031_vm8 = vcmp.eq.f32.partialorder %v5276_v13, %v1003_v23 }
 0x48a   :  { %v1047_v18 = vsel %vm1031_vm8, %v4986_v26, 128.0 }
 0x48b   :  { %1066 = vmin.xlane.f32.xlu0 %v1047_v18 }
 0x490   :  { %v1005_v50 = vpop.xlane.xlu0 %1004 }
 0x491   :  { %vm1032_vm9 = vcmp.eq.f32.partialorder %v5287_v60, %v1005_v50 }
 0x492   :  { %v1048_v34 = vsel %vm1032_vm9, %v4986_v26, 128.0 }
 0x493   :  { %1068 = vmin.xlane.f32.xlu1 %v1048_v34 }
 0x498   :  { %v1007_v32 = vpop.xlane.xlu0 %1006 }
 0x499   :  { %vm1033_vm10 = vcmp.eq.f32.partialorder %v5298_v46, %v1007_v32 }
 0x49a   :  { %v1049_v55 = vsel %vm1033_vm10, %v4986_v26, 128.0 }
 0x49b   :  { %1070 = vmin.xlane.f32.xlu1 %v1049_v55 }
 0x4a0   :  { %v1009_v9 = vpop.xlane.xlu1 %1008 }
 0x4a1   :  { %vm1034_vm11 = vcmp.eq.f32.partialorder %v5309_v19, %v1009_v9 }
 0x4a2   :  { %v1050_v16 = vsel %vm1034_vm11, %v4986_v26, 128.0 }
 0x4a3   :  { %1072 = vmin.xlane.f32.xlu2 %v1050_v16 }
 0x4a8   :  { %v1011_v23 = vpop.xlane.xlu2 %1010 }
 0x4a9   :  { %vm1035_vm12 = vcmp.eq.f32.partialorder %v5320_v51, %v1011_v23 }
 0x4aa   :  { %v1051_v18 = vsel %vm1035_vm12, %v4986_v26, 128.0 }
 0x4ab   :  { %1074 = vmin.xlane.f32.xlu0 %v1051_v18 }
 0x4b0   :  { %v1013_v50 = vpop.xlane.xlu0 %1012 }
 0x4b1   :  { %vm1036_vm13 = vcmp.eq.f32.partialorder %v5331_v52, %v1013_v50 }
 0x4b2   :  { %v1052_v34 = vsel %vm1036_vm13, %v4986_v26, 128.0 }
 0x4b3   :  { %1076 = vmin.xlane.f32.xlu1 %v1052_v34 }
 0x4b8   :  { %v1015_v32 = vpop.xlane.xlu1 %1014 }
 0x4b9   :  { %vm1037_vm3 = vcmp.eq.f32.partialorder %v5342_v35, %v1015_v32 }
 0x4ba   :  { %v1053_v55 = vsel %vm1037_vm3, %v4986_v26, 128.0 }
 0x4bb   :  { %1078 = vmin.xlane.f32.xlu2 %v1053_v55 }
 0x4c0   :  { %v1017_v9 = vpop.xlane.xlu2 %1016 }
 0x4c1   :  { %vm1038_vm14 = vcmp.eq.f32.partialorder %v5353_v20, %v1017_v9 }
 0x4c2   :  { %v1054_v16 = vsel %vm1038_vm14, %v4986_v26, 128.0 }
 0x4c3   :  { %1080 = vmin.xlane.f32.xlu0 %v1054_v16 }
 0x4c8   :  { %v1019_v23 = vpop.xlane.xlu0 %1018 }
 0x4c9   :  { %vm1039_vm15 = vcmp.eq.f32.partialorder %v5364_v63, %v1019_v23 }
 0x4ca   :  { %v1055_v18 = vsel %vm1039_vm15, %v4986_v26, 128.0 }
 0x4cb   :  { %1082 = vmin.xlane.f32.xlu1 %v1055_v18 }
 0x4d0   :  { %v1021_v50 = vpop.xlane.xlu1 %1020 }
 0x4d1   :  { %vm1040_vm0 = vcmp.eq.f32.partialorder %v5375_v8, %v1021_v50 }
 0x4d2   :  { %v1056_v34 = vsel %vm1040_vm0, %v4986_v26, 128.0 }
 0x4d3   :  { %1084 = vmin.xlane.f32.xlu2 %v1056_v34 }
 0x4d8   :  { %v1023_v32 = vpop.xlane.xlu2 %1022 }
 0x4d9   :  { %vm1041_vm2 = vcmp.eq.f32.partialorder %v5386_v31, %v1023_v32 }
 0x4da   :  { %v1057_v55 = vsel %vm1041_vm2, %v4986_v26, 128.0 }
 0x4db   :  { %1086 = vmin.xlane.f32.xlu0 %v1057_v55 }
 0x4e0   :  { %v1025_v9 = vpop.xlane.xlu0 %1024 }
 0x4e1   :  { %vm1042_vm1 = vcmp.eq.f32.partialorder %v5397_v44, %v1025_v9 }
 0x4e2   :  { %v1058_v16 = vsel %vm1042_vm1, %v4986_v26, 128.0 }
 0x4e3   :  { %1088 = vmin.xlane.f32.xlu1 %v1058_v16 }
 0x4e6   :  { %v1061_v23 = vpop.xlane.xlu2 %1060 }
 0x4e7   :  { %vm1092_vm4 = vcmp.eq.f32.partialorder %v4986_v26, %v1061_v23 }
 0x4e8   :  { %v1027_v18 = vpop.xlane.xlu1 %1026  ;;  %v5443_v50 = vsel %vm1092_vm4, 3.0, %v5241_v36  ;;  %v5446_v34 = vsel %vm1092_vm4, 1.0, %v5238_v40 }
 0x4e9   :  { %1140 = vmin.xlane.f32.xlu0 %v5443_v50  ;;  %vm1043_vm5 = vcmp.eq.f32.partialorder %v5410_v2, %v1027_v18 }
 0x4ea   :  { %v1059_v32 = vsel %vm1043_vm5, %v4986_v26, 128.0 }
 0x4eb   :  { %1090 = vmin.xlane.f32.xlu2 %v1059_v32 }
 0x4ee   :  { %v1063_v55 = vpop.xlane.xlu0 %1062 }
 0x4ef   :  { %vm1093_vm6 = vcmp.eq.f32.partialorder %v4986_v26, %v1063_v55 }
 0x4f0   :  { %v5453_v9 = vsel %vm1093_vm6, 3.0, %v5254_v27  ;;  %v5456_v16 = vsel %vm1093_vm6, 1.0, %v5251_v54 }
 0x4f1   :  { %1142 = vmin.xlane.f32.xlu1 %v5453_v9 }
 0x4f6   :  { %v1065_v40 = vpop.xlane.xlu2 %1064 }
 0x4f7   :  { %vm1094_vm7 = vcmp.eq.f32.partialorder %v4986_v26, %v1065_v40 }
 0x4f8   :  { %v5461_v36 = vsel %vm1094_vm7, 3.0, %v5265_v61  ;;  %v5464_v23 = vsel %vm1094_vm7, 1.0, %v5262_v43 }
 0x4f9   :  { %1144 = vmin.xlane.f32.xlu0 %v5461_v36 }
 0x4fe   :  { %v1067_v18 = vpop.xlane.xlu0 %1066 }
 0x4ff   :  { %vm1095_vm8 = vcmp.eq.f32.partialorder %v4986_v26, %v1067_v18 }
 0x500   :  { %v5469_v27 = vsel %vm1095_vm8, 3.0, %v5276_v13  ;;  %v5472_v54 = vsel %vm1095_vm8, 1.0, %v5273_v56 }
 0x501   :  { %1146 = vmin.xlane.f32.xlu1 %v5469_v27 }
 0x506   :  { %v1069_v32 = vpop.xlane.xlu1 %1068 }
 0x507   :  { %vm1096_vm9 = vcmp.eq.f32.partialorder %v4986_v26, %v1069_v32 }
 0x508   :  { %v5477_v61 = vsel %vm1096_vm9, 3.0, %v5287_v60  ;;  %v5480_v43 = vsel %vm1096_vm9, 1.0, %v5284_v7 }
 0x509   :  { %1148 = vmin.xlane.f32.xlu2 %v5477_v61 }
 0x50e   :  { %v1071_v55 = vpop.xlane.xlu1 %1070 }
 0x50f   :  { %vm1097_vm10 = vcmp.eq.f32.partialorder %v4986_v26, %v1071_v55 }
 0x510   :  { %v5485_v13 = vsel %vm1097_vm10, 3.0, %v5298_v46  ;;  %v5488_v56 = vsel %vm1097_vm10, 1.0, %v5295_v28 }
 0x511   :  { %1150 = vmin.xlane.f32.xlu2 %v5485_v13 }
 0x516   :  { %v1073_v40 = vpop.xlane.xlu2 %1072 }
 0x517   :  { %vm1098_vm11 = vcmp.eq.f32.partialorder %v4986_v26, %v1073_v40 }
 0x518   :  { %v5493_v60 = vsel %vm1098_vm11, 3.0, %v5309_v19  ;;  %v5496_v7 = vsel %vm1098_vm11, 1.0, %v5306_v62 }
 0x519   :  { %1152 = vmin.xlane.f32.xlu0 %v5493_v60 }
 0x51e   :  { %v1075_v18 = vpop.xlane.xlu0 %1074 }
 0x51f   :  { %vm1099_vm12 = vcmp.eq.f32.partialorder %v4986_v26, %v1075_v18 }
 0x520   :  { %v5501_v46 = vsel %vm1099_vm12, 3.0, %v5320_v51  ;;  %v5504_v28 = vsel %vm1099_vm12, 1.0, %v5317_v39 }
 0x521   :  { %1154 = vmin.xlane.f32.xlu1 %v5501_v46 }
 0x526   :  { %v1077_v32 = vpop.xlane.xlu1 %1076 }
 0x527   :  { %vm1100_vm13 = vcmp.eq.f32.partialorder %v4986_v26, %v1077_v32 }
 0x528   :  { %v5509_v19 = vsel %vm1100_vm13, 3.0, %v5331_v52  ;;  %v5512_v62 = vsel %vm1100_vm13, 1.0, %v5328_v0 }
 0x529   :  { %1156 = vmin.xlane.f32.xlu2 %v5509_v19 }
 0x52e   :  { %v1079_v55 = vpop.xlane.xlu2 %1078 }
 0x52f   :  { %vm1101_vm3 = vcmp.eq.f32.partialorder %v4986_v26, %v1079_v55 }
 0x530   :  { %v5517_v51 = vsel %vm1101_vm3, 3.0, %v5342_v35  ;;  %v5520_v39 = vsel %vm1101_vm3, 1.0, %v5339_v15 }
 0x531   :  { %1158 = vmin.xlane.f32.xlu0 %v5517_v51 }
 0x536   :  { %v1081_v40 = vpop.xlane.xlu0 %1080 }
 0x537   :  { %vm1102_vm14 = vcmp.eq.f32.partialorder %v4986_v26, %v1081_v40 }
 0x538   :  { %v5525_v52 = vsel %vm1102_vm14, 3.0, %v5353_v20  ;;  %v5528_v0 = vsel %vm1102_vm14, 1.0, %v5350_v24 }
 0x539   :  { %1160 = vmin.xlane.f32.xlu1 %v5525_v52 }
 0x53e   :  { %v1083_v18 = vpop.xlane.xlu1 %1082 }
 0x53f   :  { %vm1103_vm15 = vcmp.eq.f32.partialorder %v4986_v26, %v1083_v18 }
 0x540   :  { %v5533_v35 = vsel %vm1103_vm15, 3.0, %v5364_v63  ;;  %v5536_v15 = vsel %vm1103_vm15, 1.0, %v5361_v41 }
 0x541   :  { %1162 = vmin.xlane.f32.xlu2 %v5533_v35 }
 0x546   :  { %v1085_v32 = vpop.xlane.xlu2 %1084 }
 0x547   :  { %vm1104_vm0 = vcmp.eq.f32.partialorder %v4986_v26, %v1085_v32 }
 0x548   :  { %v5541_v20 = vsel %vm1104_vm0, 3.0, %v5375_v8  ;;  %v5544_v24 = vsel %vm1104_vm0, 1.0, %v5372_v11 }
 0x549   :  { %1164 = vmin.xlane.f32.xlu0 %v5541_v20 }
 0x54e   :  { %v1087_v55 = vpop.xlane.xlu0 %1086 }
 0x54f   :  { %vm1105_vm2 = vcmp.eq.f32.partialorder %v4986_v26, %v1087_v55 }
 0x550   :  { %v5549_v63 = vsel %vm1105_vm2, 3.0, %v5386_v31  ;;  %v5552_v41 = vsel %vm1105_vm2, 1.0, %v5383_v38 }
 0x551   :  { %1166 = vmin.xlane.f32.xlu1 %v5549_v63 }
 0x556   :  { %v1089_v40 = vpop.xlane.xlu1 %1088 }
 0x557   :  { %vm1106_vm1 = vcmp.eq.f32.partialorder %v4986_v26, %v1089_v40 }
 0x558   :  { %v5557_v8 = vsel %vm1106_vm1, 3.0, %v5397_v44  ;;  %v5560_v11 = vsel %vm1106_vm1, 1.0, %v5394_v21 }
 0x559   :  { %1168 = vmin.xlane.f32.xlu2 %v5557_v8 }
 0x55c   :  { %v1141_v18 = vpop.xlane.xlu0 %1140 }
 0x55d   :  { %vm1172_vm4 = vcmp.eq.f32.partialorder %v5443_v50, %v1141_v18 }
 0x55e   :  { %v1091_v31 = vpop.xlane.xlu2 %1090  ;;  %v1188_v38 = vsel %vm1172_vm4, %v4986_v26, 128.0 }
 0x55f   :  { %1204 = vmin.xlane.f32.xlu1 %v1188_v38  ;;  %vm1107_vm5 = vcmp.eq.f32.partialorder %v4986_v26, %v1091_v31 }
 0x560   :  { %v1139_v32 = vsel %vm1107_vm5, 3.0, %v5410_v2  ;;  %v5568_v55 = vsel %vm1107_vm5, 1.0, %v5407_v47 }
 0x561   :  { %1170 = vmin.xlane.f32.xlu0 %v1139_v32 }
 0x564   :  { %v1143_v44 = vpop.xlane.xlu1 %1142 }
 0x565   :  { %vm1173_vm6 = vcmp.eq.f32.partialorder %v5453_v9, %v1143_v44 }
 0x566   :  { %v1189_v21 = vsel %vm1173_vm6, %v4986_v26, 128.0 }
 0x567   :  { %1206 = vmin.xlane.f32.xlu2 %v1189_v21 }
 0x56c   :  { %v1145_v40 = vpop.xlane.xlu0 %1144 }
 0x56d   :  { %vm1174_vm7 = vcmp.eq.f32.partialorder %v5461_v36, %v1145_v40 }
 0x56e   :  { %v1190_v50 = vsel %vm1174_vm7, %v4986_v26, 128.0 }
 0x56f   :  { %1208 = vmin.xlane.f32.xlu1 %v1190_v50 }
 0x574   :  { %v1147_v18 = vpop.xlane.xlu1 %1146 }
 0x575   :  { %vm1175_vm8 = vcmp.eq.f32.partialorder %v5469_v27, %v1147_v18 }
 0x576   :  { %v1191_v2 = vsel %vm1175_vm8, %v4986_v26, 128.0 }
 0x577   :  { %1210 = vmin.xlane.f32.xlu2 %v1191_v2 }
 0x57c   :  { %v1149_v47 = vpop.xlane.xlu2 %1148 }
 0x57d   :  { %vm1176_vm9 = vcmp.eq.f32.partialorder %v5477_v61, %v1149_v47 }
 0x57e   :  { %v1192_v9 = vsel %vm1176_vm9, %v4986_v26, 128.0 }
 0x57f   :  { %1212 = vmin.xlane.f32.xlu0 %v1192_v9 }
 0x584   :  { %v1151_v31 = vpop.xlane.xlu2 %1150 }
 0x585   :  { %vm1177_vm10 = vcmp.eq.f32.partialorder %v5485_v13, %v1151_v31 }
 0x586   :  { %v1193_v36 = vsel %vm1177_vm10, %v4986_v26, 128.0 }
 0x587   :  { %1214 = vmin.xlane.f32.xlu0 %v1193_v36 }
 0x58c   :  { %v1153_v38 = vpop.xlane.xlu0 %1152 }
 0x58d   :  { %vm1178_vm11 = vcmp.eq.f32.partialorder %v5493_v60, %v1153_v38 }
 0x58e   :  { %v1194_v27 = vsel %vm1178_vm11, %v4986_v26, 128.0 }
 0x58f   :  { %1216 = vmin.xlane.f32.xlu1 %v1194_v27 }
 0x594   :  { %v1155_v44 = vpop.xlane.xlu1 %1154 }
 0x595   :  { %vm1179_vm12 = vcmp.eq.f32.partialorder %v5501_v46, %v1155_v44 }
 0x596   :  { %v1195_v61 = vsel %vm1179_vm12, %v4986_v26, 128.0 }
 0x597   :  { %1218 = vmin.xlane.f32.xlu2 %v1195_v61 }
 0x59c   :  { %v1157_v21 = vpop.xlane.xlu2 %1156 }
 0x59d   :  { %vm1180_vm13 = vcmp.eq.f32.partialorder %v5509_v19, %v1157_v21 }
 0x59e   :  { %v1196_v13 = vsel %vm1180_vm13, %v4986_v26, 128.0 }
 0x59f   :  { %1220 = vmin.xlane.f32.xlu0 %v1196_v13 }
 0x5a4   :  { %v1159_v40 = vpop.xlane.xlu0 %1158 }
 0x5a5   :  { %vm1181_vm3 = vcmp.eq.f32.partialorder %v5517_v51, %v1159_v40 }
 0x5a6   :  { %v1197_v60 = vsel %vm1181_vm3, %v4986_v26, 128.0 }
 0x5a7   :  { %1222 = vmin.xlane.f32.xlu1 %v1197_v60 }
 0x5ac   :  { %v1161_v50 = vpop.xlane.xlu1 %1160 }
 0x5ad   :  { %vm1182_vm14 = vcmp.eq.f32.partialorder %v5525_v52, %v1161_v50 }
 0x5ae   :  { %v1198_v46 = vsel %vm1182_vm14, %v4986_v26, 128.0 }
 0x5af   :  { %1224 = vmin.xlane.f32.xlu2 %v1198_v46 }
 0x5b4   :  { %v1163_v18 = vpop.xlane.xlu2 %1162 }
 0x5b5   :  { %vm1183_vm15 = vcmp.eq.f32.partialorder %v5533_v35, %v1163_v18 }
 0x5b6   :  { %v1199_v19 = vsel %vm1183_vm15, %v4986_v26, 128.0 }
 0x5b7   :  { %1226 = vmin.xlane.f32.xlu0 %v1199_v19 }
 0x5bc   :  { %v1165_v2 = vpop.xlane.xlu0 %1164 }
 0x5bd   :  { %vm1184_vm0 = vcmp.eq.f32.partialorder %v5541_v20, %v1165_v2 }
 0x5be   :  { %v1200_v51 = vsel %vm1184_vm0, %v4986_v26, 128.0 }
 0x5bf   :  { %1228 = vmin.xlane.f32.xlu1 %v1200_v51 }
 0x5c4   :  { %v1167_v47 = vpop.xlane.xlu1 %1166 }
 0x5c5   :  { %vm1185_vm2 = vcmp.eq.f32.partialorder %v5549_v63, %v1167_v47 }
 0x5c6   :  { %v1201_v52 = vsel %vm1185_vm2, %v4986_v26, 128.0 }
 0x5c7   :  { %1230 = vmin.xlane.f32.xlu2 %v1201_v52 }
 0x5cc   :  { %v1169_v9 = vpop.xlane.xlu2 %1168 }
 0x5cd   :  { %vm1186_vm1 = vcmp.eq.f32.partialorder %v5557_v8, %v1169_v9 }
 0x5ce   :  { %v1202_v35 = vsel %vm1186_vm1, %v4986_v26, 128.0 }
 0x5cf   :  { %1232 = vmin.xlane.f32.xlu0 %v1202_v35 }
 0x5d2   :  { %v1205_v20 = vpop.xlane.xlu1 %1204 }
 0x5d3   :  { %vm1236_vm3 = vcmp.eq.f32.partialorder %v4986_v26, %v1205_v20 }
 0x5d4   :  { %v1171_v31 = vpop.xlane.xlu0 %1170 }
 0x5d5   :  { %vm1187_vm4 = vcmp.eq.f32.partialorder %v1139_v32, %v1171_v31 }
 0x5d6   :  { %v1203_v36 = vsel %vm1187_vm4, %v4986_v26, 128.0 }
 0x5d7   :  { %1234 = vmin.xlane.f32.xlu1 %v1203_v36 }
 0x5da   :  { %v1207_v27 = vpop.xlane.xlu2 %1206 }
 0x5db   :  { %vm1237_vm12 = vcmp.eq.f32.partialorder %v4986_v26, %v1207_v27 }
 0x5e2   :  { %v1209_v44 = vpop.xlane.xlu1 %1208 }
 0x5e3   :  { %vm1238_vm14 = vcmp.eq.f32.partialorder %v4986_v26, %v1209_v44 }
 0x5e4   :  { %v5650_v19 = vsel %vm1238_vm14, 1.0, %v5464_v23 }
 0x5ea   :  { %v1211_v32 = vpop.xlane.xlu2 %1210 }
 0x5eb   :  { %vm1239_vm15 = vcmp.eq.f32.partialorder %v4986_v26, %v1211_v32 }
 0x5ec   :  { %v5655_v2 = vsel %vm1239_vm15, 1.0, %v5472_v54 }
 0x5f2   :  { %v1213_v38 = vpop.xlane.xlu0 %1212 }
 0x5f3   :  { %vm1240_vm5 = vcmp.eq.f32.partialorder %v4986_v26, %v1213_v38 }
 0x5f4   :  { %v5601_v63 = vsel %vm1240_vm5, 1.0, %v5480_v43 }
 0x5f5   :  { %1276 = vadd.xlane.f32.xlu2 %v5601_v63 }
 0x5fa   :  { %v1215_v8 = vpop.xlane.xlu0 %1214 }
 0x5fb   :  { %vm1241_vm6 = vcmp.eq.f32.partialorder %v4986_v26, %v1215_v8 }
 0x5fc   :  { %v5606_v61 = vsel %vm1241_vm6, 1.0, %v5488_v56 }
 0x5fd   :  { %1278 = vadd.xlane.f32.xlu0 %v5606_v61 }
 0x602   :  { %v1217_v21 = vpop.xlane.xlu1 %1216 }
 0x603   :  { %vm1242_vm7 = vcmp.eq.f32.partialorder %v4986_v26, %v1217_v21 }
 0x604   :  { %v5611_v13 = vsel %vm1242_vm7, 1.0, %v5496_v7 }
 0x605   :  { %1280 = vadd.xlane.f32.xlu1 %v5611_v13 }
 0x60a   :  { %v1219_v43 = vpop.xlane.xlu2 %1218 }
 0x60b   :  { %vm1243_vm8 = vcmp.eq.f32.partialorder %v4986_v26, %v1219_v43 }
 0x60c   :  { %v5616_v40 = vsel %vm1243_vm8, 1.0, %v5504_v28 }
 0x60d   :  { %1282 = vadd.xlane.f32.xlu2 %v5616_v40 }
 0x612   :  { %v1221_v56 = vpop.xlane.xlu0 %1220 }
 0x613   :  { %vm1244_vm9 = vcmp.eq.f32.partialorder %v4986_v26, %v1221_v56 }
 0x614   :  { %v5621_v60 = vsel %vm1244_vm9, 1.0, %v5512_v62 }
 0x615   :  { %1284 = vadd.xlane.f32.xlu0 %v5621_v60 }
 0x61a   :  { %v1223_v7 = vpop.xlane.xlu1 %1222 }
 0x61b   :  { %vm1245_vm10 = vcmp.eq.f32.partialorder %v4986_v26, %v1223_v7 }
 0x61c   :  { %v5626_v50 = vsel %vm1245_vm10, 1.0, %v5520_v39  ;;  %v5643_v39 = vsel %vm1237_vm12, 1.0, %v5456_v16 }
 0x61d   :  { %1286 = vadd.xlane.f32.xlu1 %v5626_v50 }
 0x622   :  { %v1225_v28 = vpop.xlane.xlu2 %1224 }
 0x623   :  { %vm1246_vm11 = vcmp.eq.f32.partialorder %v4986_v26, %v1225_v28  ;;  %v5698_v28 = vld [vmem:[#allocation8 + $0x60] sm:$0xff] }
 0x624   :  { %v5631_v46 = vsel %vm1246_vm11, 1.0, %v5528_v0  ;;  %v5647_v0 = vsel %vm1236_vm3, 1.0, %v5446_v34 }
 0x625   :  { %1288 = vadd.xlane.f32.xlu2 %v5631_v46 }
 0x62a   :  { %v1227_v62 = vpop.xlane.xlu0 %1226 }
 0x62b   :  { %vm1247_vm13 = vcmp.eq.f32.partialorder %v4986_v26, %v1227_v62  ;;  %v5701_v62 = vld [vmem:[#allocation8 + $0x70] sm:$0xff] }
 0x62c   :  { %v5637_v18 = vsel %vm1247_vm13, 1.0, %v5536_v15  ;;  %v1316_v15 = vadd.f32 %v5643_v39, %v5647_v0 }
 0x62d   :  { %1290 = vadd.xlane.f32.xlu0 %v5637_v18 }
 0x62e   :  { %v1317_v47 = vadd.f32 %v1316_v15, %v5650_v19 }
 0x630   :  { %v1318_v34 = vadd.f32 %v1317_v47, %v5655_v2 }
 0x632   :  { %v1229_v51 = vpop.xlane.xlu1 %1228  ;;  %v1319_v23 = vadd.f32 %v1318_v34, %v5601_v63 }
 0x633   :  { %vm1248_vm0 = vcmp.eq.f32.partialorder %v4986_v26, %v1229_v51 }
 0x634   :  { %v5660_v16 = vsel %vm1248_vm0, 1.0, %v5544_v24  ;;  %v1320_v52 = vadd.f32 %v1319_v23, %v5606_v61  ;;  %v5676_v24 = vld [vmem:[%s7844_s1] sm:$0xff]  ;;  %v5704_v23 = vld [vmem:[#allocation8 + $0x68] sm:$0xff] }
 0x635   :  { %1292 = vadd.xlane.f32.xlu1 %v5660_v16  ;;  %v62_v38 = vmul.f32 %v5676_v24, %v5676_v24 }
 0x636   :  { %v1321_v54 = vadd.f32 %v1320_v52, %v5611_v13  ;;  %v5710_v52 = vld [vmem:[#allocation8 + $0x58] sm:$0xff] }
 0x638   :  { %v1322_v31 = vadd.f32 %v1321_v54, %v5616_v40 }
 0x63a   :  { %v1231_v9 = vpop.xlane.xlu2 %1230  ;;  %v1323_v36 = vadd.f32 %v1322_v31, %v5621_v60 }
 0x63b   :  { %vm1249_vm2 = vcmp.eq.f32.partialorder %v4986_v26, %v1231_v9 }
 0x63c   :  { %v5669_v35 = vsel %vm1249_vm2, 1.0, %v5552_v41  ;;  %v1324_v20 = vadd.f32 %v1323_v36, %v5626_v50  ;;  %v5713_v36 = vld [vmem:[#allocation8 + $0x50] sm:$0xff] }
 0x63d   :  { %1294 = vadd.xlane.f32.xlu2 %v5669_v35 }
 0x63e   :  { %v1325_v41 = vadd.f32 %v1324_v20, %v5631_v46  ;;  %v5716_v20 = vld [vmem:[#allocation8 + $0x30] sm:$0xff] }
 0x640   :  { %v1326_v8 = vadd.f32 %v1325_v41, %v5637_v18  ;;  %v5725_v41 = vld [vmem:[#allocation8 + $0x18] sm:$0xff] }
 0x642   :  { %v1233_v27 = vpop.xlane.xlu0 %1232  ;;  %v1327_v32 = vadd.f32 %v1326_v8, %v5660_v16  ;;  %v5728_v8 = vld [vmem:[#allocation8 + $0x28] sm:$0xff] }
 0x643   :  { %vm1250_vm1 = vcmp.eq.f32.partialorder %v4986_v26, %v1233_v27  ;;  %v5722_v27 = vld [vmem:[#allocation8 + $0x38] sm:$0xff] }
 0x644   :  { %v5685_v44 = vsel %vm1250_vm1, 1.0, %v5560_v11  ;;  %v1328_v21 = vadd.f32 %v1327_v32, %v5669_v35 }
 0x645   :  { %63 = vadd.xlane.f32.xlu2 %v62_v38  ;;  %1296 = vadd.xlane.f32.xlu0 %v5685_v44  ;;  %v5719_v38 = vld [vmem:[#allocation8 + $0x40] sm:$0xff] }
 0x646   :  { %v1329_v56 = vadd.f32 %v1328_v21, %v5685_v44 }
 0x64a   :  { %v1235_v43 = vpop.xlane.xlu1 %1234 }
 0x64b   :  { %vm1251_vm4 = vcmp.eq.f32.partialorder %v4986_v26, %v1235_v43 }
 0x64c   :  { %v5694_v7 = vsel %vm1251_vm4, 1.0, %v5568_v55  ;;  %v5707_v55 = vld [vmem:[#allocation8 + $0x48] sm:$0xff] }
 0x64d   :  { %1298 = vadd.xlane.f32.xlu1 %v5694_v7  ;;  %v1330_v11 = vadd.f32 %v1329_v56, %v5694_v7  ;;  %1899 = vmax.xlane.f32.xlu2 %v5698_v28 }
 0x64e   :  { %1903 = vmax.xlane.f32.xlu0 %v5701_v62 }
 0x64f   :  { %v1331_v15 = vrot.slane %v1330_v11, 4 }
 0x651   :  { %v1332_v51 = vadd.f32 %v1331_v15, %v1330_v11  ;;  %v5731_v11 = vld [vmem:[#allocation8 + $0x20] sm:$0xff] }
 0x653   :  { %v1333_v47 = vrot.slane %v1332_v51, 2 }
 0x655   :  { %v1334_v34 = vadd.f32 %v1333_v47, %v1332_v51  ;;  %1901 = vmax.xlane.f32.xlu1 %v5704_v23  ;;  %1893 = vmax.xlane.f32.xlu2 %v5707_v55  ;;  %v5734_v51 = vld [vmem:[#allocation8 + $0x10] sm:$0xff] }
 0x656   :  { %1897 = vmax.xlane.f32.xlu0 %v5710_v52 }
 0x657   :  { %v1335_v9 = vrot.slane %v1334_v34, 1 }
 0x659   :  { %v1336_v54 = vadd.f32 %v1335_v9, %v1334_v34 }
 0x65b   :  { %v1337_v31 = vmax.f32 %v1336_v54, 1.0 }
 0x65d   :  { %1895 = vmax.xlane.f32.xlu1 %v5713_v36  ;;  %1887 = vmax.xlane.f32.xlu2 %v5716_v20  ;;  %3919 = vrsqrt.f32 %v1337_v31  ;;  %vm1520_vm9 = vweird.f32 %v1337_v31 }
 0x65e   :  { %1891 = vmax.xlane.f32.xlu0 %v5719_v38 }
 0x663   :  { %v3920_v32 = vpop.eup %3919 }
 0x664   :  { %v1515_v56 = vmul.f32 %v3920_v32, %v1337_v31  ;;  %vm1521_vm6 = vweird.f32 %v3920_v32 }
 0x665   :  { %1889 = vmax.xlane.f32.xlu1 %v5722_v27  ;;  %1881 = vmax.xlane.f32.xlu2 %v5725_v41  ;;  %vm1522_vm10 = vmor %vm1520_vm9, %vm1521_vm6 }
 0x666   :  { %1885 = vmax.xlane.f32.xlu0 %v5728_v8  ;;  %v1516_v15 = vmul.f32 %v3920_v32, %v1515_v56  ;;  %v5743_v56 = vld [vmem:[%s7845_s2] sm:$0xff] }
 0x668   :  { %v1277_v21 = vpop.xlane.xlu2 %1276  ;;  %v1517_v54 = vmul.f32 0.5, %v1516_v15 }
 0x669   :  { %v1304_v43 = vmax.f32 %v1277_v21, 1.0 }
 0x66a   :  { %v1518_v21 = vsub.f32 1.5, %v1517_v54 }
 0x66b   :  { %3921 = vrsqrt.f32 %v1304_v43  ;;  %vm1384_vm7 = vweird.f32 %v1304_v43 }
 0x66d   :  { %1883 = vmax.xlane.f32.xlu1 %v5731_v11 }
 0x66e   :  { %1879 = vmax.xlane.f32.xlu0 %v5734_v51 }
 0x670   :  { %v1279_v47 = vpop.xlane.xlu0 %1278 }
 0x671   :  { %v3922_v34 = vpop.eup %3921  ;;  %v1305_v9 = vmax.f32 %v1279_v47, 1.0 }
 0x672   :  { %v1379_v5 = vmul.f32 %v3922_v34, %v1304_v43  ;;  %vm1385_vm5 = vweird.f32 %v3922_v34 }
 0x673   :  { %3923 = vrsqrt.f32 %v1305_v9  ;;  %vm1386_vm8 = vmor %vm1384_vm7, %vm1385_vm5  ;;  %vm1394_vm12 = vweird.f32 %v1305_v9 }
 0x674   :  { %v1380_v30 = vmul.f32 %v3922_v34, %v1379_v5  ;;  %v1519_v5 = vmul.f32 %v3920_v32, %v1518_v21 }
 0x675   :  { %1877 = vmax.xlane.f32.xlu1 %v5737_v53 }
 0x676   :  { %v1381_v10 = vmul.f32 0.5, %v1380_v30  ;;  %1875 = vmax.xlane.f32.xlu0 %v5743_v56  ;;  %v5747_v17 = vsel %vm1522_vm10, %v3920_v32, %v1519_v5 }
 0x678   :  { %v1382_v3 = vsub.f32 1.5, %v1381_v10  ;;  %v1281_v4 = vpop.xlane.xlu1 %1280 }
 0x679   :  { %v3924_v15 = vpop.eup %3923  ;;  %v1306_v47 = vmax.f32 %v1281_v4, 1.0 }
 0x67a   :  { %v1389_v57 = vmul.f32 %v3924_v15, %v1305_v9  ;;  %v1383_v26 = vmul.f32 %v3922_v34, %v1382_v3  ;;  %vm1395_vm11 = vweird.f32 %v3924_v15 }
 0x67b   :  { %3925 = vrsqrt.f32 %v1306_v47  ;;  %vm1396_vm13 = vmor %vm1394_vm12, %vm1395_vm11  ;;  %vm1404_vm14 = vweird.f32 %v1306_v47 }
 0x67c   :  { %v1390_v30 = vmul.f32 %v3924_v15, %v1389_v57  ;;  %v1387_v54 = vsel %vm1386_vm8, %v3922_v34, %v1383_v26 }
 0x67d   :  { %v1502_v58 = vmul.f32 %v1387_v54, %v5601_v63 }
 0x67e   :  { %v1391_v10 = vmul.f32 0.5, %v1390_v30 }
 0x67f   :  { %v5750_v37 = vmul.f32 %v5747_v17, %v1502_v58 }
 0x680   :  { %v1392_v49 = vsub.f32 1.5, %v1391_v10  ;;  %v1283_v4 = vpop.xlane.xlu2 %1282 }
 0x681   :  { %7945 = vst [vmem:[#allocation24_spill] sm:$0xff] %v5750_v37  ;;  %v3926_v43 = vpop.eup %3925  ;;  %v1307_v21 = vmax.f32 %v1283_v4, 1.0  ;;  %1568 = vmatmul.f32.vlgmr.msra.gmra.mxu2 %v5750_v37 }
 0x682   :  { %v1399_v3 = vmul.f32 %v3926_v43, %v1306_v47  ;;  %v1393_v57 = vmul.f32 %v3924_v15, %v1392_v49  ;;  %vm1405_vm3 = vweird.f32 %v3926_v43 }
 0x683   :  { %3927 = vrsqrt.f32 %v1307_v21  ;;  %vm1406_vm15 = vmor %vm1404_vm14, %vm1405_vm3  ;;  %vm1414_vm2 = vweird.f32 %v1307_v21 }
 0x684   :  { %v1400_v26 = vmul.f32 %v3926_v43, %v1399_v3  ;;  %v1397_v63 = vsel %vm1396_vm13, %v3924_v15, %v1393_v57 }
 0x685   :  { %v1503_v31 = vmul.f32 %v1397_v63, %v5606_v61 }
 0x686   :  { %v1401_v32 = vmul.f32 0.5, %v1400_v26 }
 0x687   :  { %v5755_v58 = vmul.f32 %v5747_v17, %v1503_v31 }
 0x688   :  { %v1402_v34 = vsub.f32 1.5, %v1401_v32  ;;  %v1285_v5 = vpop.xlane.xlu0 %1284 }
 0x689   :  { %7946 = vst [vmem:[#allocation25_spill] sm:$0xff] %v5755_v58  ;;  %v3928_v30 = vpop.eup %3927  ;;  %v1308_v54 = vmax.f32 %v1285_v5, 1.0  ;;  %1571 = vmatmul.f32.gmra.mxu2 %v5755_v58 }
 0x68a   :  { %v1409_v9 = vmul.f32 %v3928_v30, %v1307_v21  ;;  %v1403_v49 = vmul.f32 %v3926_v43, %v1402_v34  ;;  %vm1415_vm0 = vweird.f32 %v3928_v30 }
 0x68b   :  { %3929 = vrsqrt.f32 %v1308_v54  ;;  %vm1416_vm1 = vmor %vm1414_vm2, %vm1415_vm0  ;;  %vm1424_vm5 = vweird.f32 %v1308_v54 }
 0x68c   :  { %v1410_v10 = vmul.f32 %v3928_v30, %v1409_v9  ;;  %v1407_v15 = vsel %vm1406_vm15, %v3926_v43, %v1403_v49 }
 0x68d   :  { %v1504_v61 = vmul.f32 %v1407_v15, %v5611_v13 }
 0x68e   :  { %v1411_v4 = vmul.f32 0.5, %v1410_v10 }
 0x68f   :  { %v5760_v3 = vmul.f32 %v5747_v17, %v1504_v61 }
 0x690   :  { %v1412_v57 = vsub.f32 1.5, %v1411_v4  ;;  %v1287_v26 = vpop.xlane.xlu1 %1286 }
 0x691   :  { %7947 = vst [vmem:[#allocation26_spill] sm:$0xff] %v5760_v3  ;;  %v3930_v63 = vpop.eup %3929  ;;  %v1309_v31 = vmax.f32 %v1287_v26, 1.0  ;;  %1574 = vmatmul.f32.gmra.mxu2 %v5760_v3 }
 0x692   :  { %v1419_v47 = vmul.f32 %v3930_v63, %v1308_v54  ;;  %v1413_v32 = vmul.f32 %v3928_v30, %v1412_v57  ;;  %vm1425_vm4 = vweird.f32 %v3930_v63 }
 0x693   :  { %3931 = vrsqrt.f32 %v1309_v31  ;;  %vm1426_vm6 = vmor %vm1424_vm5, %vm1425_vm4  ;;  %vm1434_vm8 = vweird.f32 %v1309_v31 }
 0x694   :  { %v1420_v34 = vmul.f32 %v3930_v63, %v1419_v47  ;;  %v1417_v43 = vsel %vm1416_vm1, %v3928_v30, %v1413_v32 }
 0x695   :  { %v1505_v13 = vmul.f32 %v1417_v43, %v5616_v40 }
 0x696   :  { %v1421_v5 = vmul.f32 0.5, %v1420_v34 }
 0x697   :  { %v5765_v9 = vmul.f32 %v5747_v17, %v1505_v13 }
 0x698   :  { %v1422_v49 = vsub.f32 1.5, %v1421_v5  ;;  %v1289_v10 = vpop.xlane.xlu2 %1288 }
 0x699   :  { %7948 = vst [vmem:[#allocation27_spill] sm:$0xff] %v5765_v9  ;;  %v3932_v15 = vpop.eup %3931  ;;  %v1310_v61 = vmax.f32 %v1289_v10, 1.0  ;;  %1577 = vmatmul.f32.gmra.mxu2 %v5765_v9 }
 0x69a   :  { %v1429_v21 = vmul.f32 %v3932_v15, %v1309_v31  ;;  %v1423_v4 = vmul.f32 %v3930_v63, %v1422_v49  ;;  %vm1435_vm7 = vweird.f32 %v3932_v15 }
 0x69b   :  { %3933 = vrsqrt.f32 %v1310_v61  ;;  %vm1436_vm9 = vmor %vm1434_vm8, %vm1435_vm7  ;;  %vm1444_vm11 = vweird.f32 %v1310_v61 }
 0x69c   :  { %v1430_v57 = vmul.f32 %v3932_v15, %v1429_v21  ;;  %v1427_v30 = vsel %vm1426_vm6, %v3930_v63, %v1423_v4 }
 0x69d   :  { %v1506_v40 = vmul.f32 %v1427_v30, %v5621_v60 }
 0x69e   :  { %v1431_v26 = vmul.f32 0.5, %v1430_v57 }
 0x69f   :  { %v5770_v47 = vmul.f32 %v5747_v17, %v1506_v40 }
 0x6a0   :  { %v1432_v32 = vsub.f32 1.5, %v1431_v26  ;;  %v1291_v34 = vpop.xlane.xlu0 %1290 }
 0x6a1   :  { %7949 = vst [vmem:[#allocation28_spill] sm:$0xff] %v5770_v47  ;;  %v3934_v43 = vpop.eup %3933  ;;  %v1311_v13 = vmax.f32 %v1291_v34, 1.0  ;;  %1580 = vmatmul.f32.gmra.mxu2 %v5770_v47 }
 0x6a2   :  { %v1439_v54 = vmul.f32 %v3934_v43, %v1310_v61  ;;  %v1433_v5 = vmul.f32 %v3932_v15, %v1432_v32  ;;  %vm1445_vm10 = vweird.f32 %v3934_v43 }
 0x6a3   :  { %3935 = vrsqrt.f32 %v1311_v13  ;;  %vm1446_vm12 = vmor %vm1444_vm11, %vm1445_vm10  ;;  %vm1454_vm3 = vweird.f32 %v1311_v13 }
 0x6a4   :  { %v1440_v49 = vmul.f32 %v3934_v43, %v1439_v54  ;;  %v1437_v63 = vsel %vm1436_vm9, %v3932_v15, %v1433_v5 }
 0x6a5   :  { %v1507_v60 = vmul.f32 %v1437_v63, %v5626_v50 }
 0x6a6   :  { %v1441_v10 = vmul.f32 0.5, %v1440_v49 }
 0x6a7   :  { %v5775_v21 = vmul.f32 %v5747_v17, %v1507_v60 }
 0x6a8   :  { %v1442_v4 = vsub.f32 1.5, %v1441_v10  ;;  %v1293_v57 = vpop.xlane.xlu1 %1292 }
 0x6a9   :  { %7950 = vst [vmem:[#allocation29_spill] sm:$0xff] %v5775_v21  ;;  %v3936_v30 = vpop.eup %3935  ;;  %v1312_v40 = vmax.f32 %v1293_v57, 1.0  ;;  %1583 = vmatmul.f32.gmra.mxu2 %v5775_v21 }
 0x6aa   :  { %v1449_v31 = vmul.f32 %v3936_v30, %v1311_v13  ;;  %v1443_v26 = vmul.f32 %v3934_v43, %v1442_v4  ;;  %vm1455_vm13 = vweird.f32 %v3936_v30 }
 0x6ab   :  { %3937 = vrsqrt.f32 %v1312_v40  ;;  %vm1456_vm14 = vmor %vm1454_vm3, %vm1455_vm13  ;;  %vm1464_vm0 = vweird.f32 %v1312_v40 }
 0x6ac   :  { %v1450_v32 = vmul.f32 %v3936_v30, %v1449_v31  ;;  %v1447_v15 = vsel %vm1446_vm12, %v3934_v43, %v1443_v26 }
 0x6ad   :  { %v1508_v50 = vmul.f32 %v1447_v15, %v5631_v46 }
 0x6ae   :  { %v1451_v34 = vmul.f32 0.5, %v1450_v32 }
 0x6af   :  { %v5780_v54 = vmul.f32 %v5747_v17, %v1508_v50 }
 0x6b0   :  { %v1452_v5 = vsub.f32 1.5, %v1451_v34  ;;  %v1295_v49 = vpop.xlane.xlu2 %1294 }
 0x6b1   :  { %7951 = vst [vmem:[#allocation30_spill] sm:$0xff] %v5780_v54  ;;  %v3938_v63 = vpop.eup %3937  ;;  %v1313_v60 = vmax.f32 %v1295_v49, 1.0  ;;  %1586 = vmatmul.f32.gmra.mxu2 %v5780_v54 }
 0x6b2   :  { %v1459_v61 = vmul.f32 %v3938_v63, %v1312_v40  ;;  %v1453_v10 = vmul.f32 %v3936_v30, %v1452_v5  ;;  %vm1465_vm15 = vweird.f32 %v3938_v63 }
 0x6b3   :  { %3939 = vrsqrt.f32 %v1313_v60  ;;  %vm1466_vm2 = vmor %vm1464_vm0, %vm1465_vm15  ;;  %vm1474_vm4 = vweird.f32 %v1313_v60 }
 0x6b4   :  { %v1460_v4 = vmul.f32 %v3938_v63, %v1459_v61  ;;  %v1457_v43 = vsel %vm1456_vm14, %v3936_v30, %v1453_v10 }
 0x6b5   :  { %v1509_v46 = vmul.f32 %v1457_v43, %v5637_v18 }
 0x6b6   :  { %v1461_v57 = vmul.f32 0.5, %v1460_v4 }
 0x6b7   :  { %v5785_v31 = vmul.f32 %v5747_v17, %v1509_v46 }
 0x6b8   :  { %v1462_v26 = vsub.f32 1.5, %v1461_v57  ;;  %v64_v32 = vpop.xlane.xlu2 %63  ;;  %v1297_v15 = vpop.xlane.xlu0 %1296 }
 0x6b9   :  { %7952 = vst [vmem:[#allocation31_spill] sm:$0xff] %v5785_v31  ;;  %v3940_v50 = vpop.eup %3939  ;;  %v5787_v34 = vmax.f32 %v64_v32, 1e-24  ;;  %v5789_v13 = vmax.f32 %v1297_v15, 1.0  ;;  %1589 = vmatmul.f32.gmra.mxu2 %v5785_v31 }
 0x6ba   :  { %v1469_v5 = vmul.f32 %v3940_v50, %v1313_v60  ;;  %v1463_v30 = vmul.f32 %v3938_v63, %v1462_v26  ;;  %vm1475_vm1 = vweird.f32 %v3940_v50 }
 0x6bb   :  { %3941 = vrsqrt.f32 %v5787_v34  ;;  %vm1476_vm5 = vmor %vm1474_vm4, %vm1475_vm1  ;;  %vm72_vm6 = vweird.f32 %v5787_v34  ;;  %vm1484_vm10 = vweird.f32 %v5789_v13 }
 0x6bc   :  { %v1470_v18 = vmul.f32 %v3940_v50, %v1469_v5  ;;  %3943 = vrsqrt.f32 %v5789_v13  ;;  %v1467_v49 = vsel %vm1466_vm2, %v3938_v63, %v1463_v30 }
 0x6bd   :  { %v1510_v61 = vmul.f32 %v1467_v49, %v5660_v16 }
 0x6be   :  { %v1471_v10 = vmul.f32 0.5, %v1470_v18 }
 0x6bf   :  { %v5796_v4 = vmul.f32 %v5747_v17, %v1510_v61 }
 0x6c0   :  { %v1472_v43 = vsub.f32 1.5, %v1471_v10  ;;  %v1299_v46 = vpop.xlane.xlu1 %1298  ;;  %v1900_v57 = vpop.xlane.xlu2 %1899 }
 0x6c1   :  { %7953 = vst [vmem:[#allocation32_spill] sm:$0xff] %v5796_v4  ;;  %v3942_v40 = vpop.eup %3941  ;;  %v5798_v32 = vmax.f32 %v1299_v46, 1.0  ;;  %v1918_v26 = vsub.f32 %v5698_v28, %v1900_v57  ;;  %v1904_v15 = vpop.xlane.xlu0 %1903  ;;  %1592 = vmatmul.f32.gmra.mxu2 %v5796_v4 }
 0x6c2   :  { %v5802_v5 = vpop.eup %3943  ;;  %v67_v16 = vmul.f32 %v3942_v40, %v5787_v34  ;;  %v1920_v63 = vsub.f32 %v5701_v62, %v1904_v15  ;;  %v1473_v30 = vmul.f32 %v3940_v50, %v1472_v43  ;;  %v1620_v62 = vld [vmem:[%s7846_s3 + $0x78] sm:$0xff]  ;;  %vm73_vm7 = vweird.f32 %v3942_v40 }
 0x6c3   :  { %v1479_v18 = vmul.f32 %v5802_v5, %v5789_v13  ;;  %3945 = vrsqrt.f32 %v5798_v32  ;;  %v1947_v49 = vmul.f32 1.442695, %v1918_v26  ;;  %3826 = vmatpush.msra.mxu3 %v1620_v62  ;;  %1625 = vmatpush.msrb.mxu0 %v1620_v62  ;;  %vm1485_vm8 = vweird.f32 %v5802_v5  ;;  %vm74_vm9 = vmor %vm72_vm6, %vm73_vm7  ;;  %v1618_v62 = vld [vmem:[%s7846_s3 + $0x68] sm:$0xff] }
 0x6c4   :  { %v68_v61 = vmul.f32 %v3942_v40, %v67_v16  ;;  %v1951_v28 = vmul.f32 1.442695, %v1920_v63  ;;  %v1477_v10 = vsel %vm1476_vm5, %v3940_v50, %v1473_v30  ;;  %v1619_v50 = vld [vmem:[%s7846_s3 + $0x70] sm:$0xff]  ;;  %vm1486_vm11 = vmor %vm1484_vm10, %vm1485_vm8  ;;  %vm1494_vm13 = vweird.f32 %v5798_v32 }
 0x6c5   :  { %v1480_v46 = vmul.f32 %v5802_v5, %v1479_v18  ;;  %3947 = vpow2.f32 %v1947_v49  ;;  %v1511_v60 = vmul.f32 %v1477_v10, %v5669_v35  ;;  %3827 = vmatpush.msra.mxu3 %v1619_v50  ;;  %1626 = vmatpush.msrb.mxu0 %v1619_v50 }
 0x6c6   :  { %v69_v57 = vmul.f32 0.5, %v68_v61  ;;  %3949 = vpow2.f32 %v1951_v28 }
 0x6c7   :  { %v1481_v43 = vmul.f32 0.5, %v1480_v46  ;;  %v5815_v15 = vmul.f32 %v5747_v17, %v1511_v60  ;;  %3828 = vmatpush.msra.mxu3 %v1618_v62  ;;  %1627 = vmatpush.msrb.mxu0 %v1618_v62 }
 0x6c8   :  { %v70_v26 = vsub.f32 1.5, %v69_v57  ;;  %v1902_v35 = vpop.xlane.xlu1 %1901  ;;  %v1894_v16 = vpop.xlane.xlu2 %1893 }
 0x6c9   :  { %7954 = vst [vmem:[#allocation33_spill] sm:$0xff] %v5815_v15  ;;  %v5821_v63 = vpop.eup %3945  ;;  %v1482_v30 = vsub.f32 1.5, %v1481_v43  ;;  %v1919_v18 = vsub.f32 %v5704_v23, %v1902_v35  ;;  %v1915_v49 = vsub.f32 %v5707_v55, %v1894_v16  ;;  %v1898_v61 = vpop.xlane.xlu0 %1897  ;;  %1595 = vmatmul.f32.gmra.mxu2 %v5815_v15  ;;  %v1617_v16 = vld [vmem:[%s7846_s3 + $0x60] sm:$0xff] }
 0x6ca   :  { %v71_v28 = vmul.f32 %v3942_v40, %v70_v26  ;;  %v1489_v10 = vmul.f32 %v5821_v63, %v5798_v32  ;;  %v1917_v46 = vsub.f32 %v5710_v52, %v1898_v61  ;;  %3829 = vmatpush.msra.mxu3 %v1617_v16  ;;  %vm1495_vm12 = vweird.f32 %v5821_v63  ;;  %1628 = vmatpush.msrb.mxu0 %v1617_v16  ;;  %v1612_v16 = vld [vmem:[%s7846_s3 + $0x38] sm:$0xff] }
 0x6cb   :  { %v5830_v60 = vpop.eup %3947  ;;  %v1949_v23 = vmul.f32 1.442695, %v1919_v18  ;;  %v1941_v55 = vmul.f32 1.442695, %v1915_v49  ;;  %v1483_v57 = vmul.f32 %v5802_v5, %v1482_v30  ;;  %vm1496_vm3 = vmor %vm1494_vm13, %vm1495_vm12 }
 0x6cc   :  { %v5840_v43 = vpop.eup %3949  ;;  %v75_v52 = vsel %vm74_vm9, %v3942_v40, %v71_v28  ;;  %v1490_v50 = vmul.f32 %v5821_v63, %v1489_v10  ;;  %v1945_v26 = vmul.f32 1.442695, %v1917_v46  ;;  %v1966_v34 = vmul.f32 %v5830_v60, %v5830_v60 }
 0x6cd   :  { %v5848_v13 = vmul.f32 %v75_v52, %v5676_v24  ;;  %3951 = vpow2.f32 %v1949_v23  ;;  %v1968_v35 = vmul.f32 %v5840_v43, %v5840_v43  ;;  %v1487_v40 = vsel %vm1486_vm11, %v5802_v5, %v1483_v57  ;;  %v1616_v24 = vld [vmem:[%s7846_s3 + $0x58] sm:$0xff]  ;;  %v1615_v5 = vld [vmem:[%s7846_s3 + $0x50] sm:$0xff] }
 0x6ce   :  { %v1491_v30 = vmul.f32 0.5, %v1490_v50  ;;  %3953 = vpow2.f32 %v1941_v55  ;;  %1995 = vadd.xlane.f32.xlu0 %v1966_v34  ;;  %v1512_v18 = vmul.f32 %v1487_v40, %v5685_v44  ;;  %3830 = vmatpush.msra.mxu3 %v1616_v24  ;;  %v1614_v55 = vld [vmem:[%s7846_s3 + $0x48] sm:$0xff] }
 0x6cf   :  { %161 = vst [vmem:[#allocation8] sm:$0xff] %v5848_v13  ;;  %1999 = vadd.xlane.f32.xlu2 %v1968_v35  ;;  %3137 = vmatpush.msra.mxu1 %v5848_v13  ;;  %3955 = vpow2.f32 %v1945_v26 }
 0x6d0   :  { %v1492_v49 = vsub.f32 1.5, %v1491_v30  ;;  %v1896_v61 = vpop.xlane.xlu1 %1895  ;;  %v1888_v28 = vpop.xlane.xlu2 %1887  ;;  %v5866_v10 = vmul.f32 %v5747_v17, %v1512_v18  ;;  %3831 = vmatpush.msra.mxu3 %v1615_v5  ;;  %1629 = vmatpush.msrb.mxu0 %v1616_v24  ;;  %3774 = dma.vmem_to_hbm [thread:$0]  %s3767_s24, 2048, %s3769_s22, [#allocation9], %s4218_s25, %s4218_s25, %s4219_s26  }
 0x6d1   :  { %v1916_v44 = vsub.f32 %v5713_v36, %v1896_v61  ;;  %v1912_v46 = vsub.f32 %v5716_v20, %v1888_v28  ;;  %v1892_v23 = vpop.xlane.xlu0 %1891  ;;  %v1613_v20 = vld [vmem:[%s7846_s3 + $0x40] sm:$0xff]  ;;  %v1610_v28 = vld [vmem:[%s7846_s3 + $0x28] sm:$0xff] }
 0x6d2   :  { %7955 = vst [vmem:[#allocation34_spill] sm:$0xff] %v5866_v10  ;;  %v1914_v57 = vsub.f32 %v5719_v38, %v1892_v23  ;;  %1598 = vmatmul.f32.gmra.mxu2 %v5866_v10  ;;  %v1493_v62 = vmul.f32 %v5821_v63, %v1492_v49  ;;  %3832 = vmatpush.msra.mxu3 %v1614_v55 }
 0x6d3   :  { %v5878_v52 = vpop.eup %3951  ;;  %v1943_v50 = vmul.f32 1.442695, %v1916_v44  ;;  %v1935_v36 = vmul.f32 1.442695, %v1912_v46  ;;  %1630 = vmatpush.msrb.mxu0 %v1615_v5 }
 0x6d4   :  { %v5885_v32 = vpop.eup %3953  ;;  %v1967_v38 = vmul.f32 %v5878_v52, %v5878_v52  ;;  %v1497_v26 = vsel %vm1496_vm3, %v5821_v63, %v1493_v62  ;;  %v1939_v34 = vmul.f32 1.442695, %v1914_v57  ;;  %3833 = vmatpush.msra.mxu3 %v1613_v20 }
 0x6d5   :  { %3957 = vpow2.f32 %v1943_v50  ;;  %v1963_v35 = vmul.f32 %v5885_v32, %v5885_v32  ;;  %v1513_v40 = vmul.f32 %v1497_v26, %v5694_v7  ;;  %v5896_v30 = vpop.eup %3955  ;;  %v1611_v7 = vld [vmem:[%s7846_s3 + $0x30] sm:$0xff]  ;;  %1631 = vmatpush.msrb.mxu0 %v1614_v55 }
 0x6d6   :  { %3959 = vpow2.f32 %v1935_v36  ;;  %1997 = vadd.xlane.f32.xlu1 %v1967_v38  ;;  %3834 = vmatpush.msra.mxu3 %v1612_v16  ;;  %v1965_v46 = vmul.f32 %v5896_v30, %v5896_v30  ;;  %v1608_v36 = vld [vmem:[%s7846_s3 + $0x18] sm:$0xff]  ;;  %v1607_v38 = vld [vmem:[%s7846_s3 + $0x10] sm:$0xff] }
 0x6d7   :  { %1989 = vadd.xlane.f32.xlu0 %v1963_v35  ;;  %1873 = vmax.xlane.f32.xlu2 %v5848_v13  ;;  %v5900_v63 = vmul.f32 %v5747_v17, %v1513_v40  ;;  %3961 = vpow2.f32 %v1939_v34  ;;  %v1606_v40 = vld [vmem:[%s7846_s3 + $0x8] sm:$0xff] }
 0x6d8   :  { %v1890_v18 = vpop.xlane.xlu1 %1889  ;;  %v1882_v24 = vpop.xlane.xlu2 %1881  ;;  %3835 = vmatpush.msra.mxu3 %v1611_v7  ;;  %1632 = vmatpush.msrb.mxu0 %v1613_v20 }
 0x6d9   :  { %7956 = vst [vmem:[#allocation35_spill] sm:$0xff] %v5900_v63  ;;  %v1913_v5 = vsub.f32 %v5722_v27, %v1890_v18  ;;  %v1909_v49 = vsub.f32 %v5725_v41, %v1882_v24  ;;  %v1886_v61 = vpop.xlane.xlu0 %1885  ;;  %v1609_v27 = vld [vmem:[%s7846_s3 + $0x20] sm:$0xff] }
 0x6da   :  { %v1911_v44 = vsub.f32 %v5728_v8, %v1886_v61  ;;  %1601 = vmatmul.f32.gmra.mxu2 %v5900_v63  ;;  %3836 = vmatpush.msra.mxu3 %v1610_v28 }
 0x6db   :  { %v5914_v23 = vpop.eup %3957  ;;  %v1937_v55 = vmul.f32 1.442695, %v1913_v5  ;;  %v1929_v57 = vmul.f32 1.442695, %v1909_v49  ;;  %1633 = vmatpush.msrb.mxu0 %v1612_v16 }
 0x6dc   :  { %v5919_v41 = vpop.eup %3959  ;;  %v1964_v8 = vmul.f32 %v5914_v23, %v5914_v23  ;;  %v1933_v62 = vmul.f32 1.442695, %v1911_v44  ;;  %3837 = vmatpush.msra.mxu3 %v1609_v27 }
 0x6dd   :  { %3963 = vpow2.f32 %v1937_v55  ;;  %v1960_v50 = vmul.f32 %v5919_v41, %v5919_v41  ;;  %v5928_v20 = vpop.eup %3961  ;;  %1634 = vmatpush.msrb.mxu0 %v1611_v7  ;;  %v1605_v7 = vld [vmem:[%s7846_s3] sm:$0xff] }
 0x6de   :  { %3965 = vpow2.f32 %v1929_v57  ;;  %1993 = vadd.xlane.f32.xlu1 %v1965_v46  ;;  %3838 = vmatpush.msra.mxu3 %v1608_v36  ;;  %v1962_v18 = vmul.f32 %v5928_v20, %v5928_v20 }
 0x6df   :  { %1983 = vadd.xlane.f32.xlu0 %v1960_v50  ;;  %1991 = vadd.xlane.f32.xlu2 %v1964_v8  ;;  %3967 = vpow2.f32 %v1933_v62 }
 0x6e0   :  { %v1884_v26 = vpop.xlane.xlu1 %1883  ;;  %3839 = vmatpush.msra.mxu3 %v1607_v38  ;;  %1635 = vmatpush.msrb.mxu0 %v1610_v28 }
 0x6e1   :  { %v1910_v34 = vsub.f32 %v5731_v11, %v1884_v26  ;;  %v1880_v35 = vpop.xlane.xlu0 %1879 }
 0x6e2   :  { %v1908_v16 = vsub.f32 %v5734_v51, %v1880_v35  ;;  %3840 = vmatpush.msra.mxu3 %v1606_v40  ;;  %1636 = vmatpush.msrb.mxu0 %v1609_v27 }
 0x6e3   :  { %v5940_v24 = vpop.eup %3963  ;;  %v1931_v5 = vmul.f32 1.442695, %v1910_v34 }
 0x6e4   :  { %v5942_v49 = vpop.eup %3965  ;;  %v1961_v11 = vmul.f32 %v5940_v24, %v5940_v24  ;;  %v1927_v51 = vmul.f32 1.442695, %v1908_v16  ;;  %3841 = vmatpush.msra.mxu3 %v1605_v7  ;;  %1637 = vmatpush.msrb.mxu0 %v1608_v36 }
 0x6e5   :  { %3969 = vpow2.f32 %v1931_v5  ;;  %v1957_v61 = vmul.f32 %v5942_v49, %v5942_v49  ;;  %v5951_v28 = vpop.eup %3967 }
 0x6e6   :  { %1987 = vadd.xlane.f32.xlu1 %v1962_v18  ;;  %3971 = vpow2.f32 %v1927_v51  ;;  %v1959_v27 = vmul.f32 %v5951_v28, %v5951_v28  ;;  %1638 = vmatpush.msrb.mxu0 %v1607_v38 }
 0x6e7   :  { %1977 = vadd.xlane.f32.xlu0 %v1957_v61  ;;  %1985 = vadd.xlane.f32.xlu2 %v1961_v11 }
 0x6e8   :  { %v1878_v44 = vpop.xlane.xlu1 %1877  ;;  %1639 = vmatpush.msrb.mxu0 %v1606_v40 }
 0x6e9   :  { %v1907_v46 = vsub.f32 %v5737_v53, %v1878_v44  ;;  %v1876_v55 = vpop.xlane.xlu0 %1875 }
 0x6ea   :  { %v1906_v57 = vsub.f32 %v5743_v56, %v1876_v55  ;;  %1640 = vmatpush.msrb.mxu0 %v1605_v7 }
 0x6eb   :  { %v5957_v8 = vpop.eup %3969  ;;  %v1925_v62 = vmul.f32 1.442695, %v1907_v46 }
 0x6ec   :  { %v1923_v50 = vmul.f32 1.442695, %v1906_v57  ;;  %v1958_v26 = vmul.f32 %v5957_v8, %v5957_v8  ;;  %v5961_v53 = vpop.eup %3971 }
 0x6ed   :  { %3973 = vpow2.f32 %v1925_v62  ;;  %v1956_v56 = vmul.f32 %v5961_v53, %v5961_v53 }
 0x6ee   :  { %3975 = vpow2.f32 %v1923_v50  ;;  %1981 = vadd.xlane.f32.xlu1 %v1959_v27 }
 0x6ef   :  { %1979 = vadd.xlane.f32.xlu2 %v1958_v26 }
 0x6f3   :  { %v5965_v36 = vpop.eup %3973 }
 0x6f4   :  { %v5967_v38 = vpop.eup %3975  ;;  %v1955_v34 = vmul.f32 %v5965_v36, %v5965_v36 }
 0x6f5   :  { %v1954_v35 = vmul.f32 %v5967_v38, %v5967_v38 }
 0x6f6   :  { %1975 = vadd.xlane.f32.xlu1 %v1956_v56 }
 0x6f7   :  { %1973 = vadd.xlane.f32.xlu2 %v1955_v34  ;;  %1971 = vadd.xlane.f32.xlu0 %v1954_v35 }
 0x6ff   :  { %1272 = vadd.xlane.f32.xlu2 %v5650_v19  ;;  %1270 = vadd.xlane.f32.xlu0 %v5643_v39 }
 0x704   :  { %v1569_v40 = vpop.f32.mrf.mxu2 }
 0x705   :  { %1653 = vmatmul.f32.vlgmr.msra.gmra.mxu3 %v1569_v40 }
 0x70c   :  { %v1572_v16 = vpop.f32.mrf.mxu2 }
 0x70d   :  { %1656 = vmatmul.f32.gmra.mxu3 %v1572_v16 }
 0x714   :  { %v1575_v18 = vpop.f32.mrf.mxu2 }
 0x715   :  { %1659 = vmatmul.f32.gmra.mxu3 %v1575_v18 }
 0x71c   :  { %v1578_v5 = vpop.f32.mrf.mxu2 }
 0x71d   :  { %1662 = vmatmul.f32.gmra.mxu3 %v1578_v5 }
 0x724   :  { %v1581_v11 = vpop.f32.mrf.mxu2 }
 0x725   :  { %1665 = vmatmul.f32.gmra.mxu3 %v1581_v11 }
 0x72c   :  { %v1584_v7 = vpop.f32.mrf.mxu2 }
 0x72d   :  { %1668 = vmatmul.f32.gmra.mxu3 %v1584_v7 }
 0x734   :  { %v1587_v51 = vpop.f32.mrf.mxu2 }
 0x735   :  { %1671 = vmatmul.f32.gmra.mxu3 %v1587_v51 }
 0x73c   :  { %v1590_v61 = vpop.f32.mrf.mxu2 }
 0x73d   :  { %1674 = vmatmul.f32.gmra.mxu3 %v1590_v61 }
 0x741   :  { %v5975_v44 = vpop.xlane.xlu0 %1995 }
 0x742   :  { %v2000_v46 = vpop.xlane.xlu2 %1999  ;;  %3977 = vrsqrt.f32 %v5975_v44  ;;  %vm2137_vm4 = vweird.f32 %v5975_v44 }
 0x743   :  { %3979 = vrsqrt.f32 %v2000_v46  ;;  %vm2157_vm15 = vweird.f32 %v2000_v46 }
 0x744   :  { %v1593_v55 = vpop.f32.mrf.mxu2 }
 0x745   :  { %1677 = vmatmul.f32.gmra.mxu3 %v1593_v55 }
 0x748   :  { %v5978_v57 = vpop.eup %3977 }
 0x749   :  { %v3980_v27 = vpop.eup %3979  ;;  %v2132_v62 = vmul.f32 %v5978_v57, %v5975_v44  ;;  %v1998_v50 = vpop.xlane.xlu1 %1997  ;;  %vm2138_vm5 = vweird.f32 %v5978_v57 }
 0x74a   :  { %v2152_v26 = vmul.f32 %v3980_v27, %v2000_v46  ;;  %3981 = vrsqrt.f32 %v1998_v50  ;;  %v1874_v56 = vpop.xlane.xlu2 %1873  ;;  %v5982_v34 = vpop.xlane.xlu0 %1989  ;;  %vm2158_vm14 = vweird.f32 %v3980_v27  ;;  %vm2147_vm2 = vweird.f32 %v1998_v50  ;;  %vm6021_vm7 = vmor %vm2137_vm4, %vm2138_vm5 }
 0x74b   :  { %v1905_v35 = vsub.f32 %v5848_v13, %v1874_v56  ;;  %v2133_v16 = vmul.f32 %v5978_v57, %v2132_v62  ;;  %3983 = vrsqrt.f32 %v5982_v34  ;;  %vm2159_vm0 = vmor %vm2157_vm15, %vm2158_vm14  ;;  %vm2107_vm13 = vweird.f32 %v5982_v34 }
 0x74c   :  { %v2153_v40 = vmul.f32 %v3980_v27, %v2152_v26  ;;  %v1596_v18 = vpop.f32.mrf.mxu2 }
 0x74d   :  { %v1921_v5 = vmul.f32 1.442695, %v1905_v35  ;;  %1680 = vmatmul.f32.gmra.mxu3 %v1596_v18  ;;  %v2134_v61 = vmul.f32 0.5, %v2133_v16 }
 0x74e   :  { %v2154_v11 = vmul.f32 0.5, %v2153_v40 }
 0x74f   :  { %3985 = vpow2.f32 %v1921_v5  ;;  %v2135_v26 = vsub.f32 1.5, %v2134_v61 }
 0x750   :  { %v3982_v7 = vpop.eup %3981  ;;  %v2155_v51 = vsub.f32 1.5, %v2154_v11 }
 0x751   :  { %v2142_v55 = vmul.f32 %v3982_v7, %v1998_v50  ;;  %v1994_v63 = vpop.xlane.xlu1 %1993  ;;  %v5987_v10 = vpop.eup %3983  ;;  %vm2148_vm1 = vweird.f32 %v3982_v7 }
 0x752   :  { %v5989_v15 = vpop.xlane.xlu2 %1991  ;;  %3987 = vrsqrt.f32 %v1994_v63  ;;  %v2156_v13 = vmul.f32 %v3980_v27, %v2155_v51  ;;  %v2102_v16 = vmul.f32 %v5987_v10, %v5982_v34  ;;  %v5996_v18 = vpop.xlane.xlu0 %1983  ;;  %vm2149_vm6 = vmor %vm2147_vm2, %vm2148_vm1  ;;  %vm2127_vm8 = vweird.f32 %v1994_v63 }
 0x753   :  { %v2143_v62 = vmul.f32 %v3982_v7, %v2142_v55  ;;  %3989 = vrsqrt.f32 %v5989_v15  ;;  %vm2117_vm11 = vweird.f32 %v5989_v15  ;;  %vm2108_vm14 = vweird.f32 %v5987_v10 }
 0x754   :  { %v2160_v56 = vsel %vm2159_vm0, %v3980_v27, %v2156_v13  ;;  %3991 = vrsqrt.f32 %v5996_v18  ;;  %v2103_v61 = vmul.f32 %v5987_v10, %v2102_v16  ;;  %vm6092_vm15 = vmor %vm2107_vm13, %vm2108_vm14 }
 0x755   :  { %v5992_v35 = vpop.eup %3985  ;;  %v2144_v40 = vmul.f32 0.5, %v2143_v62  ;;  %v1599_v5 = vpop.f32.mrf.mxu2  ;;  %v5999_v11 = vmul.f32 %v5840_v43, %v2160_v56  ;;  %v2136_v56 = vmul.f32 %v5978_v57, %v2135_v26 }
 0x756   :  { %1683 = vmatmul.f32.gmra.mxu3 %v1599_v5  ;;  %v1953_v46 = vmul.f32 %v5992_v35, %v5992_v35  ;;  %v2104_v4 = vmul.f32 0.5, %v2103_v61 }
 0x757   :  { %v2145_v51 = vsub.f32 1.5, %v2144_v40  ;;  %2177 = vmatpush.xpose.msrb.mxu3 %v5999_v11  ;;  %v2140_v44 = vsel %vm6021_vm7, %v5978_v57, %v2136_v56  ;;  %vm2077_vm7 = vweird.f32 %v5996_v18 }
 0x758   :  { %v3988_v27 = vpop.eup %3987  ;;  %1969 = vadd.xlane.f32.xlu1 %v1953_v46  ;;  %v6040_v61 = vmul.f32 %v5830_v60, %v2140_v44 }
 0x759   :  { %v6008_v43 = vpop.eup %3989  ;;  %v2122_v55 = vmul.f32 %v3988_v27, %v1994_v63  ;;  %v6011_v13 = vpop.xlane.xlu1 %1987  ;;  %v2146_v62 = vmul.f32 %v3982_v7, %v2145_v51  ;;  %vm2128_vm9 = vweird.f32 %v3988_v27 }
 0x75a   :  { %v2112_v40 = vmul.f32 %v6008_v43, %v5989_v15  ;;  %v6016_v5 = vpop.xlane.xlu2 %1985  ;;  %3993 = vrsqrt.f32 %v6011_v13  ;;  %v6033_v21 = vpop.eup %3991  ;;  %vm6043_vm10 = vmor %vm2127_vm8, %vm2128_vm9  ;;  %vm2118_vm12 = vweird.f32 %v6008_v43  ;;  %vm2097_vm0 = vweird.f32 %v6011_v13 }
 0x75b   :  { %v2123_v16 = vmul.f32 %v3988_v27, %v2122_v55  ;;  %3995 = vrsqrt.f32 %v6016_v5  ;;  %v2150_v46 = vsel %vm2149_vm6, %v3982_v7, %v2146_v62  ;;  %v2072_v57 = vmul.f32 %v6033_v21, %v5996_v18  ;;  %v6055_v60 = vpop.xlane.xlu0 %1977  ;;  %vm6075_vm3 = vmor %vm2117_vm11, %vm2118_vm12 }
 0x75c   :  { %v2113_v51 = vmul.f32 %v6008_v43, %v2112_v40  ;;  %v6028_v26 = vmul.f32 %v5878_v52, %v2150_v46  ;;  %vm2087_vm4 = vweird.f32 %v6016_v5  ;;  %vm2078_vm8 = vweird.f32 %v6033_v21 }
 0x75d   :  { %v2124_v31 = vmul.f32 0.5, %v2123_v16  ;;  %v1602_v54 = vpop.f32.mrf.mxu2  ;;  %vm6168_vm9 = vmor %vm2077_vm7, %vm2078_vm8 }
 0x75e   :  { %v2114_v55 = vmul.f32 0.5, %v2113_v51  ;;  %1686 = vmatmul.f32.gmra.mxu3 %v1602_v54 }
 0x75f   :  { %v2125_v47 = vsub.f32 1.5, %v2124_v31  ;;  %2178 = vmatpush.xpose.msrb.mxu3 %v6028_v26  ;;  %v2105_v31 = vsub.f32 1.5, %v2104_v4 }
 0x760   :  { %v6036_v7 = vpop.eup %3993  ;;  %v2115_v52 = vsub.f32 1.5, %v2114_v55  ;;  %1268 = vadd.xlane.f32.xlu1 %v5647_v0 }
 0x761   :  { %v6049_v54 = vpop.eup %3995  ;;  %v2092_v56 = vmul.f32 %v6036_v7, %v6011_v13  ;;  %v6057_v63 = vpop.xlane.xlu1 %1981  ;;  %v2126_v40 = vmul.f32 %v3988_v27, %v2125_v47  ;;  %v2106_v62 = vmul.f32 %v5987_v10, %v2105_v31  ;;  %vm2098_vm2 = vweird.f32 %v6036_v7 }
 0x762   :  { %v2082_v50 = vmul.f32 %v6049_v54, %v6016_v5  ;;  %v6061_v16 = vpop.xlane.xlu2 %1979  ;;  %3997 = vrsqrt.f32 %v6057_v63  ;;  %v2116_v4 = vmul.f32 %v6008_v43, %v2115_v52  ;;  %v2073_v52 = vmul.f32 %v6033_v21, %v2072_v57  ;;  %vm6128_vm1 = vmor %vm2097_vm0, %vm2098_vm2 }
 0x763   :  { %v2093_v46 = vmul.f32 %v6036_v7, %v2092_v56  ;;  %3999 = vrsqrt.f32 %v6061_v16  ;;  %2179 = vmatpush.xpose.msrb.mxu3 %v6040_v61  ;;  %v2130_v47 = vsel %vm6043_vm10, %v3988_v27, %v2126_v40  ;;  %vm2088_vm5 = vweird.f32 %v6049_v54 }
 0x764   :  { %v2083_v44 = vmul.f32 %v6049_v54, %v2082_v50  ;;  %4001 = vrsqrt.f32 %v6055_v60  ;;  %v6083_v55 = vmul.f32 %v5896_v30, %v2130_v47  ;;  %v2120_v15 = vsel %vm6075_vm3, %v6008_v43, %v2116_v4  ;;  %vm6148_vm6 = vmor %vm2087_vm4, %vm2088_vm5 }
 0x765   :  { %v2094_v27 = vmul.f32 0.5, %v2093_v46  ;;  %v2074_v43 = vmul.f32 0.5, %v2073_v52  ;;  %v6109_v4 = vmul.f32 %v5914_v23, %v2120_v15  ;;  %v2110_v46 = vsel %vm6092_vm15, %v5987_v10, %v2106_v62 }
 0x766   :  { %v2084_v56 = vmul.f32 0.5, %v2083_v44  ;;  %vm2067_vm10 = vweird.f32 %v6057_v63  ;;  %vm2057_vm13 = vweird.f32 %v6061_v16  ;;  %vm2047_vm15 = vweird.f32 %v6055_v60 }
 0x767   :  { %v2095_v50 = vsub.f32 1.5, %v2094_v27  ;;  %2180 = vmatpush.xpose.msrb.mxu3 %v6083_v55  ;;  %v2075_v15 = vsub.f32 1.5, %v2074_v43 }
 0x768   :  { %v6097_v30 = vpop.eup %3997  ;;  %1274 = vadd.xlane.f32.xlu1 %v5655_v2  ;;  %v2085_v51 = vsub.f32 1.5, %v2084_v56  ;;  %v6139_v56 = vmul.f32 %v5885_v32, %v2110_v46 }
 0x769   :  { %v6102_v31 = vpop.eup %3999  ;;  %v2062_v34 = vmul.f32 %v6097_v30, %v6057_v63  ;;  %v6106_v57 = vpop.xlane.xlu1 %1975  ;;  %v2096_v52 = vmul.f32 %v6036_v7, %v2095_v50  ;;  %v2076_v18 = vmul.f32 %v6033_v21, %v2075_v15  ;;  %vm2068_vm11 = vweird.f32 %v6097_v30 }
 0x76a   :  { %v6114_v47 = vpop.eup %4001  ;;  %v2052_v44 = vmul.f32 %v6102_v31, %v6061_v16  ;;  %v6118_v27 = vpop.xlane.xlu2 %1973  ;;  %4003 = vrsqrt.f32 %v6106_v57  ;;  %v2086_v50 = vmul.f32 %v6049_v54, %v2085_v51  ;;  %vm2069_vm12 = vmor %vm2067_vm10, %vm2068_vm11  ;;  %vm2058_vm3 = vweird.f32 %v6102_v31 }
 0x76b   :  { %v2063_v9 = vmul.f32 %v6097_v30, %v2062_v34  ;;  %2181 = vmatpush.xpose.msrb.mxu3 %v6109_v4  ;;  %v2042_v23 = vmul.f32 %v6114_v47, %v6055_v60  ;;  %4005 = vrsqrt.f32 %v6118_v27  ;;  %v6141_v40 = vpop.xlane.xlu0 %1971  ;;  %v2100_v5 = vsel %vm6128_vm1, %v6036_v7, %v2096_v52  ;;  %vm2059_vm14 = vmor %vm2057_vm13, %vm2058_vm3 }
 0x76c   :  { %v2053_v62 = vmul.f32 %v6102_v31, %v2052_v44  ;;  %4007 = vrsqrt.f32 %v6141_v40  ;;  %v6159_v7 = vmul.f32 %v5928_v20, %v2100_v5  ;;  %v2090_v51 = vsel %vm6148_vm6, %v6049_v54, %v2086_v50 }
 0x76d   :  { %v2064_v13 = vmul.f32 0.5, %v2063_v9  ;;  %v2043_v9 = vmul.f32 %v6114_v47, %v2042_v23  ;;  %vm2048_vm0 = vweird.f32 %v6114_v47  ;;  %vm2037_vm1 = vweird.f32 %v6106_v57 }
 0x76e   :  { %v2054_v32 = vmul.f32 0.5, %v2053_v62  ;;  %v6175_v62 = vmul.f32 %v5940_v24, %v2090_v51  ;;  %vm2049_vm2 = vmor %vm2047_vm15, %vm2048_vm0  ;;  %vm2027_vm6 = vweird.f32 %v6118_v27 }
 0x76f   :  { %2182 = vmatpush.xpose.msrb.mxu3 %v6139_v56  ;;  %v2065_v43 = vsub.f32 1.5, %v2064_v13  ;;  %v2044_v20 = vmul.f32 0.5, %v2043_v9  ;;  %v2080_v13 = vsel %vm6168_vm9, %v6033_v21, %v2076_v18  ;;  %vm2017_vm9 = vweird.f32 %v6141_v40 }
 0x770   :  { %v6152_v44 = vpop.eup %4003  ;;  %v2055_v23 = vsub.f32 1.5, %v2054_v32  ;;  %v6187_v63 = vmul.f32 %v5919_v41, %v2080_v13 }
 0x771   :  { %v2032_v46 = vmul.f32 %v6152_v44, %v6106_v57  ;;  %v4006_v52 = vpop.eup %4005  ;;  %v2066_v5 = vmul.f32 %v6097_v30, %v2065_v43  ;;  %v2045_v24 = vsub.f32 1.5, %v2044_v20  ;;  %vm2038_vm4 = vweird.f32 %v6152_v44 }
 0x772   :  { %v2022_v54 = vmul.f32 %v4006_v52, %v6118_v27  ;;  %v4008_v50 = vpop.eup %4007  ;;  %v2056_v34 = vmul.f32 %v6102_v31, %v2055_v23  ;;  %vm2039_vm5 = vmor %vm2037_vm1, %vm2038_vm4  ;;  %vm2028_vm7 = vweird.f32 %v4006_v52 }
 0x773   :  { %2183 = vmatpush.xpose.msrb.mxu3 %v6159_v7  ;;  %v2033_v15 = vmul.f32 %v6152_v44, %v2032_v46  ;;  %v2012_v21 = vmul.f32 %v4008_v50, %v6141_v40  ;;  %v2070_v43 = vsel %vm2069_vm12, %v6097_v30, %v2066_v5  ;;  %v2046_v41 = vmul.f32 %v6114_v47, %v2045_v24  ;;  %vm2029_vm8 = vmor %vm2027_vm6, %vm2028_vm7 }
 0x774   :  { %v2023_v9 = vmul.f32 %v4006_v52, %v2022_v54  ;;  %v6196_v16 = vmul.f32 %v5951_v28, %v2070_v43  ;;  %v2060_v10 = vsel %vm2059_vm14, %v6102_v31, %v2056_v34  ;;  %vm2018_vm10 = vweird.f32 %v4008_v50  ;;  %v1273_v43 = vpop.xlane.xlu2 %1272 }
 0x775   :  { %v2034_v32 = vmul.f32 0.5, %v2033_v15  ;;  %v2013_v18 = vmul.f32 %v4008_v50, %v2012_v21  ;;  %v6204_v60 = vmul.f32 %v5957_v8, %v2060_v10  ;;  %v2050_v20 = vsel %vm2049_vm2, %v6114_v47, %v2046_v41  ;;  %vm2019_vm11 = vmor %vm2017_vm9, %vm2018_vm10 }
 0x776   :  { %v2024_v46 = vmul.f32 0.5, %v2023_v9  ;;  %v6211_v31 = vmul.f32 %v5942_v49, %v2050_v20  ;;  %v1271_v9 = vpop.xlane.xlu0 %1270 }
 0x777   :  { %2184 = vmatpush.xpose.msrb.mxu3 %v6175_v62  ;;  %v2035_v51 = vsub.f32 1.5, %v2034_v32  ;;  %v2014_v28 = vmul.f32 0.5, %v2013_v18  ;;  %v6244_v21 = vmax.f32 %v1271_v9, 1.0 }
 0x778   :  { %v2025_v30 = vsub.f32 1.5, %v2024_v46  ;;  %v6247_v46 = vmax.f32 %v1273_v43, 1.0 }
 0x779   :  { %v2036_v23 = vmul.f32 %v6152_v44, %v2035_v51  ;;  %v2015_v57 = vsub.f32 1.5, %v2014_v28  ;;  %vm1354_vm1 = vweird.f32 %v6244_v21 }
 0x77a   :  { %v2026_v8 = vmul.f32 %v4006_v52, %v2025_v30  ;;  %vm1364_vm6 = vweird.f32 %v6247_v46 }
 0x77b   :  { %2185 = vmatpush.xpose.msrb.mxu3 %v6187_v63  ;;  %v2040_v54 = vsel %vm2039_vm5, %v6152_v44, %v2036_v23  ;;  %v2016_v13 = vmul.f32 %v4008_v50, %v2015_v57 }
 0x77c   :  { %v6219_v47 = vmul.f32 %v5961_v53, %v2040_v54  ;;  %v2030_v27 = vsel %vm2029_vm8, %v4006_v52, %v2026_v8 }
 0x77d   :  { %v6223_v49 = vmul.f32 %v5965_v36, %v2030_v27  ;;  %v2020_v44 = vsel %vm2019_vm11, %v4008_v50, %v2016_v13 }
 0x77e   :  { %v6229_v24 = vmul.f32 %v5967_v38, %v2020_v44 }
 0x77f   :  { %2186 = vmatpush.xpose.msrb.mxu3 %v6196_v16 }
 0x783   :  { %2187 = vmatpush.xpose.msrb.mxu3 %v6204_v60 }
 0x787   :  { %2188 = vmatpush.xpose.msrb.mxu3 %v6211_v31 }
 0x788   :  { %v6215_v15 = vpop.f32.mrf.mxu3 }
 0x78b   :  { %2189 = vmatpush.xpose.msrb.mxu3 %v6219_v47 }
 0x78f   :  { %2190 = vmatpush.xpose.msrb.mxu3 %v6223_v49 }
 0x790   :  { %v6226_v5 = vpop.f32.mrf.mxu3 }
 0x793   :  { %2191 = vmatpush.xpose.msrb.mxu3 %v6229_v24 }
 0x798   :  { %v6232_v53 = vpop.f32.mrf.mxu3 }
 0x7a0   :  { %v6234_v40 = vpop.f32.mrf.mxu3 }
 0x7a8   :  { %v6236_v52 = vpop.f32.mrf.mxu3 }
 0x7b0   :  { %v6238_v34 = vpop.f32.mrf.mxu3 }
 0x7b8   :  { %v6240_v36 = vpop.f32.mrf.mxu3 }
 0x7c0   :  { %v6242_v50 = vpop.f32.mrf.mxu3 }
 0x7c8   :  { %v1678_v32 = vpop.f32.mrf.mxu3 }
 0x7cb   :  { %v1970_v38 = vpop.xlane.xlu1 %1969 }
 0x7cc   :  { %4009 = vrsqrt.f32 %v1970_v38  ;;  %vm2007_vm13 = vweird.f32 %v1970_v38 }
 0x7cd   :  { %4011 = vrsqrt.f32 %v6244_v21 }
 0x7ce   :  { %4013 = vrsqrt.f32 %v6247_v46 }
 0x7d0   :  { %v1681_v41 = vpop.f32.mrf.mxu3 }
 0x7d2   :  { %v4010_v51 = vpop.eup %4009 }
 0x7d3   :  { %v2002_v18 = vmul.f32 %v4010_v51, %v1970_v38  ;;  %v1269_v10 = vpop.xlane.xlu1 %1268  ;;  %v6249_v30 = vpop.eup %4011  ;;  %vm2008_vm12 = vweird.f32 %v4010_v51 }
 0x7d4   :  { %v1300_v28 = vmax.f32 %v1269_v10, 1.0  ;;  %v1349_v23 = vmul.f32 %v6249_v30, %v6244_v21  ;;  %v6254_v27 = vpop.eup %4013  ;;  %vm2009_vm3 = vmor %vm2007_vm13, %vm2008_vm12  ;;  %vm1355_vm2 = vweird.f32 %v6249_v30 }
 0x7d5   :  { %v2003_v20 = vmul.f32 %v4010_v51, %v2002_v18  ;;  %vm1356_vm4 = vmor %vm1354_vm1, %vm1355_vm2  ;;  %vm1365_vm5 = vweird.f32 %v6254_v27 }
 0x7d6   :  { %4015 = vrsqrt.f32 %v1300_v28  ;;  %v1350_v13 = vmul.f32 %v6249_v30, %v1349_v23  ;;  %v6266_v23 = vld [vmem:[%s7847_s4] ss:$0 sm:$0xff]  ;;  %vm1344_vm15 = vweird.f32 %v1300_v28  ;;  %vm1366_vm7 = vmor %vm1364_vm6, %vm1365_vm5 }
 0x7d7   :  { %v2004_v57 = vmul.f32 0.5, %v2003_v20 }
 0x7d8   :  { %v1351_v58 = vmul.f32 0.5, %v1350_v13 }
 0x7d9   :  { %v2005_v54 = vsub.f32 1.5, %v2004_v57  ;;  %v1684_v8 = vpop.f32.mrf.mxu3  ;;  %v1359_v57 = vmul.f32 %v6254_v27, %v6247_v46 }
 0x7db   :  { %v1275_v44 = vpop.xlane.xlu1 %1274  ;;  %v2006_v9 = vmul.f32 %v4010_v51, %v2005_v54 }
 0x7dc   :  { %v4016_v43 = vpop.eup %4015  ;;  %v6257_v10 = vmax.f32 %v1275_v44, 1.0  ;;  %v1685_v44 = vadd.f32 %v6266_v23, %v1684_v8 }
 0x7dd   :  { %v1339_v18 = vmul.f32 %v4016_v43, %v1300_v28  ;;  %v2010_v3 = vsel %vm2009_vm3, %v4010_v51, %v2006_v9  ;;  %v1360_v9 = vmul.f32 %v6254_v27, %v1359_v57  ;;  %vm1345_vm14 = vweird.f32 %v4016_v43 }
 0x7de   :  { %4017 = vrsqrt.f32 %v6257_v10  ;;  %v2161_v20 = vmul.f32 %v5992_v35, %v2010_v3  ;;  %v1352_v3 = vsub.f32 1.5, %v1351_v58  ;;  %vm1346_vm0 = vmor %vm1344_vm15, %vm1345_vm14  ;;  %v1704_v12 = vmax.f32 %v1685_v44, 0.0 }
 0x7df   :  { %v1340_v37 = vmul.f32 %v4016_v43, %v1339_v18  ;;  %v1682_v18 = vadd.f32 %v6266_v23, %v1681_v41  ;;  %v1361_v8 = vmul.f32 0.5, %v1360_v9  ;;  %v1676_v41 = vadd.f32 %v6266_v23, %v6242_v50 }
 0x7e0   :  { %2192 = vmatpush.xpose.msrb.mxu3 %v2161_v20  ;;  %vm1374_vm9 = vweird.f32 %v6257_v10 }
 0x7e1   :  { %v1341_v38 = vmul.f32 0.5, %v1340_v37  ;;  %v1687_v54 = vpop.f32.mrf.mxu3  ;;  %v1679_v37 = vadd.f32 %v6266_v23, %v1678_v32  ;;  %v1701_v50 = vmax.f32 %v1676_v41, 0.0 }
 0x7e2   :  { %v1688_v51 = vadd.f32 %v6266_v23, %v1687_v54 }
 0x7e3   :  { %v1342_v35 = vsub.f32 1.5, %v1341_v38  ;;  %2193 = vmatmul.f32.vlgmr.msrb.gmra.mxu3 %v2161_v20  ;;  %v1353_v20 = vmul.f32 %v6249_v30, %v1352_v3  ;;  %v1703_v38 = vmax.f32 %v1682_v18, 0.0  ;;  %v1702_v32 = vmax.f32 %v1679_v37, 0.0 }
 0x7e4   :  { %v6271_v13 = vpop.eup %4017  ;;  %v1705_v33 = vmax.f32 %v1688_v51, 0.0 }
 0x7e5   :  { %v1343_v45 = vmul.f32 %v4016_v43, %v1342_v35  ;;  %v1369_v58 = vmul.f32 %v6271_v13, %v6257_v10  ;;  %vm1375_vm8 = vweird.f32 %v6271_v13  ;;  %v7973_v10 = vsub.f32 1.0, %v4826_v1 }
 0x7e6   :  { %1706 = vmatpush.msra.mxu0 %v1705_v33  ;;  %v1673_v33 = vadd.f32 %v6266_v23, %v6240_v36  ;;  %v1667_v36 = vadd.f32 %v6266_v23, %v6236_v52  ;;  %vm1376_vm10 = vmor %vm1374_vm9, %vm1375_vm8 }
 0x7e7   :  { %v1347_v57 = vsel %vm1346_vm0, %v4016_v43, %v1343_v45  ;;  %v1362_v45 = vsub.f32 1.5, %v1361_v8  ;;  %v1370_v43 = vmul.f32 %v6271_v13, %v1369_v58 }
 0x7e8   :  { %1707 = vmatpush.msra.mxu0 %v1704_v12  ;;  %v1498_v28 = vmul.f32 %v1347_v57, %v5647_v0  ;;  %v1357_v12 = vsel %vm1356_vm4, %v6249_v30, %v1353_v20  ;;  %v1670_v0 = vadd.f32 %v6266_v23, %v6238_v34  ;;  %v1700_v21 = vmax.f32 %v1673_v33, 0.0 }
 0x7e9   :  { %v1499_v44 = vmul.f32 %v1357_v12, %v5643_v39  ;;  %v1371_v51 = vmul.f32 0.5, %v1370_v43  ;;  %v1363_v9 = vmul.f32 %v6254_v27, %v1362_v45  ;;  %v1661_v30 = vadd.f32 %v6266_v23, %v6232_v53 }
 0x7ea   :  { %1708 = vmatpush.msra.mxu0 %v1703_v38  ;;  %v6286_v54 = vmul.f32 %v5747_v17, %v1498_v28  ;;  %v1699_v34 = vmax.f32 %v1670_v0, 0.0  ;;  %v1698_v52 = vmax.f32 %v1667_v36, 0.0  ;;  %v1655_v53 = vadd.f32 %v6266_v23, %v6215_v15 }
 0x7eb   :  { %2196 = vmatmul.f32.gmra.mxu3 %v6229_v24  ;;  %v1664_v24 = vadd.f32 %v6266_v23, %v6234_v40  ;;  %v6305_v3 = vmul.f32 %v5747_v17, %v1499_v44  ;;  %v1372_v39 = vsub.f32 1.5, %v1371_v51  ;;  %v1367_v35 = vsel %vm1366_vm7, %v6254_v27, %v1363_v9 }
 0x7ec   :  { %1556 = vmatmul.f32.vlgmr.msrb.gmra.mxu1 %v6286_v54  ;;  %1709 = vmatpush.msra.mxu0 %v1702_v32  ;;  %v1658_v40 = vadd.f32 %v6266_v23, %v6226_v5  ;;  %v1696_v46 = vmax.f32 %v1661_v30, 0.0  ;;  %v1500_v37 = vmul.f32 %v1367_v35, %v5650_v19  ;;  %v1694_v5 = vmax.f32 %v1655_v53, 0.0 }
 0x7ed   :  { %v1697_v18 = vmax.f32 %v1664_v24, 0.0  ;;  %v1373_v8 = vmul.f32 %v6271_v13, %v1372_v39  ;;  %v7974_v38 = vsub.f32 1.0, %v4838_v25  ;;  %v7975_v45 = vsub.f32 1.0, %v4850_v59 }
 0x7ee   :  { %1710 = vmatpush.msra.mxu0 %v1701_v50  ;;  %v6319_v27 = vmul.f32 %v5747_v17, %v1500_v37  ;;  %v7980_v37 = vld [vmem:[#allocation16_spill] sm:$0xff] }
 0x7ef   :  { %v1377_v15 = vsel %vm1376_vm10, %v6271_v13, %v1373_v8 }
 0x7f0   :  { %1711 = vmatpush.msra.mxu0 %v1700_v21  ;;  %v1501_v19 = vmul.f32 %v1377_v15, %v5655_v2 }
 0x7f2   :  { %1712 = vmatpush.msra.mxu0 %v1699_v34  ;;  %v6326_v58 = vmul.f32 %v5747_v17, %v1501_v19  ;;  %v7982_v19 = vld [vmem:[#allocation17_spill] sm:$0xff] }
 0x7f3   :  { %2199 = vmatmul.f32.gmra.mxu3 %v6223_v49  ;;  %v1695_v49 = vmax.f32 %v1658_v40, 0.0 }
 0x7f4   :  { %1559 = vmatmul.f32.gmra.mxu1 %v6305_v3  ;;  %1713 = vmatpush.msra.mxu0 %v1698_v52 }
 0x7f6   :  { %1714 = vmatpush.msra.mxu0 %v1697_v18 }
 0x7f8   :  { %1715 = vmatpush.msra.mxu0 %v1696_v46 }
 0x7fa   :  { %1716 = vmatpush.msra.mxu0 %v1695_v49 }
 0x7fb   :  { %2202 = vmatmul.f32.gmra.mxu3 %v6219_v47 }
 0x7fc   :  { %1562 = vmatmul.f32.gmra.mxu1 %v6319_v27  ;;  %1717 = vmatpush.msra.mxu0 %v1694_v5 }
 0x803   :  { %2205 = vmatmul.f32.gmra.mxu3 %v6211_v31 }
 0x804   :  { %1565 = vmatmul.f32.gmra.mxu1 %v6326_v58 }
 0x80b   :  { %2208 = vmatmul.f32.gmra.mxu3 %v6204_v60 }
 0x813   :  { %2211 = vmatmul.f32.gmra.mxu3 %v6196_v16 }
 0x81b   :  { %2214 = vmatmul.f32.gmra.mxu3 %v6187_v63 }
 0x823   :  { %2217 = vmatmul.f32.gmra.mxu3 %v6175_v62 }
 0x82b   :  { %2220 = vmatmul.f32.gmra.mxu3 %v6159_v7  ;;  %v7971_v7 = vsub.f32 1.0, %v4803_v6 }
 0x833   :  { %2223 = vmatmul.f32.gmra.mxu3 %v6139_v56 }
 0x83b   :  { %2226 = vmatmul.f32.gmra.mxu3 %v6109_v4 }
 0x843   :  { %2229 = vmatmul.f32.gmra.mxu3 %v6083_v55 }
 0x84b   :  { %2232 = vmatmul.f32.gmra.mxu3 %v6040_v61 }
 0x853   :  { %2235 = vmatmul.f32.gmra.mxu3 %v6028_v26 }
 0x85b   :  { %2238 = vmatmul.f32.gmra.mxu3 %v5999_v11  ;;  %v7972_v11 = vsub.f32 1.0, %v4814_v14 }
 0x866   :  { %v2194_v17 = vpop.f32.mrf.mxu3 }
 0x867   :  { %v2242_v2 = vsub.f32 1.0, %v2194_v17 }
 0x869   :  { %v2258_v63 = vmul.f32 %v4803_v6, %v2242_v2  ;;  %v1557_v16 = vpop.f32.mrf.mxu1 }
 0x86a   :  { %1641 = vmatmul.f32.vlgmr.msrb.gmra.mxu0 %v1557_v16 }
 0x86b   :  { %v6344_v62 = vsub.f32 %v2258_v63, %v7971_v7  ;;  %v7984_v7 = vld [vmem:[#allocation18_spill] sm:$0xff] }
 0x86d   :  { %2290 = vmin.xlane.f32.xlu2 %v6344_v62 }
 0x86e   :  { %v2197_v4 = vpop.f32.mrf.mxu3 }
 0x86f   :  { %v2243_v55 = vsub.f32 1.0, %v2197_v4 }
 0x871   :  { %v2259_v61 = vmul.f32 %v4814_v14, %v2243_v55  ;;  %v1560_v56 = vpop.f32.mrf.mxu1  ;;  %v7985_v55 = vsub.f32 1.0, %v7984_v7 }
 0x872   :  { %1644 = vmatmul.f32.gmra.mxu0 %v1560_v56 }
 0x873   :  { %v6350_v26 = vsub.f32 %v2259_v61, %v7972_v11 }
 0x875   :  { %2292 = vmin.xlane.f32.xlu0 %v6350_v26 }
 0x876   :  { %v2200_v60 = vpop.f32.mrf.mxu3 }
 0x877   :  { %v2244_v31 = vsub.f32 1.0, %v2200_v60  ;;  %v7986_v60 = vld [vmem:[#allocation19_spill] sm:$0xff] }
 0x879   :  { %v2260_v6 = vmul.f32 %v4826_v1, %v2244_v31  ;;  %v1563_v47 = vpop.f32.mrf.mxu1 }
 0x87a   :  { %1647 = vmatmul.f32.gmra.mxu0 %v1563_v47 }
 0x87b   :  { %v6356_v13 = vsub.f32 %v2260_v6, %v7973_v10  ;;  %v7987_v6 = vsub.f32 1.0, %v7986_v60 }
 0x87d   :  { %2294 = vmin.xlane.f32.xlu1 %v6356_v13 }
 0x87e   :  { %v2203_v57 = vpop.f32.mrf.mxu3 }
 0x87f   :  { %v2245_v20 = vsub.f32 1.0, %v2203_v57 }
 0x881   :  { %v2261_v14 = vmul.f32 %v4838_v25, %v2245_v20  ;;  %v1566_v41 = vpop.f32.mrf.mxu1  ;;  %v7976_v25 = vsub.f32 1.0, %v4862_v22  ;;  %v7988_v20 = vld [vmem:[#allocation20_spill] sm:$0xff] }
 0x882   :  { %1650 = vmatmul.f32.gmra.mxu0 %v1566_v41  ;;  %v7989_v41 = vsub.f32 1.0, %v7988_v20 }
 0x883   :  { %v6362_v28 = vsub.f32 %v2261_v14, %v7974_v38 }
 0x885   :  { %2296 = vmin.xlane.f32.xlu2 %v6362_v28 }
 0x886   :  { %v2206_v33 = vpop.f32.mrf.mxu3 }
 0x887   :  { %v2246_v32 = vsub.f32 1.0, %v2206_v33 }
 0x889   :  { %v2262_v1 = vmul.f32 %v4850_v59, %v2246_v32  ;;  %v7977_v59 = vsub.f32 1.0, %v4874_v29 }
 0x88b   :  { %v6368_v43 = vsub.f32 %v2262_v1, %v7975_v45  ;;  %v7990_v1 = vld [vmem:[#allocation21_spill] sm:$0xff] }
 0x88d   :  { %2298 = vmin.xlane.f32.xlu0 %v6368_v43 }
 0x88e   :  { %v2209_v12 = vpop.f32.mrf.mxu3 }
 0x88f   :  { %v2247_v0 = vsub.f32 1.0, %v2209_v12  ;;  %v7991_v12 = vsub.f32 1.0, %v7990_v1 }
 0x891   :  { %v2263_v50 = vmul.f32 %v4862_v22, %v2247_v0  ;;  %v7978_v22 = vsub.f32 1.0, %v4886_v48 }
 0x893   :  { %v6374_v36 = vsub.f32 %v2263_v50, %v7976_v25  ;;  %v6431_v25 = vpop.f32.mrf.mxu0 }
 0x895   :  { %2300 = vmin.xlane.f32.xlu1 %v6374_v36 }
 0x896   :  { %v2212_v21 = vpop.f32.mrf.mxu3 }
 0x897   :  { %v2248_v44 = vsub.f32 1.0, %v2212_v21 }
 0x899   :  { %v2264_v51 = vmul.f32 %v4874_v29, %v2248_v44  ;;  %v7979_v29 = vsub.f32 1.0, %v4898_v42 }
 0x89b   :  { %v6380_v9 = vsub.f32 %v2264_v51, %v7977_v59  ;;  %v7992_v51 = vld [vmem:[#allocation22_spill] sm:$0xff] }
 0x89d   :  { %2302 = vmin.xlane.f32.xlu2 %v6380_v9 }
 0x89e   :  { %v2215_v24 = vpop.f32.mrf.mxu3 }
 0x89f   :  { %v2249_v34 = vsub.f32 1.0, %v2215_v24  ;;  %v7993_v24 = vld [vmem:[#allocation23_spill] sm:$0xff] }
 0x8a1   :  { %v2265_v30 = vmul.f32 %v4886_v48, %v2249_v34  ;;  %v7981_v48 = vsub.f32 1.0, %v7980_v37 }
 0x8a3   :  { %v6386_v52 = vsub.f32 %v2265_v30, %v7978_v22  ;;  %v7994_v30 = vsub.f32 1.0, %v7992_v51 }
 0x8a5   :  { %2304 = vmin.xlane.f32.xlu0 %v6386_v52 }
 0x8a6   :  { %v2218_v39 = vpop.f32.mrf.mxu3 }
 0x8a7   :  { %v2250_v35 = vsub.f32 1.0, %v2218_v39 }
 0x8a9   :  { %v2266_v40 = vmul.f32 %v4898_v42, %v2250_v35  ;;  %v7983_v42 = vsub.f32 1.0, %v7982_v19 }
 0x8ab   :  { %v6392_v18 = vsub.f32 %v2266_v40, %v7979_v29 }
 0x8ad   :  { %2306 = vmin.xlane.f32.xlu1 %v6392_v18 }
 0x8ae   :  { %v2221_v53 = vpop.f32.mrf.mxu3 }
 0x8af   :  { %v2251_v46 = vsub.f32 1.0, %v2221_v53 }
 0x8b1   :  { %v2267_v8 = vmul.f32 %v7980_v37, %v2251_v46 }
 0x8b3   :  { %v6398_v49 = vsub.f32 %v2267_v8, %v7981_v48 }
 0x8b5   :  { %2308 = vmin.xlane.f32.xlu2 %v6398_v49 }
 0x8b6   :  { %v2224_v5 = vpop.f32.mrf.mxu3 }
 0x8b7   :  { %v2252_v15 = vsub.f32 1.0, %v2224_v5 }
 0x8b9   :  { %v2268_v17 = vmul.f32 %v7982_v19, %v2252_v15 }
 0x8bb   :  { %v6404_v2 = vsub.f32 %v2268_v17, %v7983_v42 }
 0x8bd   :  { %2310 = vmin.xlane.f32.xlu0 %v6404_v2 }
 0x8be   :  { %v2227_v63 = vpop.f32.mrf.mxu3 }
 0x8bf   :  { %v2253_v16 = vsub.f32 1.0, %v2227_v63 }
 0x8c1   :  { %v2269_v4 = vmul.f32 %v7984_v7, %v2253_v16 }
 0x8c3   :  { %v6410_v61 = vsub.f32 %v2269_v4, %v7985_v55 }
 0x8c5   :  { %2312 = vmin.xlane.f32.xlu1 %v6410_v61 }
 0x8c6   :  { %v2230_v56 = vpop.f32.mrf.mxu3 }
 0x8c7   :  { %v2254_v11 = vsub.f32 1.0, %v2230_v56 }
 0x8c9   :  { %v2270_v31 = vmul.f32 %v7986_v60, %v2254_v11 }
 0x8cb   :  { %v6416_v47 = vsub.f32 %v2270_v31, %v7987_v6 }
 0x8cd   :  { %2314 = vmin.xlane.f32.xlu2 %v6416_v47 }
 0x8ce   :  { %v2233_v10 = vpop.f32.mrf.mxu3 }
 0x8cf   :  { %v2255_v57 = vsub.f32 1.0, %v2233_v10 }
 0x8d1   :  { %v2271_v14 = vmul.f32 %v7988_v20, %v2255_v57 }
 0x8d3   :  { %v6422_v38 = vsub.f32 %v2271_v14, %v7989_v41  ;;  %v7995_v14 = vld [vmem:[#allocation24_spill] sm:$0xff] }
 0x8d5   :  { %2316 = vmin.xlane.f32.xlu0 %v6422_v38 }
 0x8d6   :  { %v2236_v33 = vpop.f32.mrf.mxu3 }
 0x8d7   :  { %v2256_v32 = vsub.f32 1.0, %v2236_v33  ;;  %v7996_v33 = vld [vmem:[#allocation25_spill] sm:$0xff] }
 0x8d9   :  { %v2272_v45 = vmul.f32 %v7990_v1, %v2256_v32  ;;  %v7997_v1 = vld [vmem:[#allocation26_spill] sm:$0xff] }
 0x8db   :  { %v6428_v0 = vsub.f32 %v2272_v45, %v7991_v12 }
 0x8dd   :  { %2318 = vmin.xlane.f32.xlu1 %v6428_v0 }
 0x8de   :  { %v2239_v50 = vpop.f32.mrf.mxu3 }
 0x8df   :  { %v2257_v21 = vsub.f32 1.0, %v2239_v50  ;;  %v7998_v50 = vld [vmem:[#allocation27_spill] sm:$0xff] }
 0x8e0   :  { %v2291_v44 = vpop.xlane.xlu2 %2290 }
 0x8e1   :  { %v2273_v59 = vmul.f32 %v7992_v51, %v2257_v21  ;;  %vm2322_vm11 = vcmp.eq.f32.partialorder %v6344_v62, %v2291_v44  ;;  %v1786_v44 = vld [vmem:[%s7848_s5 + $0x78] sm:$0xff] }
 0x8e2   :  { %v2338_v34 = vsel %vm2322_vm11, %v7993_v24, 128.0  ;;  %1791 = vmatpush.msrb.mxu2 %v1786_v44 }
 0x8e3   :  { %2354 = vmin.xlane.f32.xlu0 %v2338_v34  ;;  %v6438_v22 = vsub.f32 %v2273_v59, %v7994_v30  ;;  %v7999_v59 = vld [vmem:[#allocation28_spill] sm:$0xff]  ;;  %v1785_v34 = vld [vmem:[%s7848_s5 + $0x70] sm:$0xff]  ;;  %v1784_v30 = vld [vmem:[%s7848_s5 + $0x68] sm:$0xff] }
 0x8e4   :  { %1792 = vmatpush.msrb.mxu2 %v1785_v34 }
 0x8e5   :  { %2320 = vmin.xlane.f32.xlu2 %v6438_v22 }
 0x8e6   :  { %1793 = vmatpush.msrb.mxu2 %v1784_v30 }
 0x8e7   :  { %v1642_v39 = vpop.f32.mrf.mxu0 }
 0x8e8   :  { %v2293_v35 = vpop.xlane.xlu0 %2292  ;;  %v1643_v7 = vadd.f32 %v6266_v23, %v1642_v39  ;;  %v1783_v39 = vld [vmem:[%s7848_s5 + $0x60] sm:$0xff] }
 0x8e9   :  { %vm2323_vm12 = vcmp.eq.f32.partialorder %v6350_v26, %v2293_v35  ;;  %1794 = vmatpush.msrb.mxu2 %v1783_v39 }
 0x8ea   :  { %v2339_v40 = vsel %vm2323_vm12, %v7993_v24, 128.0  ;;  %v1690_v56 = vmax.f32 %v1643_v7, 0.0 }
 0x8eb   :  { %2356 = vmin.xlane.f32.xlu1 %v2339_v40  ;;  %v1782_v40 = vld [vmem:[%s7848_s5 + $0x58] sm:$0xff] }
 0x8ec   :  { %1795 = vmatpush.msrb.mxu2 %v1782_v40 }
 0x8ef   :  { %v1645_v29 = vpop.f32.mrf.mxu0 }
 0x8f0   :  { %v2295_v53 = vpop.xlane.xlu1 %2294  ;;  %v1646_v42 = vadd.f32 %v6266_v23, %v1645_v29 }
 0x8f1   :  { %vm2324_vm13 = vcmp.eq.f32.partialorder %v6356_v13, %v2295_v53  ;;  %v8000_v53 = vld [vmem:[#allocation29_spill] sm:$0xff] }
 0x8f2   :  { %v2340_v46 = vsel %vm2324_vm13, %v7993_v24, 128.0  ;;  %v1691_v55 = vmax.f32 %v1646_v42, 0.0 }
 0x8f3   :  { %2358 = vmin.xlane.f32.xlu2 %v2340_v46  ;;  %v1781_v46 = vld [vmem:[%s7848_s5 + $0x50] sm:$0xff] }
 0x8f4   :  { %1796 = vmatpush.msrb.mxu2 %v1781_v46 }
 0x8f7   :  { %v1648_v37 = vpop.f32.mrf.mxu0 }
 0x8f8   :  { %v2297_v8 = vpop.xlane.xlu2 %2296  ;;  %v1649_v15 = vadd.f32 %v6266_v23, %v1648_v37  ;;  %v1780_v37 = vld [vmem:[%s7848_s5 + $0x48] sm:$0xff] }
 0x8f9   :  { %vm2325_vm3 = vcmp.eq.f32.partialorder %v6362_v28, %v2297_v8  ;;  %1797 = vmatpush.msrb.mxu2 %v1780_v37 }
 0x8fa   :  { %v2341_v48 = vsel %vm2325_vm3, %v7993_v24, 128.0  ;;  %v1692_v4 = vmax.f32 %v1649_v15, 0.0  ;;  %v1778_v15 = vld [vmem:[%s7848_s5 + $0x38] sm:$0xff] }
 0x8fb   :  { %2360 = vmin.xlane.f32.xlu0 %v2341_v48 }
 0x8ff   :  { %v1651_v5 = vpop.f32.mrf.mxu0 }
 0x900   :  { %v1652_v19 = vadd.f32 %v6266_v23, %v1651_v5  ;;  %v2299_v17 = vpop.xlane.xlu0 %2298  ;;  %v1779_v5 = vld [vmem:[%s7848_s5 + $0x40] sm:$0xff] }
 0x901   :  { %vm2326_vm14 = vcmp.eq.f32.partialorder %v6368_v43, %v2299_v17  ;;  %1798 = vmatpush.msrb.mxu2 %v1779_v5  ;;  %v8001_v17 = vld [vmem:[#allocation30_spill] sm:$0xff] }
 0x902   :  { %v1693_v63 = vmax.f32 %v1652_v19, 0.0  ;;  %v2342_v16 = vsel %vm2326_vm14, %v7993_v24, 128.0 }
 0x903   :  { %2362 = vmin.xlane.f32.xlu2 %v2342_v16  ;;  %1799 = vmatpush.msrb.mxu2 %v1778_v15  ;;  %v1776_v16 = vld [vmem:[%s7848_s5 + $0x28] sm:$0xff] }
 0x904   :  { %1718 = vmatpush.msra.mxu0 %v1693_v63  ;;  %v1777_v63 = vld [vmem:[%s7848_s5 + $0x30] sm:$0xff] }
 0x905   :  { %1800 = vmatpush.msrb.mxu2 %v1777_v63 }
 0x906   :  { %1719 = vmatpush.msra.mxu0 %v1692_v4  ;;  %v1774_v4 = vld [vmem:[%s7848_s5 + $0x18] sm:$0xff] }
 0x907   :  { %1801 = vmatpush.msrb.mxu2 %v1776_v16 }
 0x908   :  { %v2301_v11 = vpop.xlane.xlu1 %2300  ;;  %1720 = vmatpush.msra.mxu0 %v1691_v55 }
 0x909   :  { %vm2327_vm15 = vcmp.eq.f32.partialorder %v6374_v36, %v2301_v11  ;;  %v1773_v11 = vld [vmem:[%s7848_s5 + $0x10] sm:$0xff] }
 0x90a   :  { %1721 = vmatpush.msra.mxu0 %v1690_v56  ;;  %v2343_v60 = vsel %vm2327_vm15, %v7993_v24, 128.0  ;;  %v8002_v56 = vld [vmem:[#allocation31_spill] sm:$0xff] }
 0x90b   :  { %2364 = vmin.xlane.f32.xlu0 %v2343_v60  ;;  %1722 = vmatmul.f32.vlgmr.msra.gmra.mxu0 %v6286_v54  ;;  %v1772_v60 = vld [vmem:[%s7848_s5 + $0x8] sm:$0xff] }
 0x910   :  { %v2303_v31 = vpop.xlane.xlu2 %2302 }
 0x911   :  { %vm2328_vm0 = vcmp.eq.f32.partialorder %v6380_v9, %v2303_v31 }
 0x912   :  { %v2344_v23 = vsel %vm2328_vm0, %v7993_v24, 128.0 }
 0x913   :  { %1725 = vmatmul.f32.gmra.mxu0 %v6305_v3  ;;  %2366 = vmin.xlane.f32.xlu1 %v2344_v23  ;;  %v1771_v23 = vld [vmem:[%s7848_s5] sm:$0xff] }
 0x918   :  { %v2305_v6 = vpop.xlane.xlu0 %2304 }
 0x919   :  { %vm2329_vm2 = vcmp.eq.f32.partialorder %v6386_v52, %v2305_v6  ;;  %v8003_v6 = vld [vmem:[#allocation32_spill] sm:$0xff] }
 0x91a   :  { %v2345_v10 = vsel %vm2329_vm2, %v7993_v24, 128.0 }
 0x91b   :  { %1728 = vmatmul.f32.gmra.mxu0 %v6319_v27  ;;  %2368 = vmin.xlane.f32.xlu2 %v2345_v10 }
 0x920   :  { %v2307_v57 = vpop.xlane.xlu1 %2306 }
 0x921   :  { %vm2330_vm1 = vcmp.eq.f32.partialorder %v6392_v18, %v2307_v57  ;;  %v8004_v57 = vld [vmem:[#allocation33_spill] sm:$0xff] }
 0x922   :  { %v2346_v54 = vsel %vm2330_vm1, %v7993_v24, 128.0 }
 0x923   :  { %1731 = vmatmul.f32.gmra.mxu0 %v6326_v58  ;;  %2370 = vmin.xlane.f32.xlu1 %v2346_v54 }
 0x928   :  { %v2309_v20 = vpop.xlane.xlu2 %2308 }
 0x929   :  { %vm2331_vm4 = vcmp.eq.f32.partialorder %v6398_v49, %v2309_v20 }
 0x92a   :  { %v2347_v3 = vsel %vm2331_vm4, %v7993_v24, 128.0 }
 0x92b   :  { %1734 = vmatmul.f32.gmra.mxu0 %v7995_v14  ;;  %2372 = vmin.xlane.f32.xlu2 %v2347_v3  ;;  %v8005_v3 = vld [vmem:[#allocation34_spill] sm:$0xff] }
 0x930   :  { %v2311_v41 = vpop.xlane.xlu0 %2310 }
 0x931   :  { %vm2332_vm5 = vcmp.eq.f32.partialorder %v6404_v2, %v2311_v41  ;;  %v8006_v41 = vld [vmem:[#allocation35_spill] sm:$0xff] }
 0x932   :  { %v2348_v27 = vsel %vm2332_vm5, %v7993_v24, 128.0 }
 0x933   :  { %1737 = vmatmul.f32.gmra.mxu0 %v7996_v33  ;;  %2374 = vmin.xlane.f32.xlu0 %v2348_v27 }
 0x938   :  { %v2313_v32 = vpop.xlane.xlu1 %2312 }
 0x939   :  { %vm2333_vm6 = vcmp.eq.f32.partialorder %v6410_v61, %v2313_v32 }
 0x93a   :  { %v2349_v58 = vsel %vm2333_vm6, %v7993_v24, 128.0 }
 0x93b   :  { %1740 = vmatmul.f32.gmra.mxu0 %v7997_v1  ;;  %2376 = vmin.xlane.f32.xlu1 %v2349_v58 }
 0x940   :  { %v2315_v45 = vpop.xlane.xlu2 %2314 }
 0x941   :  { %vm2334_vm7 = vcmp.eq.f32.partialorder %v6416_v47, %v2315_v45 }
 0x942   :  { %v2350_v12 = vsel %vm2334_vm7, %v7993_v24, 128.0 }
 0x943   :  { %1743 = vmatmul.f32.gmra.mxu0 %v7998_v50  ;;  %2378 = vmin.xlane.f32.xlu0 %v2350_v12 }
 0x948   :  { %v2317_v21 = vpop.xlane.xlu0 %2316 }
 0x949   :  { %vm2335_vm8 = vcmp.eq.f32.partialorder %v6422_v38, %v2317_v21 }
 0x94a   :  { %v2351_v51 = vsel %vm2335_vm8, %v7993_v24, 128.0 }
 0x94b   :  { %1746 = vmatmul.f32.gmra.mxu0 %v7999_v59  ;;  %2380 = vmin.xlane.f32.xlu1 %v2351_v51 }
 0x950   :  { %v2319_v35 = vpop.xlane.xlu1 %2318 }
 0x951   :  { %vm2336_vm9 = vcmp.eq.f32.partialorder %v6428_v0, %v2319_v35 }
 0x952   :  { %v2352_v29 = vsel %vm2336_vm9, %v7993_v24, 128.0 }
 0x953   :  { %1749 = vmatmul.f32.gmra.mxu0 %v8000_v53  ;;  %2382 = vmin.xlane.f32.xlu2 %v2352_v29 }
 0x956   :  { %v6504_v8 = vpop.xlane.xlu0 %2354 }
 0x957   :  { %vm2386_vm10 = vcmp.eq.f32.partialorder %v7993_v24, %v6504_v8 }
 0x958   :  { %v2321_v48 = vpop.xlane.xlu2 %2320  ;;  %v6521_v42 = vsel %vm2386_vm10, 3.0, %v6344_v62  ;;  %v1775_v62 = vld [vmem:[%s7848_s5 + $0x20] sm:$0xff]  ;;  %s4216_s5 = smov [#allocation5]  }
 0x959   :  { %vm2337_vm11 = vcmp.eq.f32.partialorder %v6438_v22, %v2321_v48  ;;  %1802 = vmatpush.msrb.mxu2 %v1775_v62  ;;  %s3745_s20 = sshll.u32 %s4216_s5, 4  ;;  %s3746_s20 = int_to_ptr.vmem [resolvable:$true] %s3745_s20 }
 0x95a   :  { %v2353_v19 = vsel %vm2337_vm11, %v7993_v24, 128.0 }
 0x95b   :  { %1752 = vmatmul.f32.gmra.mxu0 %v8001_v17  ;;  %2384 = vmin.xlane.f32.xlu0 %v2353_v19 }
 0x95c   :  { %2434 = vmin.xlane.f32.xlu2 %v6521_v42  ;;  %1803 = vmatpush.msrb.mxu2 %v1774_v4 }
 0x95e   :  { %v6530_v7 = vpop.xlane.xlu1 %2356  ;;  %1804 = vmatpush.msrb.mxu2 %v1773_v11 }
 0x95f   :  { %vm2387_vm12 = vcmp.eq.f32.partialorder %v7993_v24, %v6530_v7 }
 0x960   :  { %v6544_v55 = vsel %vm2387_vm12, 3.0, %v6350_v26  ;;  %1805 = vmatpush.msrb.mxu2 %v1772_v60 }
 0x962   :  { %1806 = vmatpush.msrb.mxu2 %v1771_v23 }
 0x963   :  { %1755 = vmatmul.f32.gmra.mxu0 %v8002_v56  ;;  %2436 = vmin.xlane.f32.xlu0 %v6544_v55 }
 0x966   :  { %v6554_v31 = vpop.xlane.xlu2 %2358 }
 0x967   :  { %vm2388_vm13 = vcmp.eq.f32.partialorder %v7993_v24, %v6554_v31 }
 0x968   :  { %v6562_v26 = vsel %vm2388_vm13, 3.0, %v6356_v13 }
 0x969   :  { %2438 = vmin.xlane.f32.xlu1 %v6562_v26 }
 0x96b   :  { %1758 = vmatmul.f32.gmra.mxu0 %v8003_v6 }
 0x96e   :  { %v6569_v10 = vpop.xlane.xlu0 %2360 }
 0x96f   :  { %vm2389_vm3 = vcmp.eq.f32.partialorder %v7993_v24, %v6569_v10 }
 0x970   :  { %v6577_v13 = vsel %vm2389_vm3, 3.0, %v6362_v28 }
 0x971   :  { %2440 = vmin.xlane.f32.xlu2 %v6577_v13 }
 0x973   :  { %1761 = vmatmul.f32.gmra.mxu0 %v8004_v57 }
 0x976   :  { %v6581_v54 = vpop.xlane.xlu2 %2362 }
 0x977   :  { %vm2390_vm14 = vcmp.eq.f32.partialorder %v7993_v24, %v6581_v54 }
 0x978   :  { %v6589_v20 = vsel %vm2390_vm14, 3.0, %v6368_v43 }
 0x979   :  { %2442 = vmin.xlane.f32.xlu0 %v6589_v20 }
 0x97b   :  { %1764 = vmatmul.f32.gmra.mxu0 %v8005_v3 }
 0x97e   :  { %v6593_v28 = vpop.xlane.xlu0 %2364 }
 0x97f   :  { %vm2391_vm15 = vcmp.eq.f32.partialorder %v7993_v24, %v6593_v28 }
 0x980   :  { %v6601_v14 = vsel %vm2391_vm15, 3.0, %v6374_v36 }
 0x981   :  { %2444 = vmin.xlane.f32.xlu1 %v6601_v14 }
 0x983   :  { %1767 = vmatmul.f32.gmra.mxu0 %v8006_v41 }
 0x986   :  { %v6605_v43 = vpop.xlane.xlu1 %2366 }
 0x987   :  { %vm2392_vm0 = vcmp.eq.f32.partialorder %v7993_v24, %v6605_v43 }
 0x988   :  { %v6613_v27 = vsel %vm2392_vm0, 3.0, %v6380_v9  ;;  %v1723_v33 = vpop.f32.mrf.mxu0 }
 0x989   :  { %1807 = vmatmul.f32.vlgmr.msrb.gmra.mxu2 %v1723_v33  ;;  %2446 = vmin.xlane.f32.xlu2 %v6613_v27 }
 0x98e   :  { %v6616_v36 = vpop.xlane.xlu2 %2368 }
 0x98f   :  { %vm2393_vm2 = vcmp.eq.f32.partialorder %v7993_v24, %v6616_v36 }
 0x990   :  { %v6624_v32 = vsel %vm2393_vm2, 3.0, %v6386_v52  ;;  %v1726_v58 = vpop.f32.mrf.mxu0 }
 0x991   :  { %1810 = vmatmul.f32.gmra.mxu2 %v1726_v58  ;;  %2448 = vmin.xlane.f32.xlu0 %v6624_v32 }
 0x996   :  { %v6627_v9 = vpop.xlane.xlu1 %2370 }
 0x997   :  { %vm2394_vm1 = vcmp.eq.f32.partialorder %v7993_v24, %v6627_v9 }
 0x998   :  { %v6635_v1 = vsel %vm2394_vm1, 3.0, %v6392_v18  ;;  %v1729_v45 = vpop.f32.mrf.mxu0 }
 0x999   :  { %1812 = vmatmul.f32.gmra.mxu2 %v1729_v45  ;;  %2450 = vmin.xlane.f32.xlu1 %v6635_v1 }
 0x99e   :  { %v6638_v52 = vpop.xlane.xlu2 %2372 }
 0x99f   :  { %vm2395_vm4 = vcmp.eq.f32.partialorder %v7993_v24, %v6638_v52 }
 0x9a0   :  { %v6646_v12 = vsel %vm2395_vm4, 3.0, %v6398_v49  ;;  %v1732_v50 = vpop.f32.mrf.mxu0 }
 0x9a1   :  { %1814 = vmatmul.f32.gmra.mxu2 %v1732_v50  ;;  %2452 = vmin.xlane.f32.xlu2 %v6646_v12 }
 0x9a6   :  { %v6649_v18 = vpop.xlane.xlu0 %2374 }
 0x9a7   :  { %vm2396_vm5 = vcmp.eq.f32.partialorder %v7993_v24, %v6649_v18 }
 0x9a8   :  { %v6657_v21 = vsel %vm2396_vm5, 3.0, %v6404_v2  ;;  %v1735_v44 = vpop.f32.mrf.mxu0 }
 0x9a9   :  { %1816 = vmatmul.f32.gmra.mxu2 %v1735_v44  ;;  %2454 = vmin.xlane.f32.xlu0 %v6657_v21 }
 0x9ae   :  { %v6660_v49 = vpop.xlane.xlu1 %2376 }
 0x9af   :  { %vm2397_vm6 = vcmp.eq.f32.partialorder %v7993_v24, %v6660_v49 }
 0x9b0   :  { %v6668_v51 = vsel %vm2397_vm6, 3.0, %v6410_v61  ;;  %v1738_v59 = vpop.f32.mrf.mxu0 }
 0x9b1   :  { %1818 = vmatmul.f32.gmra.mxu2 %v1738_v59  ;;  %2456 = vmin.xlane.f32.xlu1 %v6668_v51 }
 0x9b6   :  { %v6671_v2 = vpop.xlane.xlu0 %2378 }
 0x9b7   :  { %vm7914_vm7 = vcmp.eq.f32.partialorder %v7993_v24, %v6671_v2 }
 0x9b8   :  { %v6679_v34 = vsel %vm7914_vm7, 3.0, %v6416_v47  ;;  %v1741_v30 = vpop.f32.mrf.mxu0 }
 0x9b9   :  { %1820 = vmatmul.f32.gmra.mxu2 %v1741_v30  ;;  %2458 = vmin.xlane.f32.xlu2 %v6679_v34 }
 0x9be   :  { %v6682_v61 = vpop.xlane.xlu1 %2380 }
 0x9bf   :  { %vm7912_vm8 = vcmp.eq.f32.partialorder %v7993_v24, %v6682_v61 }
 0x9c0   :  { %v6690_v39 = vsel %vm7912_vm8, 3.0, %v6422_v38  ;;  %v1744_v35 = vpop.f32.mrf.mxu0 }
 0x9c1   :  { %1822 = vmatmul.f32.gmra.mxu2 %v1744_v35  ;;  %2460 = vmin.xlane.f32.xlu0 %v6690_v39 }
 0x9c6   :  { %v6693_v47 = vpop.xlane.xlu2 %2382 }
 0x9c7   :  { %vm7913_vm9 = vcmp.eq.f32.partialorder %v7993_v24, %v6693_v47 }
 0x9c8   :  { %v6701_v40 = vsel %vm7913_vm9, 3.0, %v6428_v0  ;;  %v1747_v29 = vpop.f32.mrf.mxu0 }
 0x9c9   :  { %1824 = vmatmul.f32.gmra.mxu2 %v1747_v29  ;;  %2462 = vmin.xlane.f32.xlu1 %v6701_v40 }
 0x9ce   :  { %v6704_v38 = vpop.xlane.xlu0 %2384 }
 0x9cf   :  { %v2435_v53 = vpop.xlane.xlu2 %2434  ;;  %vm7915_vm11 = vcmp.eq.f32.partialorder %v7993_v24, %v6704_v38 }
 0x9d0   :  { %vm2466_vm8 = vcmp.eq.f32.partialorder %v6521_v42, %v2435_v53  ;;  %v6713_v46 = vsel %vm7915_vm11, 3.0, %v6438_v22  ;;  %v1750_v0 = vpop.f32.mrf.mxu0 }
 0x9d1   :  { %v2482_v37 = vsel %vm2466_vm8, %v7993_v24, 128.0  ;;  %1826 = vmatmul.f32.gmra.mxu2 %v1750_v0  ;;  %2464 = vmin.xlane.f32.xlu2 %v6713_v46 }
 0x9d2   :  { %2498 = vmin.xlane.f32.xlu0 %v2482_v37 }
 0x9d6   :  { %v2437_v48 = vpop.xlane.xlu0 %2436 }
 0x9d7   :  { %vm2467_vm9 = vcmp.eq.f32.partialorder %v6544_v55, %v2437_v48 }
 0x9d8   :  { %v2483_v5 = vsel %vm2467_vm9, %v7993_v24, 128.0  ;;  %v1753_v15 = vpop.f32.mrf.mxu0 }
 0x9d9   :  { %1828 = vmatmul.f32.gmra.mxu2 %v1753_v15  ;;  %2500 = vmin.xlane.f32.xlu1 %v2483_v5 }
 0x9dc   :  { %v2439_v19 = vpop.xlane.xlu1 %2438 }
 0x9dd   :  { %vm2468_vm7 = vcmp.eq.f32.partialorder %v6562_v26, %v2439_v19 }
 0x9de   :  { %v2484_v22 = vsel %vm2468_vm7, %v7993_v24, 128.0 }
 0x9df   :  { %2502 = vmin.xlane.f32.xlu2 %v2484_v22 }
 0x9e0   :  { %v1756_v17 = vpop.f32.mrf.mxu0 }
 0x9e1   :  { %1830 = vmatmul.f32.gmra.mxu2 %v1756_v17 }
 0x9e4   :  { %v2441_v63 = vpop.xlane.xlu2 %2440 }
 0x9e5   :  { %vm2469_vm8 = vcmp.eq.f32.partialorder %v6577_v13, %v2441_v63 }
 0x9e6   :  { %v2485_v16 = vsel %vm2469_vm8, %v7993_v24, 128.0 }
 0x9e7   :  { %2504 = vmin.xlane.f32.xlu0 %v2485_v16 }
 0x9e8   :  { %v1759_v62 = vpop.f32.mrf.mxu0 }
 0x9e9   :  { %1832 = vmatmul.f32.gmra.mxu2 %v1759_v62 }
 0x9ec   :  { %v2443_v4 = vpop.xlane.xlu0 %2442 }
 0x9ed   :  { %vm2470_vm9 = vcmp.eq.f32.partialorder %v6589_v20, %v2443_v4 }
 0x9ee   :  { %v2486_v56 = vsel %vm2470_vm9, %v7993_v24, 128.0 }
 0x9ef   :  { %2506 = vmin.xlane.f32.xlu1 %v2486_v56 }
 0x9f0   :  { %v1762_v11 = vpop.f32.mrf.mxu0 }
 0x9f1   :  { %1834 = vmatmul.f32.gmra.mxu2 %v1762_v11 }
 0x9f4   :  { %v2445_v60 = vpop.xlane.xlu1 %2444 }
 0x9f5   :  { %vm2471_vm7 = vcmp.eq.f32.partialorder %v6601_v14, %v2445_v60 }
 0x9f6   :  { %v2487_v23 = vsel %vm2471_vm7, %v7993_v24, 128.0 }
 0x9f7   :  { %2508 = vmin.xlane.f32.xlu2 %v2487_v23 }
 0x9f8   :  { %v1765_v6 = vpop.f32.mrf.mxu0 }
 0x9f9   :  { %1836 = vmatmul.f32.gmra.mxu2 %v1765_v6 }
 0x9fc   :  { %v2447_v57 = vpop.xlane.xlu2 %2446 }
 0x9fd   :  { %vm2472_vm8 = vcmp.eq.f32.partialorder %v6613_v27, %v2447_v57  ;;  %v8007_v57 = vmov 0.0  }
 0x9fe   :  { %v2488_v3 = vsel %vm2472_vm8, %v7993_v24, 128.0 }
 0x9ff   :  { %2510 = vmin.xlane.f32.xlu0 %v2488_v3  ;;  %v2402_v3 = vsel %vm2386_vm10, 1.0, %v8007_v57 }
 0xa00   :  { %v1768_v41 = vpop.f32.mrf.mxu0 }
 0xa01   :  { %1838 = vmatmul.f32.gmra.mxu2 %v1768_v41 }
 0xa04   :  { %v2449_v33 = vpop.xlane.xlu0 %2448 }
 0xa05   :  { %vm2473_vm9 = vcmp.eq.f32.partialorder %v6624_v32, %v2449_v33 }
 0xa06   :  { %v2489_v58 = vsel %vm2473_vm9, %v7993_v24, 128.0 }
 0xa07   :  { %2512 = vmin.xlane.f32.xlu1 %v2489_v58 }
 0xa0c   :  { %v6731_v45 = vpop.f32.mrf.mxu2  ;;  %v2451_v50 = vpop.xlane.xlu1 %2450 }
 0xa0d   :  { %vm2474_vm7 = vcmp.eq.f32.partialorder %v6635_v1, %v2451_v50 }
 0xa0e   :  { %v2490_v44 = vsel %vm2474_vm7, %v7993_v24, 128.0 }
 0xa0f   :  { %2514 = vmin.xlane.f32.xlu2 %v2490_v44  ;;  %v2403_v44 = vsel %vm2387_vm12, 1.0, %v8007_v57 }
 0xa14   :  { %v1811_v59 = vpop.f32.mrf.mxu2  ;;  %v2453_v30 = vpop.xlane.xlu2 %2452 }
 0xa15   :  { %vm2475_vm8 = vcmp.eq.f32.partialorder %v6646_v12, %v2453_v30  ;;  %v2404_v30 = vsel %vm2388_vm13, 1.0, %v8007_v57 }
 0xa16   :  { %v2491_v35 = vsel %vm2475_vm8, %v7993_v24, 128.0 }
 0xa17   :  { %2516 = vmin.xlane.f32.xlu0 %v2491_v35 }
 0xa1c   :  { %v1813_v29 = vpop.f32.mrf.mxu2  ;;  %v2455_v53 = vpop.xlane.xlu0 %2454 }
 0xa1d   :  { %vm2476_vm9 = vcmp.eq.f32.partialorder %v6657_v21, %v2455_v53  ;;  %v2405_v53 = vsel %vm2389_vm3, 1.0, %v8007_v57 }
 0xa1e   :  { %v2492_v0 = vsel %vm2476_vm9, %v7993_v24, 128.0 }
 0xa1f   :  { %2518 = vmin.xlane.f32.xlu1 %v2492_v0 }
 0xa24   :  { %v1815_v37 = vpop.f32.mrf.mxu2  ;;  %v2457_v48 = vpop.xlane.xlu1 %2456 }
 0xa25   :  { %vm2477_vm11 = vcmp.eq.f32.partialorder %v6668_v51, %v2457_v48  ;;  %v2406_v48 = vsel %vm2390_vm14, 1.0, %v8007_v57 }
 0xa26   :  { %v2493_v5 = vsel %vm2477_vm11, %v7993_v24, 128.0 }
 0xa27   :  { %2520 = vmin.xlane.f32.xlu2 %v2493_v5 }
 0xa2c   :  { %v1817_v15 = vpop.f32.mrf.mxu2  ;;  %v2459_v19 = vpop.xlane.xlu2 %2458 }
 0xa2d   :  { %vm2478_vm7 = vcmp.eq.f32.partialorder %v6679_v34, %v2459_v19  ;;  %v2407_v19 = vsel %vm2391_vm15, 1.0, %v8007_v57 }
 0xa2e   :  { %v2494_v22 = vsel %vm2478_vm7, %v7993_v24, 128.0 }
 0xa2f   :  { %2522 = vmin.xlane.f32.xlu0 %v2494_v22 }
 0xa34   :  { %v1819_v17 = vpop.f32.mrf.mxu2  ;;  %v2461_v63 = vpop.xlane.xlu0 %2460 }
 0xa35   :  { %vm2479_vm8 = vcmp.eq.f32.partialorder %v6690_v39, %v2461_v63  ;;  %v2408_v63 = vsel %vm2392_vm0, 1.0, %v8007_v57 }
 0xa36   :  { %v2495_v16 = vsel %vm2479_vm8, %v7993_v24, 128.0 }
 0xa37   :  { %2524 = vmin.xlane.f32.xlu1 %v2495_v16 }
 0xa3c   :  { %v1821_v62 = vpop.f32.mrf.mxu2  ;;  %v2463_v4 = vpop.xlane.xlu1 %2462 }
 0xa3d   :  { %vm2480_vm9 = vcmp.eq.f32.partialorder %v6701_v40, %v2463_v4  ;;  %v2409_v4 = vsel %vm2393_vm2, 1.0, %v8007_v57 }
 0xa3e   :  { %v2496_v56 = vsel %vm2480_vm9, %v7993_v24, 128.0 }
 0xa3f   :  { %2526 = vmin.xlane.f32.xlu2 %v2496_v56 }
 0xa44   :  { %v1823_v11 = vpop.f32.mrf.mxu2  ;;  %v2465_v60 = vpop.xlane.xlu2 %2464 }
 0xa45   :  { %vm2481_vm11 = vcmp.eq.f32.partialorder %v6713_v46, %v2465_v60  ;;  %v2499_v23 = vpop.xlane.xlu0 %2498  ;;  %v2410_v60 = vsel %vm2394_vm1, 1.0, %v8007_v57 }
 0xa46   :  { %v2497_v6 = vsel %vm2481_vm11, %v7993_v24, 128.0  ;;  %vm2530_vm7 = vcmp.eq.f32.partialorder %v7993_v24, %v2499_v23 }
 0xa47   :  { %v6754_v41 = vsel %vm2530_vm7, 1.0, %v2402_v3  ;;  %v6757_v33 = vsel %vm2530_vm7, 3.0, %v6521_v42  ;;  %2528 = vmin.xlane.f32.xlu0 %v2497_v6  ;;  %v2411_v3 = vsel %vm2395_vm4, 1.0, %v8007_v57  ;;  %vm8010_vm7 = vcmp.eq.f32.partialorder %v7993_v24, %v6693_v47 }
 0xa48   :  { %2578 = vmin.xlane.f32.xlu1 %v6757_v33 }
 0xa4c   :  { %v1825_v58 = vpop.f32.mrf.mxu2  ;;  %v2501_v50 = vpop.xlane.xlu1 %2500 }
 0xa4d   :  { %vm2531_vm8 = vcmp.eq.f32.partialorder %v7993_v24, %v2501_v50  ;;  %v2412_v50 = vsel %vm2396_vm5, 1.0, %v8007_v57  ;;  %vm8008_vm5 = vcmp.eq.f32.partialorder %v7993_v24, %v6671_v2 }
 0xa4e   :  { %v6765_v8 = vsel %vm2531_vm8, 1.0, %v2403_v44  ;;  %v6768_v59 = vsel %vm2531_vm8, 3.0, %v6544_v55 }
 0xa4f   :  { %2580 = vmin.xlane.f32.xlu2 %v6768_v59 }
 0xa52   :  { %v2503_v42 = vpop.xlane.xlu2 %2502 }
 0xa53   :  { %vm2532_vm10 = vcmp.eq.f32.partialorder %v7993_v24, %v2503_v42 }
 0xa54   :  { %v6776_v35 = vsel %vm2532_vm10, 1.0, %v2404_v30  ;;  %v6779_v7 = vsel %vm2532_vm10, 3.0, %v6562_v26  ;;  %v1827_v29 = vpop.f32.mrf.mxu2  ;;  %vm8011_vm10 = vcmp.eq.f32.partialorder %v7993_v24, %v6704_v38 }
 0xa55   :  { %2582 = vmin.xlane.f32.xlu0 %v6779_v7 }
 0xa5a   :  { %v2505_v55 = vpop.xlane.xlu0 %2504 }
 0xa5b   :  { %vm2533_vm12 = vcmp.eq.f32.partialorder %v7993_v24, %v2505_v55 }
 0xa5c   :  { %v6787_v31 = vsel %vm2533_vm12, 1.0, %v2405_v53  ;;  %v6790_v0 = vsel %vm2533_vm12, 3.0, %v6577_v13  ;;  %v1829_v37 = vpop.f32.mrf.mxu2 }
 0xa5d   :  { %2584 = vmin.xlane.f32.xlu1 %v6790_v0 }
 0xa62   :  { %v2507_v26 = vpop.xlane.xlu1 %2506 }
 0xa63   :  { %vm2534_vm13 = vcmp.eq.f32.partialorder %v7993_v24, %v2507_v26 }
 0xa64   :  { %v6798_v10 = vsel %vm2534_vm13, 1.0, %v2406_v48  ;;  %v6801_v5 = vsel %vm2534_vm13, 3.0, %v6589_v20  ;;  %v1831_v15 = vpop.f32.mrf.mxu2 }
 0xa65   :  { %2586 = vmin.xlane.f32.xlu2 %v6801_v5 }
 0xa6a   :  { %v2509_v13 = vpop.xlane.xlu2 %2508 }
 0xa6b   :  { %vm2535_vm3 = vcmp.eq.f32.partialorder %v7993_v24, %v2509_v13 }
 0xa6c   :  { %v6809_v54 = vsel %vm2535_vm3, 1.0, %v2407_v19  ;;  %v6812_v22 = vsel %vm2535_vm3, 3.0, %v6601_v14  ;;  %v1833_v17 = vpop.f32.mrf.mxu2 }
 0xa6d   :  { %2588 = vmin.xlane.f32.xlu0 %v6812_v22 }
 0xa72   :  { %v2511_v20 = vpop.xlane.xlu0 %2510 }
 0xa73   :  { %vm2536_vm14 = vcmp.eq.f32.partialorder %v7993_v24, %v2511_v20 }
 0xa74   :  { %v6820_v28 = vsel %vm2536_vm14, 1.0, %v2408_v63  ;;  %v6823_v16 = vsel %vm2536_vm14, 3.0, %v6613_v27  ;;  %v1835_v62 = vpop.f32.mrf.mxu2 }
 0xa75   :  { %2590 = vmin.xlane.f32.xlu1 %v6823_v16 }
 0xa7a   :  { %v2513_v14 = vpop.xlane.xlu1 %2512 }
 0xa7b   :  { %vm2537_vm15 = vcmp.eq.f32.partialorder %v7993_v24, %v2513_v14 }
 0xa7c   :  { %v6831_v43 = vsel %vm2537_vm15, 1.0, %v2409_v4  ;;  %v6834_v56 = vsel %vm2537_vm15, 3.0, %v6624_v32  ;;  %v1837_v11 = vpop.f32.mrf.mxu2 }
 0xa7d   :  { %2592 = vmin.xlane.f32.xlu2 %v6834_v56 }
 0xa82   :  { %v2515_v27 = vpop.xlane.xlu2 %2514 }
 0xa83   :  { %vm2538_vm0 = vcmp.eq.f32.partialorder %v7993_v24, %v2515_v27 }
 0xa84   :  { %v6842_v36 = vsel %vm2538_vm0, 1.0, %v2410_v60  ;;  %v6845_v23 = vsel %vm2538_vm0, 3.0, %v6635_v1  ;;  %v1839_v6 = vpop.f32.mrf.mxu2 }
 0xa85   :  { %2594 = vmin.xlane.f32.xlu0 %v6845_v23 }
 0xa8a   :  { %v2517_v32 = vpop.xlane.xlu0 %2516 }
 0xa8b   :  { %vm2539_vm2 = vcmp.eq.f32.partialorder %v7993_v24, %v2517_v32 }
 0xa8c   :  { %v6853_v9 = vsel %vm2539_vm2, 1.0, %v2411_v3  ;;  %v6856_v58 = vsel %vm2539_vm2, 3.0, %v6646_v12  ;;  %v2413_v12 = vsel %vm2397_vm6, 1.0, %v8007_v57  ;;  %vm8009_vm6 = vcmp.eq.f32.partialorder %v7993_v24, %v6682_v61 }
 0xa8d   :  { %2596 = vmin.xlane.f32.xlu1 %v6856_v58 }
 0xa92   :  { %v2519_v1 = vpop.xlane.xlu1 %2518 }
 0xa93   :  { %vm2540_vm1 = vcmp.eq.f32.partialorder %v7993_v24, %v2519_v1 }
 0xa94   :  { %v6864_v44 = vsel %vm2540_vm1, 1.0, %v2412_v50  ;;  %v6867_v52 = vsel %vm2540_vm1, 3.0, %v6657_v21  ;;  %v2414_v21 = vsel %vm8008_vm5, 1.0, %v8007_v57 }
 0xa95   :  { %2598 = vmin.xlane.f32.xlu2 %v6867_v52 }
 0xa9a   :  { %v2521_v42 = vpop.xlane.xlu2 %2520 }
 0xa9b   :  { %vm2541_vm4 = vcmp.eq.f32.partialorder %v7993_v24, %v2521_v42 }
 0xa9c   :  { %v6875_v30 = vsel %vm2541_vm4, 1.0, %v2413_v12  ;;  %v6878_v18 = vsel %vm2541_vm4, 3.0, %v6668_v51  ;;  %v2415_v51 = vsel %vm8009_vm6, 1.0, %v8007_v57 }
 0xa9d   :  { %2600 = vmin.xlane.f32.xlu0 %v6878_v18 }
 0xaa2   :  { %v2523_v29 = vpop.xlane.xlu0 %2522 }
 0xaa3   :  { %vm2542_vm9 = vcmp.eq.f32.partialorder %v7993_v24, %v2523_v29 }
 0xaa4   :  { %v6886_v55 = vsel %vm2542_vm9, 1.0, %v2414_v21  ;;  %v6889_v49 = vsel %vm2542_vm9, 3.0, %v6679_v34  ;;  %v2416_v34 = vsel %vm8010_vm7, 1.0, %v8007_v57 }
 0xaa5   :  { %2602 = vmin.xlane.f32.xlu1 %v6889_v49 }
 0xaaa   :  { %v2525_v53 = vpop.xlane.xlu1 %2524 }
 0xaab   :  { %vm2543_vm11 = vcmp.eq.f32.partialorder %v7993_v24, %v2525_v53 }
 0xaac   :  { %v6897_v37 = vsel %vm2543_vm11, 1.0, %v2415_v51  ;;  %v6900_v2 = vsel %vm2543_vm11, 3.0, %v6690_v39  ;;  %v2417_v39 = vsel %vm8011_vm10, 1.0, %v8007_v57 }
 0xaad   :  { %2604 = vmin.xlane.f32.xlu2 %v6900_v2 }
 0xab2   :  { %v2527_v26 = vpop.xlane.xlu2 %2526 }
 0xab3   :  { %vm2544_vm8 = vcmp.eq.f32.partialorder %v7993_v24, %v2527_v26 }
 0xab4   :  { %v6908_v48 = vsel %vm2544_vm8, 1.0, %v2416_v34  ;;  %v6911_v61 = vsel %vm2544_vm8, 3.0, %v6701_v40 }
 0xab5   :  { %2606 = vmin.xlane.f32.xlu0 %v6911_v61 }
 0xaba   :  { %v2529_v15 = vpop.xlane.xlu0 %2528 }
 0xabb   :  { %v2579_v13 = vpop.xlane.xlu1 %2578  ;;  %vm2545_vm12 = vcmp.eq.f32.partialorder %v7993_v24, %v2529_v15 }
 0xabc   :  { %vm2610_vm13 = vcmp.eq.f32.partialorder %v6757_v33, %v2579_v13  ;;  %v6920_v47 = vsel %vm2545_vm12, 1.0, %v2417_v39  ;;  %v6923_v19 = vsel %vm2545_vm12, 3.0, %v6713_v46 }
 0xabd   :  { %v2626_v40 = vsel %vm2610_vm13, %v7993_v24, 128.0  ;;  %2608 = vmin.xlane.f32.xlu1 %v6923_v19 }
 0xabe   :  { %2642 = vmin.xlane.f32.xlu2 %v2626_v40 }
 0xac2   :  { %v2581_v17 = vpop.xlane.xlu2 %2580 }
 0xac3   :  { %vm2611_vm3 = vcmp.eq.f32.partialorder %v6768_v59, %v2581_v17 }
 0xac4   :  { %v2627_v38 = vsel %vm2611_vm3, %v7993_v24, 128.0 }
 0xac5   :  { %2644 = vmin.xlane.f32.xlu0 %v2627_v38 }
 0xac8   :  { %v2583_v57 = vpop.xlane.xlu0 %2582 }
 0xac9   :  { %vm2612_vm14 = vcmp.eq.f32.partialorder %v6779_v7, %v2583_v57 }
 0xaca   :  { %v2628_v20 = vsel %vm2612_vm14, %v7993_v24, 128.0 }
 0xacb   :  { %2646 = vmin.xlane.f32.xlu1 %v2628_v20 }
 0xad0   :  { %v2585_v63 = vpop.xlane.xlu1 %2584 }
 0xad1   :  { %vm2613_vm15 = vcmp.eq.f32.partialorder %v6790_v0, %v2585_v63 }
 0xad2   :  { %v2629_v46 = vsel %vm2613_vm15, %v7993_v24, 128.0 }
 0xad3   :  { %2648 = vmin.xlane.f32.xlu2 %v2629_v46 }
 0xad8   :  { %v2587_v62 = vpop.xlane.xlu2 %2586 }
 0xad9   :  { %vm2614_vm0 = vcmp.eq.f32.partialorder %v6801_v5, %v2587_v62 }
 0xada   :  { %v2630_v14 = vsel %vm2614_vm0, %v7993_v24, 128.0 }
 0xadb   :  { %2650 = vmin.xlane.f32.xlu0 %v2630_v14 }
 0xae0   :  { %v2589_v4 = vpop.xlane.xlu0 %2588 }
 0xae1   :  { %vm2615_vm2 = vcmp.eq.f32.partialorder %v6812_v22, %v2589_v4 }
 0xae2   :  { %v2631_v11 = vsel %vm2615_vm2, %v7993_v24, 128.0 }
 0xae3   :  { %2652 = vmin.xlane.f32.xlu1 %v2631_v11 }
 0xae8   :  { %v2591_v27 = vpop.xlane.xlu1 %2590 }
 0xae9   :  { %vm2616_vm1 = vcmp.eq.f32.partialorder %v6823_v16, %v2591_v27 }
 0xaea   :  { %v2632_v60 = vsel %vm2616_vm1, %v7993_v24, 128.0 }
 0xaeb   :  { %2654 = vmin.xlane.f32.xlu2 %v2632_v60 }
 0xaf0   :  { %v2593_v6 = vpop.xlane.xlu2 %2592 }
 0xaf1   :  { %vm2617_vm4 = vcmp.eq.f32.partialorder %v6834_v56, %v2593_v6 }
 0xaf2   :  { %v2633_v32 = vsel %vm2617_vm4, %v7993_v24, 128.0 }
 0xaf3   :  { %2656 = vmin.xlane.f32.xlu0 %v2633_v32 }
 0xaf8   :  { %v2595_v3 = vpop.xlane.xlu0 %2594 }
 0xaf9   :  { %vm2618_vm5 = vcmp.eq.f32.partialorder %v6845_v23, %v2595_v3 }
 0xafa   :  { %v2634_v1 = vsel %vm2618_vm5, %v7993_v24, 128.0 }
 0xafb   :  { %2658 = vmin.xlane.f32.xlu1 %v2634_v1 }
 0xb00   :  { %v2597_v50 = vpop.xlane.xlu1 %2596 }
 0xb01   :  { %vm2619_vm9 = vcmp.eq.f32.partialorder %v6856_v58, %v2597_v50 }
 0xb02   :  { %v2635_v42 = vsel %vm2619_vm9, %v7993_v24, 128.0 }
 0xb03   :  { %2660 = vmin.xlane.f32.xlu2 %v2635_v42 }
 0xb08   :  { %v2599_v12 = vpop.xlane.xlu2 %2598 }
 0xb09   :  { %vm2620_vm6 = vcmp.eq.f32.partialorder %v6867_v52, %v2599_v12 }
 0xb0a   :  { %v2636_v29 = vsel %vm2620_vm6, %v7993_v24, 128.0 }
 0xb0b   :  { %2662 = vmin.xlane.f32.xlu0 %v2636_v29 }
 0xb10   :  { %v2601_v21 = vpop.xlane.xlu0 %2600 }
 0xb11   :  { %vm2621_vm11 = vcmp.eq.f32.partialorder %v6878_v18, %v2601_v21 }
 0xb12   :  { %v2637_v53 = vsel %vm2621_vm11, %v7993_v24, 128.0 }
 0xb13   :  { %2664 = vmin.xlane.f32.xlu1 %v2637_v53 }
 0xb18   :  { %v2603_v51 = vpop.xlane.xlu1 %2602 }
 0xb19   :  { %vm2622_vm7 = vcmp.eq.f32.partialorder %v6889_v49, %v2603_v51 }
 0xb1a   :  { %v2638_v26 = vsel %vm2622_vm7, %v7993_v24, 128.0 }
 0xb1b   :  { %2666 = vmin.xlane.f32.xlu2 %v2638_v26 }
 0xb20   :  { %v2605_v34 = vpop.xlane.xlu2 %2604 }
 0xb21   :  { %vm2623_vm8 = vcmp.eq.f32.partialorder %v6900_v2, %v2605_v34 }
 0xb22   :  { %v2639_v15 = vsel %vm2623_vm8, %v7993_v24, 128.0 }
 0xb23   :  { %2668 = vmin.xlane.f32.xlu0 %v2639_v15 }
 0xb28   :  { %v2607_v39 = vpop.xlane.xlu0 %2606 }
 0xb29   :  { %vm2624_vm10 = vcmp.eq.f32.partialorder %v6911_v61, %v2607_v39 }
 0xb2a   :  { %v2640_v13 = vsel %vm2624_vm10, %v7993_v24, 128.0 }
 0xb2b   :  { %2670 = vmin.xlane.f32.xlu1 %v2640_v13 }
 0xb30   :  { %v2609_v40 = vpop.xlane.xlu1 %2608 }
 0xb31   :  { %v2643_v17 = vpop.xlane.xlu2 %2642  ;;  %vm2625_vm12 = vcmp.eq.f32.partialorder %v6923_v19, %v2609_v40 }
 0xb32   :  { %vm2674_vm13 = vcmp.eq.f32.partialorder %v7993_v24, %v2643_v17  ;;  %v2641_v38 = vsel %vm2625_vm12, %v7993_v24, 128.0 }
 0xb33   :  { %v6959_v57 = vsel %vm2674_vm13, 1.0, %v6754_v41  ;;  %v6962_v20 = vsel %vm2674_vm13, 3.0, %v6757_v33  ;;  %2672 = vmin.xlane.f32.xlu2 %v2641_v38 }
 0xb34   :  { %2722 = vmin.xlane.f32.xlu0 %v6962_v20 }
 0xb38   :  { %v2645_v63 = vpop.xlane.xlu0 %2644 }
 0xb39   :  { %vm2675_vm3 = vcmp.eq.f32.partialorder %v7993_v24, %v2645_v63 }
 0xb3a   :  { %v6967_v46 = vsel %vm2675_vm3, 1.0, %v6765_v8  ;;  %v6970_v62 = vsel %vm2675_vm3, 3.0, %v6768_v59 }
 0xb3b   :  { %2724 = vmin.xlane.f32.xlu1 %v6970_v62 }
 0xb3e   :  { %v2647_v14 = vpop.xlane.xlu1 %2646 }
 0xb3f   :  { %vm2676_vm14 = vcmp.eq.f32.partialorder %v7993_v24, %v2647_v14 }
 0xb40   :  { %v6975_v41 = vsel %vm2676_vm14, 1.0, %v6776_v35  ;;  %v6978_v33 = vsel %vm2676_vm14, 3.0, %v6779_v7 }
 0xb41   :  { %2726 = vmin.xlane.f32.xlu2 %v6978_v33 }
 0xb46   :  { %v2649_v4 = vpop.xlane.xlu2 %2648 }
 0xb47   :  { %vm2677_vm15 = vcmp.eq.f32.partialorder %v7993_v24, %v2649_v4 }
 0xb48   :  { %v6983_v8 = vsel %vm2677_vm15, 1.0, %v6787_v31  ;;  %v6986_v59 = vsel %vm2677_vm15, 3.0, %v6790_v0 }
 0xb49   :  { %2728 = vmin.xlane.f32.xlu0 %v6986_v59 }
 0xb4e   :  { %v2651_v11 = vpop.xlane.xlu0 %2650 }
 0xb4f   :  { %vm2678_vm0 = vcmp.eq.f32.partialorder %v7993_v24, %v2651_v11 }
 0xb50   :  { %v6991_v35 = vsel %vm2678_vm0, 1.0, %v6798_v10  ;;  %v6994_v7 = vsel %vm2678_vm0, 3.0, %v6801_v5 }
 0xb51   :  { %2730 = vmin.xlane.f32.xlu1 %v6994_v7 }
 0xb56   :  { %v2653_v27 = vpop.xlane.xlu1 %2652 }
 0xb57   :  { %vm2679_vm2 = vcmp.eq.f32.partialorder %v7993_v24, %v2653_v27 }
 0xb58   :  { %v6999_v31 = vsel %vm2679_vm2, 1.0, %v6809_v54  ;;  %v7002_v0 = vsel %vm2679_vm2, 3.0, %v6812_v22 }
 0xb59   :  { %2732 = vmin.xlane.f32.xlu2 %v7002_v0 }
 0xb5e   :  { %v2655_v60 = vpop.xlane.xlu2 %2654 }
 0xb5f   :  { %vm2680_vm1 = vcmp.eq.f32.partialorder %v7993_v24, %v2655_v60 }
 0xb60   :  { %v7007_v10 = vsel %vm2680_vm1, 1.0, %v6820_v28  ;;  %v7010_v5 = vsel %vm2680_vm1, 3.0, %v6823_v16 }
 0xb61   :  { %2734 = vmin.xlane.f32.xlu0 %v7010_v5 }
 0xb66   :  { %v2657_v6 = vpop.xlane.xlu0 %2656 }
 0xb67   :  { %vm2681_vm4 = vcmp.eq.f32.partialorder %v7993_v24, %v2657_v6 }
 0xb68   :  { %v7015_v54 = vsel %vm2681_vm4, 1.0, %v6831_v43  ;;  %v7018_v22 = vsel %vm2681_vm4, 3.0, %v6834_v56 }
 0xb69   :  { %2736 = vmin.xlane.f32.xlu1 %v7018_v22 }
 0xb6e   :  { %v2659_v32 = vpop.xlane.xlu1 %2658 }
 0xb6f   :  { %vm2682_vm5 = vcmp.eq.f32.partialorder %v7993_v24, %v2659_v32 }
 0xb70   :  { %v7023_v28 = vsel %vm2682_vm5, 1.0, %v6842_v36  ;;  %v7026_v16 = vsel %vm2682_vm5, 3.0, %v6845_v23 }
 0xb71   :  { %2738 = vmin.xlane.f32.xlu2 %v7026_v16 }
 0xb76   :  { %v2661_v3 = vpop.xlane.xlu2 %2660 }
 0xb77   :  { %vm2683_vm9 = vcmp.eq.f32.partialorder %v7993_v24, %v2661_v3 }
 0xb78   :  { %v7031_v43 = vsel %vm2683_vm9, 1.0, %v6853_v9  ;;  %v7034_v56 = vsel %vm2683_vm9, 3.0, %v6856_v58 }
 0xb79   :  { %2740 = vmin.xlane.f32.xlu0 %v7034_v56 }
 0xb7e   :  { %v2663_v1 = vpop.xlane.xlu0 %2662 }
 0xb7f   :  { %vm2684_vm6 = vcmp.eq.f32.partialorder %v7993_v24, %v2663_v1 }
 0xb80   :  { %v7039_v36 = vsel %vm2684_vm6, 1.0, %v6864_v44  ;;  %v7042_v23 = vsel %vm2684_vm6, 3.0, %v6867_v52 }
 0xb81   :  { %2742 = vmin.xlane.f32.xlu1 %v7042_v23 }
 0xb86   :  { %v2665_v50 = vpop.xlane.xlu1 %2664 }
 0xb87   :  { %vm2685_vm11 = vcmp.eq.f32.partialorder %v7993_v24, %v2665_v50 }
 0xb88   :  { %v7047_v9 = vsel %vm2685_vm11, 1.0, %v6875_v30  ;;  %v7050_v58 = vsel %vm2685_vm11, 3.0, %v6878_v18 }
 0xb89   :  { %2744 = vmin.xlane.f32.xlu2 %v7050_v58 }
 0xb8e   :  { %v2667_v42 = vpop.xlane.xlu2 %2666 }
 0xb8f   :  { %vm2686_vm7 = vcmp.eq.f32.partialorder %v7993_v24, %v2667_v42 }
 0xb90   :  { %v7055_v44 = vsel %vm2686_vm7, 1.0, %v6886_v55  ;;  %v7058_v52 = vsel %vm2686_vm7, 3.0, %v6889_v49 }
 0xb91   :  { %2746 = vmin.xlane.f32.xlu0 %v7058_v52 }
 0xb96   :  { %v2669_v12 = vpop.xlane.xlu0 %2668 }
 0xb97   :  { %vm2687_vm8 = vcmp.eq.f32.partialorder %v7993_v24, %v2669_v12 }
 0xb98   :  { %v7063_v30 = vsel %vm2687_vm8, 1.0, %v6897_v37  ;;  %v7066_v18 = vsel %vm2687_vm8, 3.0, %v6900_v2 }
 0xb99   :  { %2748 = vmin.xlane.f32.xlu1 %v7066_v18 }
 0xb9e   :  { %v2671_v29 = vpop.xlane.xlu1 %2670 }
 0xb9f   :  { %vm2688_vm10 = vcmp.eq.f32.partialorder %v7993_v24, %v2671_v29 }
 0xba0   :  { %v7071_v55 = vsel %vm2688_vm10, 1.0, %v6908_v48  ;;  %v7074_v49 = vsel %vm2688_vm10, 3.0, %v6911_v61 }
 0xba1   :  { %2750 = vmin.xlane.f32.xlu2 %v7074_v49 }
 0xba6   :  { %v2673_v21 = vpop.xlane.xlu2 %2672 }
 0xba7   :  { %vm2689_vm12 = vcmp.eq.f32.partialorder %v7993_v24, %v2673_v21  ;;  %v2723_v37 = vpop.xlane.xlu0 %2722 }
 0xba8   :  { %v7079_v2 = vsel %vm2689_vm12, 1.0, %v6920_v47  ;;  %v7082_v53 = vsel %vm2689_vm12, 3.0, %v6923_v19  ;;  %vm2754_vm13 = vcmp.eq.f32.partialorder %v6962_v20, %v2723_v37 }
 0xba9   :  { %v2770_v48 = vsel %vm2754_vm13, %v7993_v24, 128.0  ;;  %2752 = vmin.xlane.f32.xlu0 %v7082_v53 }
 0xbaa   :  { %2786 = vmin.xlane.f32.xlu1 %v2770_v48 }
 0xbae   :  { %v2725_v61 = vpop.xlane.xlu1 %2724 }
 0xbaf   :  { %vm2755_vm3 = vcmp.eq.f32.partialorder %v6970_v62, %v2725_v61 }
 0xbb0   :  { %v2771_v51 = vsel %vm2755_vm3, %v7993_v24, 128.0 }
 0xbb1   :  { %2788 = vmin.xlane.f32.xlu2 %v2771_v51 }
 0xbb4   :  { %v2727_v26 = vpop.xlane.xlu2 %2726 }
 0xbb5   :  { %vm2756_vm14 = vcmp.eq.f32.partialorder %v6978_v33, %v2727_v26 }
 0xbb6   :  { %v2772_v47 = vsel %vm2756_vm14, %v7993_v24, 128.0 }
 0xbb7   :  { %2790 = vmin.xlane.f32.xlu0 %v2772_v47 }
 0xbbc   :  { %v2729_v19 = vpop.xlane.xlu0 %2728 }
 0xbbd   :  { %vm2757_vm15 = vcmp.eq.f32.partialorder %v6986_v59, %v2729_v19 }
 0xbbe   :  { %v2773_v34 = vsel %vm2757_vm15, %v7993_v24, 128.0 }
 0xbbf   :  { %2792 = vmin.xlane.f32.xlu1 %v2773_v34 }
 0xbc4   :  { %v2731_v15 = vpop.xlane.xlu1 %2730 }
 0xbc5   :  { %vm2758_vm0 = vcmp.eq.f32.partialorder %v6994_v7, %v2731_v15 }
 0xbc6   :  { %v2774_v39 = vsel %vm2758_vm0, %v7993_v24, 128.0 }
 0xbc7   :  { %2794 = vmin.xlane.f32.xlu2 %v2774_v39 }
 0xbcc   :  { %v2733_v13 = vpop.xlane.xlu2 %2732 }
 0xbcd   :  { %vm2759_vm2 = vcmp.eq.f32.partialorder %v7002_v0, %v2733_v13 }
 0xbce   :  { %v2775_v40 = vsel %vm2759_vm2, %v7993_v24, 128.0 }
 0xbcf   :  { %2796 = vmin.xlane.f32.xlu0 %v2775_v40 }
 0xbd4   :  { %v2735_v17 = vpop.xlane.xlu0 %2734 }
 0xbd5   :  { %vm2760_vm1 = vcmp.eq.f32.partialorder %v7010_v5, %v2735_v17 }
 0xbd6   :  { %v2776_v38 = vsel %vm2760_vm1, %v7993_v24, 128.0 }
 0xbd7   :  { %2798 = vmin.xlane.f32.xlu1 %v2776_v38 }
 0xbdc   :  { %v2737_v20 = vpop.xlane.xlu1 %2736 }
 0xbdd   :  { %vm2761_vm4 = vcmp.eq.f32.partialorder %v7018_v22, %v2737_v20 }
 0xbde   :  { %v2777_v63 = vsel %vm2761_vm4, %v7993_v24, 128.0 }
 0xbdf   :  { %2800 = vmin.xlane.f32.xlu2 %v2777_v63 }
 0xbe4   :  { %v2739_v62 = vpop.xlane.xlu2 %2738 }
 0xbe5   :  { %vm2762_vm5 = vcmp.eq.f32.partialorder %v7026_v16, %v2739_v62 }
 0xbe6   :  { %v2778_v14 = vsel %vm2762_vm5, %v7993_v24, 128.0 }
 0xbe7   :  { %2802 = vmin.xlane.f32.xlu0 %v2778_v14 }
 0xbec   :  { %v2741_v33 = vpop.xlane.xlu0 %2740 }
 0xbed   :  { %vm2763_vm9 = vcmp.eq.f32.partialorder %v7034_v56, %v2741_v33 }
 0xbee   :  { %v2779_v4 = vsel %vm2763_vm9, %v7993_v24, 128.0 }
 0xbef   :  { %2804 = vmin.xlane.f32.xlu1 %v2779_v4 }
 0xbf4   :  { %v2743_v59 = vpop.xlane.xlu1 %2742 }
 0xbf5   :  { %vm2764_vm6 = vcmp.eq.f32.partialorder %v7042_v23, %v2743_v59 }
 0xbf6   :  { %v2780_v11 = vsel %vm2764_vm6, %v7993_v24, 128.0 }
 0xbf7   :  { %2806 = vmin.xlane.f32.xlu2 %v2780_v11 }
 0xbfc   :  { %v2745_v7 = vpop.xlane.xlu2 %2744 }
 0xbfd   :  { %vm2765_vm11 = vcmp.eq.f32.partialorder %v7050_v58, %v2745_v7 }
 0xbfe   :  { %v2781_v27 = vsel %vm2765_vm11, %v7993_v24, 128.0 }
 0xbff   :  { %2808 = vmin.xlane.f32.xlu0 %v2781_v27 }
 0xc04   :  { %v2747_v0 = vpop.xlane.xlu0 %2746 }
 0xc05   :  { %vm2766_vm7 = vcmp.eq.f32.partialorder %v7058_v52, %v2747_v0 }
 0xc06   :  { %v2782_v60 = vsel %vm2766_vm7, %v7993_v24, 128.0 }
 0xc07   :  { %2810 = vmin.xlane.f32.xlu1 %v2782_v60 }
 0xc0c   :  { %v2749_v5 = vpop.xlane.xlu1 %2748 }
 0xc0d   :  { %vm2767_vm8 = vcmp.eq.f32.partialorder %v7066_v18, %v2749_v5 }
 0xc0e   :  { %v2783_v6 = vsel %vm2767_vm8, %v7993_v24, 128.0 }
 0xc0f   :  { %2812 = vmin.xlane.f32.xlu2 %v2783_v6 }
 0xc14   :  { %v2751_v22 = vpop.xlane.xlu2 %2750 }
 0xc15   :  { %vm2768_vm10 = vcmp.eq.f32.partialorder %v7074_v49, %v2751_v22 }
 0xc16   :  { %v2784_v32 = vsel %vm2768_vm10, %v7993_v24, 128.0 }
 0xc17   :  { %2814 = vmin.xlane.f32.xlu0 %v2784_v32 }
 0xc1c   :  { %v2753_v16 = vpop.xlane.xlu0 %2752 }
 0xc1d   :  { %v2787_v3 = vpop.xlane.xlu1 %2786  ;;  %vm2769_vm12 = vcmp.eq.f32.partialorder %v7082_v53, %v2753_v16 }
 0xc1e   :  { %vm2818_vm13 = vcmp.eq.f32.partialorder %v7993_v24, %v2787_v3  ;;  %v2785_v56 = vsel %vm2769_vm12, %v7993_v24, 128.0 }
 0xc1f   :  { %v7119_v1 = vsel %vm2818_vm13, 1.0, %v6959_v57  ;;  %2816 = vmin.xlane.f32.xlu1 %v2785_v56 }
 0xc20   :  { %2850 = vadd.xlane.f32.xlu2 %v7119_v1 }
 0xc24   :  { %v2789_v23 = vpop.xlane.xlu2 %2788 }
 0xc25   :  { %vm2819_vm3 = vcmp.eq.f32.partialorder %v7993_v24, %v2789_v23 }
 0xc26   :  { %v7124_v50 = vsel %vm2819_vm3, 1.0, %v6967_v46 }
 0xc27   :  { %2852 = vadd.xlane.f32.xlu0 %v7124_v50 }
 0xc2a   :  { %v2791_v58 = vpop.xlane.xlu0 %2790 }
 0xc2b   :  { %vm2820_vm14 = vcmp.eq.f32.partialorder %v7993_v24, %v2791_v58 }
 0xc2c   :  { %v7129_v42 = vsel %vm2820_vm14, 1.0, %v6975_v41 }
 0xc2d   :  { %2854 = vadd.xlane.f32.xlu1 %v7129_v42 }
 0xc32   :  { %v2793_v57 = vpop.xlane.xlu1 %2792 }
 0xc33   :  { %vm2821_vm15 = vcmp.eq.f32.partialorder %v7993_v24, %v2793_v57 }
 0xc34   :  { %v7134_v52 = vsel %vm2821_vm15, 1.0, %v6983_v8 }
 0xc35   :  { %2856 = vadd.xlane.f32.xlu2 %v7134_v52 }
 0xc3a   :  { %v2795_v46 = vpop.xlane.xlu2 %2794 }
 0xc3b   :  { %vm2822_vm0 = vcmp.eq.f32.partialorder %v7993_v24, %v2795_v46 }
 0xc3c   :  { %v7139_v12 = vsel %vm2822_vm0, 1.0, %v6991_v35 }
 0xc3d   :  { %2858 = vadd.xlane.f32.xlu0 %v7139_v12 }
 0xc42   :  { %v2797_v41 = vpop.xlane.xlu0 %2796 }
 0xc43   :  { %vm2823_vm2 = vcmp.eq.f32.partialorder %v7993_v24, %v2797_v41 }
 0xc44   :  { %v7144_v18 = vsel %vm2823_vm2, 1.0, %v6999_v31 }
 0xc45   :  { %2860 = vadd.xlane.f32.xlu1 %v7144_v18 }
 0xc4a   :  { %v2799_v8 = vpop.xlane.xlu1 %2798 }
 0xc4b   :  { %vm2824_vm1 = vcmp.eq.f32.partialorder %v7993_v24, %v2799_v8 }
 0xc4c   :  { %v7149_v29 = vsel %vm2824_vm1, 1.0, %v7007_v10 }
 0xc4d   :  { %2862 = vadd.xlane.f32.xlu2 %v7149_v29 }
 0xc52   :  { %v2801_v35 = vpop.xlane.xlu2 %2800 }
 0xc53   :  { %vm2825_vm4 = vcmp.eq.f32.partialorder %v7993_v24, %v2801_v35 }
 0xc54   :  { %v7154_v49 = vsel %vm2825_vm4, 1.0, %v7015_v54 }
 0xc55   :  { %2864 = vadd.xlane.f32.xlu0 %v7154_v49 }
 0xc5a   :  { %v2803_v31 = vpop.xlane.xlu0 %2802 }
 0xc5b   :  { %vm2826_vm5 = vcmp.eq.f32.partialorder %v7993_v24, %v2803_v31 }
 0xc5c   :  { %v7159_v21 = vsel %vm2826_vm5, 1.0, %v7023_v28 }
 0xc5d   :  { %2866 = vadd.xlane.f32.xlu1 %v7159_v21 }
 0xc62   :  { %v2805_v10 = vpop.xlane.xlu1 %2804 }
 0xc63   :  { %vm2827_vm9 = vcmp.eq.f32.partialorder %v7993_v24, %v2805_v10 }
 0xc64   :  { %v7164_v37 = vsel %vm2827_vm9, 1.0, %v7031_v43  ;;  %v2898_v43 = vadd.f32 %v7124_v50, %v7119_v1 }
 0xc65   :  { %2868 = vadd.xlane.f32.xlu2 %v7164_v37 }
 0xc66   :  { %v2899_v51 = vadd.f32 %v2898_v43, %v7129_v42 }
 0xc68   :  { %v2900_v26 = vadd.f32 %v2899_v51, %v7134_v52 }
 0xc6a   :  { %v2807_v54 = vpop.xlane.xlu2 %2806 }
 0xc6b   :  { %vm2828_vm6 = vcmp.eq.f32.partialorder %v7993_v24, %v2807_v54 }
 0xc6c   :  { %v7169_v53 = vsel %vm2828_vm6, 1.0, %v7039_v36 }
 0xc6d   :  { %2870 = vadd.xlane.f32.xlu0 %v7169_v53 }
 0xc72   :  { %v2809_v28 = vpop.xlane.xlu0 %2808 }
 0xc73   :  { %vm2829_vm11 = vcmp.eq.f32.partialorder %v7993_v24, %v2809_v28 }
 0xc74   :  { %v7174_v48 = vsel %vm2829_vm11, 1.0, %v7047_v9  ;;  %v2901_v9 = vadd.f32 %v2900_v26, %v7139_v12 }
 0xc75   :  { %2872 = vadd.xlane.f32.xlu1 %v7174_v48 }
 0xc76   :  { %v2902_v47 = vadd.f32 %v2901_v9, %v7144_v18 }
 0xc78   :  { %v2903_v34 = vadd.f32 %v2902_v47, %v7149_v29 }
 0xc7a   :  { %v2811_v61 = vpop.xlane.xlu1 %2810  ;;  %v2904_v39 = vadd.f32 %v2903_v34, %v7154_v49 }
 0xc7b   :  { %vm2830_vm7 = vcmp.eq.f32.partialorder %v7993_v24, %v2811_v61 }
 0xc7c   :  { %v7182_v36 = vsel %vm2830_vm7, 1.0, %v7055_v44  ;;  %v2905_v44 = vadd.f32 %v2904_v39, %v7159_v21 }
 0xc7d   :  { %2874 = vadd.xlane.f32.xlu2 %v7182_v36 }
 0xc7e   :  { %v2906_v13 = vadd.f32 %v2905_v44, %v7164_v37 }
 0xc80   :  { %v2907_v17 = vadd.f32 %v2906_v13, %v7169_v53 }
 0xc82   :  { %v2813_v19 = vpop.xlane.xlu2 %2812  ;;  %v2908_v20 = vadd.f32 %v2907_v17, %v7174_v48 }
 0xc83   :  { %vm2831_vm8 = vcmp.eq.f32.partialorder %v7993_v24, %v2813_v19 }
 0xc84   :  { %v7191_v15 = vsel %vm2831_vm8, 1.0, %v7063_v30  ;;  %v2909_v30 = vadd.f32 %v2908_v20, %v7182_v36 }
 0xc85   :  { %2876 = vadd.xlane.f32.xlu0 %v7191_v15 }
 0xc86   :  { %v2910_v63 = vadd.f32 %v2909_v30, %v7191_v15 }
 0xc8a   :  { %v2815_v40 = vpop.xlane.xlu0 %2814 }
 0xc8b   :  { %vm2832_vm10 = vcmp.eq.f32.partialorder %v7993_v24, %v2815_v40 }
 0xc8c   :  { %v7200_v38 = vsel %vm2832_vm10, 1.0, %v7071_v55 }
 0xc8d   :  { %2878 = vadd.xlane.f32.xlu1 %v7200_v38  ;;  %v2911_v14 = vadd.f32 %v2910_v63, %v7200_v38 }
 0xc92   :  { %v2817_v62 = vpop.xlane.xlu1 %2816 }
 0xc93   :  { %v2851_v33 = vpop.xlane.xlu2 %2850  ;;  %vm2833_vm12 = vcmp.eq.f32.partialorder %v7993_v24, %v2817_v62 }
 0xc94   :  { %v2882_v4 = vmax.f32 %v2851_v33, 1.0  ;;  %v7209_v59 = vsel %vm2833_vm12, 1.0, %v7079_v2 }
 0xc95   :  { %v2912_v55 = vadd.f32 %v2911_v14, %v7209_v59  ;;  %2880 = vadd.xlane.f32.xlu2 %v7209_v59 }
 0xc96   :  { %4019 = vrsqrt.f32 %v2882_v4  ;;  %vm2926_vm3 = vweird.f32 %v2882_v4 }
 0xc97   :  { %v2913_v11 = vrot.slane %v2912_v55, 4 }
 0xc99   :  { %v2914_v7 = vadd.f32 %v2913_v11, %v2912_v55 }
 0xc9a   :  { %v2853_v27 = vpop.xlane.xlu0 %2852 }
 0xc9b   :  { %v2915_v0 = vrot.slane %v2914_v7, 2  ;;  %v2883_v60 = vmax.f32 %v2853_v27, 1.0 }
 0xc9c   :  { %v4020_v5 = vpop.eup %4019 }
 0xc9d   :  { %v2916_v6 = vadd.f32 %v2915_v0, %v2914_v7  ;;  %4021 = vrsqrt.f32 %v2883_v60  ;;  %v2921_v22 = vmul.f32 %v4020_v5, %v2882_v4  ;;  %vm2927_vm13 = vweird.f32 %v4020_v5 }
 0xc9e   :  { %vm2928_vm14 = vmor %vm2926_vm3, %vm2927_vm13  ;;  %vm2936_vm4 = vweird.f32 %v2883_v60 }
 0xc9f   :  { %v2917_v32 = vrot.slane %v2916_v6, 1  ;;  %v2922_v2 = vmul.f32 %v4020_v5, %v2921_v22 }
 0xca0   :  { %v2855_v24 = vpop.xlane.xlu1 %2854 }
 0xca1   :  { %v2918_v16 = vadd.f32 %v2917_v32, %v2916_v6  ;;  %v2884_v3 = vmax.f32 %v2855_v24, 1.0  ;;  %v2923_v58 = vmul.f32 0.5, %v2922_v2 }
 0xca3   :  { %v4022_v56 = vpop.eup %4021  ;;  %v2919_v23 = vmax.f32 %v2918_v16, 1.0  ;;  %4023 = vrsqrt.f32 %v2884_v3  ;;  %v2924_v35 = vsub.f32 1.5, %v2923_v58  ;;  %vm2946_vm6 = vweird.f32 %v2884_v3 }
 0xca4   :  { %v2931_v57 = vmul.f32 %v4022_v56, %v2883_v60  ;;  %vm2937_vm1 = vweird.f32 %v4022_v56 }
 0xca5   :  { %4025 = vrsqrt.f32 %v2919_v23  ;;  %v2925_v43 = vmul.f32 %v4020_v5, %v2924_v35  ;;  %vm3102_vm0 = vweird.f32 %v2919_v23  ;;  %vm2938_vm5 = vmor %vm2936_vm4, %vm2937_vm1 }
 0xca6   :  { %v2932_v31 = vmul.f32 %v4022_v56, %v2931_v57 }
 0xca7   :  { %v2929_v39 = vsel %vm2928_vm14, %v4020_v5, %v2925_v43 }
 0xca8   :  { %v2857_v46 = vpop.xlane.xlu2 %2856  ;;  %v2933_v51 = vmul.f32 0.5, %v2932_v31  ;;  %v3080_v30 = vmul.f32 %v2929_v39, %v7119_v1 }
 0xca9   :  { %v4024_v41 = vpop.eup %4023  ;;  %v7213_v8 = vmax.f32 %v2857_v46, 1.0 }
 0xcaa   :  { %v2941_v28 = vmul.f32 %v4024_v41, %v2884_v3  ;;  %v2934_v13 = vsub.f32 1.5, %v2933_v51  ;;  %vm2947_vm9 = vweird.f32 %v4024_v41 }
 0xcab   :  { %v4026_v10 = vpop.eup %4025  ;;  %4027 = vrsqrt.f32 %v7213_v8  ;;  %vm2948_vm11 = vmor %vm2946_vm6, %vm2947_vm9  ;;  %vm2956_vm8 = vweird.f32 %v7213_v8 }
 0xcac   :  { %v3097_v54 = vmul.f32 %v4026_v10, %v2919_v23  ;;  %v2942_v9 = vmul.f32 %v4024_v41, %v2941_v28  ;;  %vm3103_vm15 = vweird.f32 %v4026_v10  ;;  %v2935_v62 = vmul.f32 %v4022_v56, %v2934_v13 }
 0xcad   :  { %vm3104_vm2 = vmor %vm3102_vm0, %vm3103_vm15 }
 0xcae   :  { %v3098_v61 = vmul.f32 %v4026_v10, %v3097_v54  ;;  %v2943_v17 = vmul.f32 0.5, %v2942_v9  ;;  %v2939_v27 = vsel %vm2938_vm5, %v4022_v56, %v2935_v62 }
 0xcaf   :  { %v3081_v6 = vmul.f32 %v2939_v27, %v7124_v50 }
 0xcb0   :  { %v3099_v26 = vmul.f32 0.5, %v3098_v61  ;;  %v2859_v47 = vpop.xlane.xlu0 %2858  ;;  %v2944_v33 = vsub.f32 1.5, %v2943_v17 }
 0xcb1   :  { %v4028_v19 = vpop.eup %4027  ;;  %v7216_v34 = vmax.f32 %v2859_v47, 1.0 }
 0xcb2   :  { %v3100_v44 = vsub.f32 1.5, %v3099_v26  ;;  %v2951_v20 = vmul.f32 %v4028_v19, %v7213_v8  ;;  %v2945_v5 = vmul.f32 %v4024_v41, %v2944_v33  ;;  %vm2957_vm7 = vweird.f32 %v4028_v19 }
 0xcb3   :  { %4029 = vrsqrt.f32 %v7216_v34  ;;  %vm2958_vm10 = vmor %vm2956_vm8, %vm2957_vm7  ;;  %vm2966_vm13 = vweird.f32 %v7216_v34 }
 0xcb4   :  { %v3101_v40 = vmul.f32 %v4026_v10, %v3100_v44  ;;  %v2952_v4 = vmul.f32 %v4028_v19, %v2951_v20  ;;  %v2949_v16 = vsel %vm2948_vm11, %v4024_v41, %v2945_v5 }
 0xcb5   :  { %v3082_v56 = vmul.f32 %v2949_v16, %v7129_v42 }
 0xcb6   :  { %v7221_v63 = vsel %vm3104_vm2, %v4026_v10, %v3101_v40  ;;  %v2953_v1 = vmul.f32 0.5, %v2952_v4 }
 0xcb7   :  { %v7224_v14 = vmul.f32 %v7221_v63, %v3080_v30  ;;  %v7230_v60 = vmul.f32 %v7221_v63, %v3081_v6  ;;  %v7236_v3 = vmul.f32 %v7221_v63, %v3082_v56 }
 0xcb8   :  { %v2861_v55 = vpop.xlane.xlu1 %2860  ;;  %v2954_v22 = vsub.f32 1.5, %v2953_v1 }
 0xcb9   :  { %v4030_v11 = vpop.eup %4029  ;;  %v2887_v7 = vmax.f32 %v2861_v55, 1.0  ;;  %3138 = vmatmul.f32.vlgmr.msra.gmra.mxu1 %v7224_v14 }
 0xcba   :  { %v2961_v0 = vmul.f32 %v4030_v11, %v7216_v34  ;;  %v2955_v50 = vmul.f32 %v4028_v19, %v2954_v22  ;;  %vm2967_vm12 = vweird.f32 %v4030_v11 }
 0xcbb   :  { %4031 = vrsqrt.f32 %v2887_v7  ;;  %vm2968_vm3 = vmor %vm2966_vm13, %vm2967_vm12  ;;  %vm2976_vm15 = vweird.f32 %v2887_v7 }
 0xcbc   :  { %v2962_v32 = vmul.f32 %v4030_v11, %v2961_v0  ;;  %v2959_v31 = vsel %vm2958_vm10, %v4028_v19, %v2955_v50 }
 0xcbd   :  { %v3083_v42 = vmul.f32 %v2959_v31, %v7134_v52 }
 0xcbe   :  { %v2963_v58 = vmul.f32 0.5, %v2962_v32 }
 0xcbf   :  { %v7242_v8 = vmul.f32 %v7221_v63, %v3083_v42 }
 0xcc0   :  { %v2863_v24 = vpop.xlane.xlu2 %2862  ;;  %v2964_v46 = vsub.f32 1.5, %v2963_v58 }
 0xcc1   :  { %v4032_v2 = vpop.eup %4031  ;;  %v2888_v23 = vmax.f32 %v2863_v24, 1.0  ;;  %3141 = vmatmul.f32.gmra.mxu1 %v7230_v60 }
 0xcc2   :  { %v2971_v57 = vmul.f32 %v4032_v2, %v2887_v7  ;;  %v2965_v28 = vmul.f32 %v4030_v11, %v2964_v46  ;;  %vm2977_vm14 = vweird.f32 %v4032_v2 }
 0xcc3   :  { %4033 = vrsqrt.f32 %v2888_v23  ;;  %vm2978_vm0 = vmor %vm2976_vm15, %vm2977_vm14  ;;  %vm2986_vm1 = vweird.f32 %v2888_v23 }
 0xcc4   :  { %v2972_v35 = vmul.f32 %v4032_v2, %v2971_v57  ;;  %v2969_v47 = vsel %vm2968_vm3, %v4030_v11, %v2965_v28 }
 0xcc5   :  { %v3084_v52 = vmul.f32 %v2969_v47, %v7139_v12 }
 0xcc6   :  { %v2973_v43 = vmul.f32 0.5, %v2972_v35 }
 0xcc7   :  { %v7247_v34 = vmul.f32 %v7221_v63, %v3084_v52 }
 0xcc8   :  { %v2865_v41 = vpop.xlane.xlu0 %2864  ;;  %v2974_v51 = vsub.f32 1.5, %v2973_v43 }
 0xcc9   :  { %v4034_v10 = vpop.eup %4033  ;;  %v2889_v54 = vmax.f32 %v2865_v41, 1.0  ;;  %3144 = vmatmul.f32.gmra.mxu1 %v7236_v3 }
 0xcca   :  { %v2981_v61 = vmul.f32 %v4034_v10, %v2888_v23  ;;  %v2975_v44 = vmul.f32 %v4032_v2, %v2974_v51  ;;  %vm2987_vm2 = vweird.f32 %v4034_v10 }
 0xccb   :  { %4035 = vrsqrt.f32 %v2889_v54  ;;  %vm2988_vm4 = vmor %vm2986_vm1, %vm2987_vm2  ;;  %vm2996_vm9 = vweird.f32 %v2889_v54 }
 0xccc   :  { %v2982_v26 = vmul.f32 %v4034_v10, %v2981_v61  ;;  %v2979_v62 = vsel %vm2978_vm0, %v4032_v2, %v2975_v44 }
 0xccd   :  { %v3085_v12 = vmul.f32 %v2979_v62, %v7144_v18 }
 0xcce   :  { %v2983_v13 = vmul.f32 0.5, %v2982_v26 }
 0xccf   :  { %v7252_v7 = vmul.f32 %v7221_v63, %v3085_v12 }
 0xcd0   :  { %v2867_v9 = vpop.xlane.xlu1 %2866  ;;  %v2984_v17 = vsub.f32 1.5, %v2983_v13 }
 0xcd1   :  { %v4036_v19 = vpop.eup %4035  ;;  %v2890_v39 = vmax.f32 %v2867_v9, 1.0  ;;  %3147 = vmatmul.f32.gmra.mxu1 %v7242_v8 }
 0xcd2   :  { %v2991_v40 = vmul.f32 %v4036_v19, %v2889_v54  ;;  %v2985_v55 = vmul.f32 %v4034_v10, %v2984_v17  ;;  %vm2997_vm5 = vweird.f32 %v4036_v19 }
 0xcd3   :  { %4037 = vrsqrt.f32 %v2890_v39  ;;  %vm2998_vm6 = vmor %vm2996_vm9, %vm2997_vm5  ;;  %vm3006_vm7 = vweird.f32 %v2890_v39 }
 0xcd4   :  { %v2992_v20 = vmul.f32 %v4036_v19, %v2991_v40  ;;  %v2989_v6 = vsel %vm2988_vm4, %v4034_v10, %v2985_v55 }
 0xcd5   :  { %v3086_v18 = vmul.f32 %v2989_v6, %v7149_v29 }
 0xcd6   :  { %v2993_v11 = vmul.f32 0.5, %v2992_v20 }
 0xcd7   :  { %v7260_v23 = vmul.f32 %v7221_v63, %v3086_v18 }
 0xcd8   :  { %v2869_v30 = vpop.xlane.xlu2 %2868  ;;  %v2994_v1 = vsub.f32 1.5, %v2993_v11  ;;  %v3199_v11 = vld [vmem:[%s7850_s7 + $0x60] sm:$0xff] }
 0xcd9   :  { %v4038_v33 = vpop.eup %4037  ;;  %v2891_v4 = vmax.f32 %v2869_v30, 1.0  ;;  %3150 = vmatmul.f32.gmra.mxu1 %v7247_v34  ;;  %v3201_v30 = vld [vmem:[%s7850_s7 + $0x70] sm:$0xff] }
 0xcda   :  { %v3001_v27 = vmul.f32 %v4038_v33, %v2890_v39  ;;  %v2995_v24 = vmul.f32 %v4036_v19, %v2994_v1  ;;  %vm3007_vm11 = vweird.f32 %v4038_v33 }
 0xcdb   :  { %4039 = vrsqrt.f32 %v2891_v4  ;;  %vm3008_vm8 = vmor %vm3006_vm7, %vm3007_vm11  ;;  %vm3016_vm12 = vweird.f32 %v2891_v4 }
 0xcdc   :  { %v3002_v0 = vmul.f32 %v4038_v33, %v3001_v27  ;;  %v2999_v50 = vsel %vm2998_vm6, %v4036_v19, %v2995_v24  ;;  %v3198_v27 = vld [vmem:[%s7850_s7 + $0x58] sm:$0xff] }
 0xcdd   :  { %v3087_v29 = vmul.f32 %v2999_v50, %v7154_v49  ;;  %v3194_v50 = vld [vmem:[%s7850_s7 + $0x38] sm:$0xff] }
 0xcde   :  { %v3003_v16 = vmul.f32 0.5, %v3002_v0 }
 0xcdf   :  { %v7272_v54 = vmul.f32 %v7221_v63, %v3087_v29 }
 0xce0   :  { %v2871_v5 = vpop.xlane.xlu0 %2870  ;;  %v3004_v56 = vsub.f32 1.5, %v3003_v16  ;;  %v3196_v16 = vld [vmem:[%s7850_s7 + $0x48] sm:$0xff] }
 0xce1   :  { %v4040_v22 = vpop.eup %4039  ;;  %v7254_v32 = vmax.f32 %v2871_v5, 1.0  ;;  %3153 = vmatmul.f32.gmra.mxu1 %v7252_v7 }
 0xce2   :  { %v3011_v2 = vmul.f32 %v4040_v22, %v2891_v4  ;;  %v3005_v41 = vmul.f32 %v4038_v33, %v3004_v56  ;;  %vm3017_vm10 = vweird.f32 %v4040_v22 }
 0xce3   :  { %4041 = vrsqrt.f32 %v7254_v32  ;;  %vm3018_vm13 = vmor %vm3016_vm12, %vm3017_vm10  ;;  %vm3026_vm14 = vweird.f32 %v7254_v32 }
 0xce4   :  { %v3012_v58 = vmul.f32 %v4040_v22, %v3011_v2  ;;  %v3009_v61 = vsel %vm3008_vm8, %v4038_v33, %v3005_v41  ;;  %v3200_v33 = vld [vmem:[%s7850_s7 + $0x68] sm:$0xff] }
 0xce5   :  { %v3088_v49 = vmul.f32 %v3009_v61, %v7159_v21  ;;  %v3202_v21 = vld [vmem:[%s7850_s7 + $0x78] sm:$0xff] }
 0xce6   :  { %v3013_v31 = vmul.f32 0.5, %v3012_v58  ;;  %3207 = vmatpush.msrb.mxu0 %v3202_v21  ;;  %v3188_v21 = vld [vmem:[%s7850_s7 + $0x8] sm:$0xff] }
 0xce7   :  { %v7285_v39 = vmul.f32 %v7221_v63, %v3088_v49 }
 0xce8   :  { %v2873_v57 = vpop.xlane.xlu1 %2872  ;;  %v3014_v42 = vsub.f32 1.5, %v3013_v31  ;;  %3208 = vmatpush.msrb.mxu0 %v3201_v30 }
 0xce9   :  { %v7262_v46 = vpop.eup %4041  ;;  %v7264_v35 = vmax.f32 %v2873_v57, 1.0  ;;  %3156 = vmatmul.f32.gmra.mxu1 %v7260_v23  ;;  %v3195_v57 = vld [vmem:[%s7850_s7 + $0x40] sm:$0xff] }
 0xcea   :  { %v3021_v10 = vmul.f32 %v7262_v46, %v7254_v32  ;;  %v3015_v9 = vmul.f32 %v4040_v22, %v3014_v42  ;;  %vm3027_vm3 = vweird.f32 %v7262_v46  ;;  %3209 = vmatpush.msrb.mxu0 %v3200_v33  ;;  %v3197_v32 = vld [vmem:[%s7850_s7 + $0x50] sm:$0xff]  ;;  %v3187_v33 = vld [vmem:[%s7850_s7] sm:$0xff] }
 0xceb   :  { %4043 = vrsqrt.f32 %v7264_v35  ;;  %vm3028_vm15 = vmor %vm3026_vm14, %vm3027_vm3  ;;  %vm3036_vm2 = vweird.f32 %v7264_v35 }
 0xcec   :  { %v3022_v28 = vmul.f32 %v7262_v46, %v3021_v10  ;;  %v3019_v40 = vsel %vm3018_vm13, %v4040_v22, %v3015_v9  ;;  %3210 = vmatpush.msrb.mxu0 %v3199_v11  ;;  %v3191_v9 = vld [vmem:[%s7850_s7 + $0x20] sm:$0xff] }
 0xced   :  { %v3089_v62 = vmul.f32 %v3019_v40, %v7164_v37 }
 0xcee   :  { %v3023_v47 = vmul.f32 0.5, %v3022_v28  ;;  %3211 = vmatpush.msrb.mxu0 %v3198_v27 }
 0xcef   :  { %v7313_v37 = vmul.f32 %v7221_v63, %v3089_v62 }
 0xcf0   :  { %v2875_v43 = vpop.xlane.xlu2 %2874  ;;  %v3024_v52 = vsub.f32 1.5, %v3023_v47  ;;  %3212 = vmatpush.msrb.mxu0 %v3197_v32  ;;  %v3190_v47 = vld [vmem:[%s7850_s7 + $0x18] sm:$0xff] }
 0xcf1   :  { %v7275_v51 = vpop.eup %4043  ;;  %v7277_v26 = vmax.f32 %v2875_v43, 1.0  ;;  %3159 = vmatmul.f32.gmra.mxu1 %v7272_v54  ;;  %v3192_v43 = vld [vmem:[%s7850_s7 + $0x28] sm:$0xff] }
 0xcf2   :  { %v3031_v19 = vmul.f32 %v7275_v51, %v7264_v35  ;;  %v3025_v4 = vmul.f32 %v7262_v46, %v3024_v52  ;;  %vm3037_vm0 = vweird.f32 %v7275_v51  ;;  %3213 = vmatpush.msrb.mxu0 %v3196_v16  ;;  %v3193_v35 = vld [vmem:[%s7850_s7 + $0x30] sm:$0xff] }
 0xcf3   :  { %4045 = vrsqrt.f32 %v7277_v26  ;;  %vm3038_vm1 = vmor %vm3036_vm2, %vm3037_vm0  ;;  %vm3046_vm5 = vweird.f32 %v7277_v26 }
 0xcf4   :  { %v3032_v44 = vmul.f32 %v7275_v51, %v3031_v19  ;;  %v3029_v6 = vsel %vm3028_vm15, %v7262_v46, %v3025_v4  ;;  %3214 = vmatpush.msrb.mxu0 %v3195_v57 }
 0xcf5   :  { %v3090_v24 = vmul.f32 %v3029_v6, %v7169_v53 }
 0xcf6   :  { %v3033_v12 = vmul.f32 0.5, %v3032_v44  ;;  %3215 = vmatpush.msrb.mxu0 %v3194_v50 }
 0xcf7   :  { %v7342_v53 = vmul.f32 %v7221_v63, %v3090_v24 }
 0xcf8   :  { %v2877_v13 = vpop.xlane.xlu0 %2876  ;;  %v3034_v1 = vsub.f32 1.5, %v3033_v12  ;;  %3216 = vmatpush.msrb.mxu0 %v3193_v35 }
 0xcf9   :  { %v7288_v17 = vpop.eup %4045  ;;  %v7290_v20 = vmax.f32 %v2877_v13, 1.0  ;;  %3162 = vmatmul.f32.gmra.mxu1 %v7285_v39 }
 0xcfa   :  { %v3041_v55 = vmul.f32 %v7288_v17, %v7277_v26  ;;  %v3035_v2 = vmul.f32 %v7275_v51, %v3034_v1  ;;  %vm3047_vm4 = vweird.f32 %v7288_v17  ;;  %3217 = vmatpush.msrb.mxu0 %v3192_v43  ;;  %v3189_v26 = vld [vmem:[%s7850_s7 + $0x10] sm:$0xff] }
 0xcfb   :  { %4047 = vrsqrt.f32 %v7290_v20  ;;  %vm3048_vm9 = vmor %vm3046_vm5, %vm3047_vm4  ;;  %vm3056_vm11 = vweird.f32 %v7290_v20 }
 0xcfc   :  { %v3042_v0 = vmul.f32 %v7288_v17, %v3041_v55  ;;  %v3039_v31 = vsel %vm3038_vm1, %v7275_v51, %v3035_v2  ;;  %3218 = vmatpush.msrb.mxu0 %v3191_v9 }
 0xcfd   :  { %v3091_v28 = vmul.f32 %v3039_v31, %v7174_v48 }
 0xcfe   :  { %v3043_v56 = vmul.f32 0.5, %v3042_v0  ;;  %3219 = vmatpush.msrb.mxu0 %v3190_v47 }
 0xcff   :  { %v7365_v48 = vmul.f32 %v7221_v63, %v3091_v28 }
 0xd00   :  { %v2879_v5 = vpop.xlane.xlu1 %2878  ;;  %v3044_v46 = vsub.f32 1.5, %v3043_v56  ;;  %3220 = vmatpush.msrb.mxu0 %v3189_v26 }
 0xd01   :  { %v7320_v22 = vpop.eup %4047  ;;  %v7322_v18 = vmax.f32 %v2879_v5, 1.0  ;;  %3165 = vmatmul.f32.gmra.mxu1 %v7313_v37 }
 0xd02   :  { %v3051_v58 = vmul.f32 %v7320_v22, %v7290_v20  ;;  %v3045_v61 = vmul.f32 %v7288_v17, %v3044_v46  ;;  %vm3057_vm6 = vweird.f32 %v7320_v22  ;;  %3221 = vmatpush.msrb.mxu0 %v3188_v21 }
 0xd03   :  { %4049 = vrsqrt.f32 %v7322_v18  ;;  %vm3058_vm7 = vmor %vm3056_vm11, %vm3057_vm6  ;;  %vm3066_vm10 = vweird.f32 %v7322_v18 }
 0xd04   :  { %v3052_v29 = vmul.f32 %v7320_v22, %v3051_v58  ;;  %v3049_v44 = vsel %vm3048_vm9, %v7288_v17, %v3045_v61  ;;  %3222 = vmatpush.msrb.mxu0 %v3187_v33 }
 0xd05   :  { %v3092_v40 = vmul.f32 %v3049_v44, %v7182_v36 }
 0xd06   :  { %v3053_v51 = vmul.f32 0.5, %v3052_v29 }
 0xd07   :  { %v7386_v36 = vmul.f32 %v7221_v63, %v3092_v40 }
 0xd08   :  { %v2881_v41 = vpop.xlane.xlu2 %2880  ;;  %v3054_v19 = vsub.f32 1.5, %v3053_v51 }
 0xd09   :  { %v4050_v10 = vpop.eup %4049  ;;  %v2897_v42 = vmax.f32 %v2881_v41, 1.0  ;;  %3168 = vmatmul.f32.gmra.mxu1 %v7342_v53 }
 0xd0a   :  { %v3061_v49 = vmul.f32 %v4050_v10, %v7322_v18  ;;  %v3055_v30 = vmul.f32 %v7320_v22, %v3054_v19  ;;  %vm3067_vm8 = vweird.f32 %v4050_v10 }
 0xd0b   :  { %4051 = vrsqrt.f32 %v2897_v42  ;;  %vm3068_vm12 = vmor %vm3066_vm10, %vm3067_vm8  ;;  %vm3076_vm3 = vweird.f32 %v2897_v42 }
 0xd0c   :  { %v3062_v52 = vmul.f32 %v4050_v10, %v3061_v49  ;;  %v3059_v55 = vsel %vm3058_vm7, %v7320_v22, %v3055_v30 }
 0xd0d   :  { %v3093_v11 = vmul.f32 %v3059_v55, %v7191_v15 }
 0xd0e   :  { %v3063_v17 = vmul.f32 0.5, %v3062_v52 }
 0xd0f   :  { %v7393_v1 = vmul.f32 %v7221_v63, %v3093_v11 }
 0xd10   :  { %v3064_v4 = vsub.f32 1.5, %v3063_v17  ;;  %v3851_v17 = vld [vmem:[%s7851_s8] ss:$0 sm:$0xff]  ;;  %s4221_s8 = smov [#allocation3]  }
 0xd11   :  { %v4052_v13 = vpop.eup %4051  ;;  %3171 = vmatmul.f32.gmra.mxu1 %v7365_v48  ;;  %s3734_s4 = sshll.u32 %s4221_s8, 4  ;;  %s3735_s4 = int_to_ptr.vmem [resolvable:$true] %s3734_s4 }
 0xd12   :  { %v3071_v62 = vmul.f32 %v4052_v13, %v2897_v42  ;;  %v3065_v27 = vmul.f32 %v4050_v10, %v3064_v4  ;;  %vm3077_vm13 = vweird.f32 %v4052_v13 }
 0xd13   :  { %vm3078_vm14 = vmor %vm3076_vm3, %vm3077_vm13 }
 0xd14   :  { %v3072_v12 = vmul.f32 %v4052_v13, %v3071_v62  ;;  %v3069_v5 = vsel %vm3068_vm12, %v4050_v10, %v3065_v27 }
 0xd15   :  { %v3094_v6 = vmul.f32 %v3069_v5, %v7200_v38 }
 0xd16   :  { %v3073_v20 = vmul.f32 0.5, %v3072_v12 }
 0xd17   :  { %v7398_v15 = vmul.f32 %v7221_v63, %v3094_v6 }
 0xd18   :  { %v3074_v0 = vsub.f32 1.5, %v3073_v20 }
 0xd19   :  { %3174 = vmatmul.f32.gmra.mxu1 %v7386_v36 }
 0xd1a   :  { %v3075_v22 = vmul.f32 %v4052_v13, %v3074_v0 }
 0xd1c   :  { %v3079_v32 = vsel %vm3078_vm14, %v4052_v13, %v3075_v22 }
 0xd1d   :  { %v3095_v18 = vmul.f32 %v3079_v32, %v7209_v59 }
 0xd1f   :  { %v7403_v24 = vmul.f32 %v7221_v63, %v3095_v18 }
 0xd21   :  { %3177 = vmatmul.f32.gmra.mxu1 %v7393_v1 }
 0xd29   :  { %3180 = vmatmul.f32.gmra.mxu1 %v7398_v15 }
 0xd31   :  { %3183 = vmatmul.f32.gmra.mxu1 %v7403_v24 }
 0xd36   :  { %v3139_v16 = vpop.f32.mrf.mxu1 }
 0xd37   :  { %3223 = vmatmul.f32.vlgmr.msrb.gmra.mxu0 %v3139_v16 }
 0xd3e   :  { %v3142_v38 = vpop.f32.mrf.mxu1 }
 0xd3f   :  { %3226 = vmatmul.f32.gmra.mxu0 %v3142_v38 }
 0xd46   :  { %v3145_v2 = vpop.f32.mrf.mxu1 }
 0xd47   :  { %3229 = vmatmul.f32.gmra.mxu0 %v3145_v2 }
 0xd4e   :  { %v3148_v56 = vpop.f32.mrf.mxu1 }
 0xd4f   :  { %3232 = vmatmul.f32.gmra.mxu0 %v3148_v56 }
 0xd56   :  { %v3151_v58 = vpop.f32.mrf.mxu1 }
 0xd57   :  { %3235 = vmatmul.f32.gmra.mxu0 %v3151_v58 }
 0xd5e   :  { %v3154_v57 = vpop.f32.mrf.mxu1 }
 0xd5f   :  { %3238 = vmatmul.f32.gmra.mxu0 %v3154_v57 }
 0xd66   :  { %v3157_v50 = vpop.f32.mrf.mxu1 }
 0xd67   :  { %3241 = vmatmul.f32.gmra.mxu0 %v3157_v50 }
 0xd6e   :  { %v3160_v59 = vpop.f32.mrf.mxu1 }
 0xd6f   :  { %3244 = vmatmul.f32.gmra.mxu0 %v3160_v59 }
 0xd76   :  { %v3163_v63 = vpop.f32.mrf.mxu1 }
 0xd77   :  { %3247 = vmatmul.f32.gmra.mxu0 %v3163_v63 }
 0xd7e   :  { %v3166_v46 = vpop.f32.mrf.mxu1 }
 0xd7f   :  { %3250 = vmatmul.f32.gmra.mxu0 %v3166_v46 }
 0xd86   :  { %v3169_v29 = vpop.f32.mrf.mxu1 }
 0xd87   :  { %3253 = vmatmul.f32.gmra.mxu0 %v3169_v29 }
 0xd8e   :  { %v3172_v41 = vpop.f32.mrf.mxu1 }
 0xd8f   :  { %3256 = vmatmul.f32.gmra.mxu0 %v3172_v41 }
 0xd96   :  { %v3175_v31 = vpop.f32.mrf.mxu1 }
 0xd97   :  { %3259 = vmatmul.f32.gmra.mxu0 %v3175_v31 }
 0xd9e   :  { %v3178_v10 = vpop.f32.mrf.mxu1 }
 0xd9f   :  { %3262 = vmatmul.f32.gmra.mxu0 %v3178_v10 }
 0xda6   :  { %v3181_v42 = vpop.f32.mrf.mxu1 }
 0xda7   :  { %3265 = vmatmul.f32.gmra.mxu0 %v3181_v42 }
 0xdae   :  { %v3184_v35 = vpop.f32.mrf.mxu1 }
 0xdaf   :  { %3268 = vmatmul.f32.gmra.mxu0 %v3184_v35 }
 0xdb4   :  { %v3224_v28 = vpop.f32.mrf.mxu0 }
 0xdb5   :  { %v3225_v35 = vadd.f32 %v3851_v17, %v3224_v28  ;;  %v3357_v28 = vld [vmem:[%s7852_s9 + $0x20] sm:$0xff] }
 0xdbc   :  { %v3227_v43 = vpop.f32.mrf.mxu0 }
 0xdbd   :  { %v3228_v10 = vadd.f32 %v3851_v17, %v3227_v43  ;;  %v3356_v43 = vld [vmem:[%s7852_s9 + $0x18] sm:$0xff] }
 0xdc4   :  { %v3230_v61 = vpop.f32.mrf.mxu0 }
 0xdc5   :  { %v3231_v41 = vadd.f32 %v3851_v17, %v3230_v61  ;;  %v3355_v61 = vld [vmem:[%s7852_s9 + $0x10] sm:$0xff] }
 0xdcc   :  { %v3233_v51 = vpop.f32.mrf.mxu0 }
 0xdcd   :  { %v3234_v46 = vadd.f32 %v3851_v17, %v3233_v51  ;;  %v3353_v51 = vld [vmem:[%s7852_s9] sm:$0xff] }
 0xdcf   :  { %v3275_v42 = vmax.f32 %v3234_v46, 0.0 }
 0xdd4   :  { %v3236_v49 = vpop.f32.mrf.mxu0 }
 0xdd5   :  { %v3237_v59 = vadd.f32 %v3851_v17, %v3236_v49 }
 0xdd7   :  { %v3276_v31 = vmax.f32 %v3237_v59, 0.0 }
 0xddc   :  { %v3239_v9 = vpop.f32.mrf.mxu0 }
 0xddd   :  { %v3240_v57 = vadd.f32 %v3851_v17, %v3239_v9  ;;  %v3272_v9 = vmax.f32 %v3225_v35, 0.0 }
 0xddf   :  { %v3277_v29 = vmax.f32 %v3240_v57, 0.0 }
 0xde4   :  { %v3242_v47 = vpop.f32.mrf.mxu0 }
 0xde5   :  { %v3243_v56 = vadd.f32 %v3851_v17, %v3242_v47  ;;  %v3273_v47 = vmax.f32 %v3228_v10, 0.0 }
 0xde7   :  { %v3278_v63 = vmax.f32 %v3243_v56, 0.0 }
 0xdec   :  { %v3245_v19 = vpop.f32.mrf.mxu0 }
 0xded   :  { %v3246_v38 = vadd.f32 %v3851_v17, %v3245_v19  ;;  %v3274_v19 = vmax.f32 %v3231_v41, 0.0 }
 0xdef   :  { %v3279_v50 = vmax.f32 %v3246_v38, 0.0 }
 0xdf4   :  { %v3248_v52 = vpop.f32.mrf.mxu0 }
 0xdf5   :  { %v3249_v18 = vadd.f32 %v3851_v17, %v3248_v52 }
 0xdf7   :  { %v3280_v58 = vmax.f32 %v3249_v18, 0.0 }
 0xdfc   :  { %v3251_v44 = vpop.f32.mrf.mxu0 }
 0xdfd   :  { %v3252_v22 = vadd.f32 %v3851_v17, %v3251_v44 }
 0xdff   :  { %v3281_v2 = vmax.f32 %v3252_v22, 0.0 }
 0xe04   :  { %v3254_v13 = vpop.f32.mrf.mxu0 }
 0xe05   :  { %v3255_v5 = vadd.f32 %v3851_v17, %v3254_v13 }
 0xe07   :  { %v3282_v16 = vmax.f32 %v3255_v5, 0.0 }
 0xe0c   :  { %v3257_v26 = vpop.f32.mrf.mxu0 }
 0xe0d   :  { %v3258_v20 = vadd.f32 %v3851_v17, %v3257_v26 }
 0xe0f   :  { %v3283_v32 = vmax.f32 %v3258_v20, 0.0 }
 0xe14   :  { %v3260_v40 = vpop.f32.mrf.mxu0 }
 0xe15   :  { %v3261_v11 = vadd.f32 %v3851_v17, %v3260_v40 }
 0xe17   :  { %v3284_v6 = vmax.f32 %v3261_v11, 0.0 }
 0xe1c   :  { %v3263_v21 = vpop.f32.mrf.mxu0 }
 0xe1d   :  { %v3264_v12 = vadd.f32 %v3851_v17, %v3263_v21 }
 0xe1f   :  { %v3285_v0 = vmax.f32 %v3264_v12, 0.0 }
 0xe24   :  { %v3266_v30 = vpop.f32.mrf.mxu0 }
 0xe25   :  { %v3267_v33 = vadd.f32 %v3851_v17, %v3266_v30 }
 0xe27   :  { %v3286_v27 = vmax.f32 %v3267_v33, 0.0 }
 0xe2c   :  { %v3269_v62 = vpop.f32.mrf.mxu0 }
 0xe2d   :  { %v3270_v4 = vadd.f32 %v3851_v17, %v3269_v62 }
 0xe2f   :  { %v3287_v55 = vmax.f32 %v3270_v4, 0.0 }
 0xe31   :  { %3288 = vmatpush.msra.mxu2 %v3287_v55 }
 0xe33   :  { %3289 = vmatpush.msra.mxu2 %v3286_v27 }
 0xe35   :  { %3290 = vmatpush.msra.mxu2 %v3285_v0 }
 0xe37   :  { %3291 = vmatpush.msra.mxu2 %v3284_v6 }
 0xe39   :  { %3292 = vmatpush.msra.mxu2 %v3283_v32 }
 0xe3b   :  { %3293 = vmatpush.msra.mxu2 %v3282_v16 }
 0xe3d   :  { %3294 = vmatpush.msra.mxu2 %v3281_v2  ;;  %v3852_v2 = vld [vmem:[%s7853_s10] ss:$0 sm:$0xff] }
 0xe3f   :  { %3295 = vmatpush.msra.mxu2 %v3280_v58 }
 0xe41   :  { %3296 = vmatpush.msra.mxu2 %v3279_v50 }
 0xe43   :  { %3297 = vmatpush.msra.mxu2 %v3278_v63 }
 0xe45   :  { %3298 = vmatpush.msra.mxu2 %v3277_v29 }
 0xe47   :  { %3299 = vmatpush.msra.mxu2 %v3276_v31 }
 0xe49   :  { %3300 = vmatpush.msra.mxu2 %v3275_v42 }
 0xe4b   :  { %3301 = vmatpush.msra.mxu2 %v3274_v19 }
 0xe4d   :  { %3302 = vmatpush.msra.mxu2 %v3273_v47 }
 0xe4f   :  { %3303 = vmatpush.msra.mxu2 %v3272_v9 }
 0xe50   :  { %3304 = vmatmul.f32.vlgmr.msra.gmra.mxu2 %v7224_v14  ;;  %v3368_v14 = vld [vmem:[%s7852_s9 + $0x78] sm:$0xff] }
 0xe51   :  { %3373 = vmatpush.msra.mxu3 %v3368_v14 }
 0xe58   :  { %3307 = vmatmul.f32.gmra.mxu2 %v7230_v60  ;;  %v3367_v60 = vld [vmem:[%s7852_s9 + $0x70] sm:$0xff] }
 0xe59   :  { %3374 = vmatpush.msra.mxu3 %v3367_v60 }
 0xe60   :  { %3310 = vmatmul.f32.gmra.mxu2 %v7236_v3  ;;  %v3366_v3 = vld [vmem:[%s7852_s9 + $0x68] sm:$0xff] }
 0xe61   :  { %3375 = vmatpush.msra.mxu3 %v3366_v3 }
 0xe68   :  { %3313 = vmatmul.f32.gmra.mxu2 %v7242_v8  ;;  %v3365_v8 = vld [vmem:[%s7852_s9 + $0x60] sm:$0xff] }
 0xe69   :  { %3376 = vmatpush.msra.mxu3 %v3365_v8 }
 0xe70   :  { %3316 = vmatmul.f32.gmra.mxu2 %v7247_v34  ;;  %v3364_v34 = vld [vmem:[%s7852_s9 + $0x58] sm:$0xff] }
 0xe71   :  { %3377 = vmatpush.msra.mxu3 %v3364_v34 }
 0xe78   :  { %3319 = vmatmul.f32.gmra.mxu2 %v7252_v7  ;;  %v3363_v7 = vld [vmem:[%s7852_s9 + $0x50] sm:$0xff] }
 0xe79   :  { %3378 = vmatpush.msra.mxu3 %v3363_v7 }
 0xe80   :  { %3322 = vmatmul.f32.gmra.mxu2 %v7260_v23  ;;  %v3362_v23 = vld [vmem:[%s7852_s9 + $0x48] sm:$0xff] }
 0xe81   :  { %3379 = vmatpush.msra.mxu3 %v3362_v23 }
 0xe88   :  { %3325 = vmatmul.f32.gmra.mxu2 %v7272_v54  ;;  %v3361_v54 = vld [vmem:[%s7852_s9 + $0x40] sm:$0xff] }
 0xe89   :  { %3380 = vmatpush.msra.mxu3 %v3361_v54 }
 0xe90   :  { %3328 = vmatmul.f32.gmra.mxu2 %v7285_v39  ;;  %v3360_v39 = vld [vmem:[%s7852_s9 + $0x38] sm:$0xff] }
 0xe91   :  { %3381 = vmatpush.msra.mxu3 %v3360_v39 }
 0xe98   :  { %3331 = vmatmul.f32.gmra.mxu2 %v7313_v37  ;;  %v3359_v37 = vld [vmem:[%s7852_s9 + $0x30] sm:$0xff] }
 0xe99   :  { %3382 = vmatpush.msra.mxu3 %v3359_v37 }
 0xea0   :  { %3334 = vmatmul.f32.gmra.mxu2 %v7342_v53  ;;  %v3358_v53 = vld [vmem:[%s7852_s9 + $0x28] sm:$0xff] }
 0xea1   :  { %3383 = vmatpush.msra.mxu3 %v3358_v53 }
 0xea3   :  { %3384 = vmatpush.msra.mxu3 %v3357_v28 }
 0xea5   :  { %3385 = vmatpush.msra.mxu3 %v3356_v43 }
 0xea7   :  { %3386 = vmatpush.msra.mxu3 %v3355_v61  ;;  %v3850_v61 = vld [vmem:[%s7849_s6] ss:$0 sm:$0xff] }
 0xea8   :  { %3337 = vmatmul.f32.gmra.mxu2 %v7365_v48  ;;  %v3354_v48 = vld [vmem:[%s7852_s9 + $0x8] sm:$0xff] }
 0xea9   :  { %3387 = vmatpush.msra.mxu3 %v3354_v48 }
 0xeab   :  { %3388 = vmatpush.msra.mxu3 %v3353_v51  ;;  %v4112_v51 = vld [vmem:[#allocation8] sm:$0xff] }
 0xeb0   :  { %3340 = vmatmul.f32.gmra.mxu2 %v7386_v36 }
 0xeb8   :  { %3343 = vmatmul.f32.gmra.mxu2 %v7393_v1 }
 0xec0   :  { %3346 = vmatmul.f32.gmra.mxu2 %v7398_v15 }
 0xec8   :  { %3349 = vmatmul.f32.gmra.mxu2 %v7403_v24 }
 0xed3   :  { %v3305_v49 = vpop.f32.mrf.mxu2 }
 0xed4   :  { %3389 = vmatmul.f32.vlgmr.msra.gmra.mxu3 %v3305_v49  ;;  %v8012_v49 = vld [vmem:[#allocation13_spill] sm:$0xff] }
 0xedb   :  { %v3308_v52 = vpop.f32.mrf.mxu2 }
 0xedc   :  { %3392 = vmatmul.f32.gmra.mxu3 %v3308_v52  ;;  %v93_v52 = vmul.f32 %v4112_v51, %v8012_v49 }
 0xee3   :  { %v3311_v44 = vpop.f32.mrf.mxu2 }
 0xee4   :  { %3395 = vmatmul.f32.gmra.mxu3 %v3311_v44 }
 0xeeb   :  { %v3314_v13 = vpop.f32.mrf.mxu2 }
 0xeec   :  { %3398 = vmatmul.f32.gmra.mxu3 %v3314_v13  ;;  %v7539_v13 = vadd.f32 %v3850_v61, %v6731_v45  ;;  %v117_v45 = vmul.f32 10.0, %v6431_v25 }
 0xef3   :  { %v3317_v36 = vpop.f32.mrf.mxu2 }
 0xef4   :  { %3401 = vmatmul.f32.gmra.mxu3 %v3317_v36 }
 0xefb   :  { %v3320_v26 = vpop.f32.mrf.mxu2 }
 0xefc   :  { %3404 = vmatmul.f32.gmra.mxu3 %v3320_v26  ;;  %v1841_v26 = vmul.f32 %v7539_v13, %v7539_v13 }
 0xf03   :  { %v3323_v40 = vpop.f32.mrf.mxu2 }
 0xf04   :  { %3407 = vmatmul.f32.gmra.mxu3 %v3323_v40 }
 0xf0b   :  { %v3326_v21 = vpop.f32.mrf.mxu2 }
 0xf0c   :  { %3410 = vmatmul.f32.gmra.mxu3 %v3326_v21 }
 0xf13   :  { %v3329_v1 = vpop.f32.mrf.mxu2 }
 0xf14   :  { %3413 = vmatmul.f32.gmra.mxu3 %v3329_v1 }
 0xf1b   :  { %v3332_v15 = vpop.f32.mrf.mxu2 }
 0xf1c   :  { %3416 = vmatmul.f32.gmra.mxu3 %v3332_v15  ;;  %v8013_v15 = vld [vmem:[#allocation15_spill] sm:$0xff] }
 0xf1d   :  { %vm120_vm15 = vcmp.lt.s32.totalorder %v8013_v15, 120 }
 0xf23   :  { %v3335_v24 = vpop.f32.mrf.mxu2 }
 0xf24   :  { %3419 = vmatmul.f32.gmra.mxu3 %v3335_v24  ;;  %v7554_v24 = vsel %vm120_vm15, %v117_v45, -inf }
 0xf2b   :  { %v3338_v30 = vpop.f32.mrf.mxu2 }
 0xf2c   :  { %3422 = vmatmul.f32.gmra.mxu3 %v3338_v30 }
 0xf33   :  { %v3341_v17 = vpop.f32.mrf.mxu2 }
 0xf34   :  { %3425 = vmatmul.f32.gmra.mxu3 %v3341_v17 }
 0xf3b   :  { %v3344_v62 = vpop.f32.mrf.mxu2 }
 0xf3c   :  { %3428 = vmatmul.f32.gmra.mxu3 %v3344_v62 }
 0xf43   :  { %v3347_v33 = vpop.f32.mrf.mxu2 }
 0xf44   :  { %3431 = vmatmul.f32.gmra.mxu3 %v3347_v33 }
 0xf4b   :  { %v3350_v4 = vpop.f32.mrf.mxu2 }
 0xf4c   :  { %3434 = vmatmul.f32.gmra.mxu3 %v3350_v4 }
 0xf57   :  { %v7473_v12 = vpop.f32.mrf.mxu3 }
 0xf58   :  { %v7548_v21 = vadd.f32 %v3852_v2, %v7473_v12 }
 0xf5a   :  { %v3438_v1 = vmul.f32 %v7548_v21, %v7548_v21 }
 0xf5f   :  { %v3393_v55 = vpop.f32.mrf.mxu3 }
 0xf60   :  { %v7514_v7 = vadd.f32 %v3852_v2, %v3393_v55 }
 0xf62   :  { %v3439_v39 = vmul.f32 %v7514_v7, %v7514_v7 }
 0xf67   :  { %v3396_v11 = vpop.f32.mrf.mxu3 }
 0xf68   :  { %v7526_v28 = vadd.f32 %v3852_v2, %v3396_v11 }
 0xf6a   :  { %v3440_v48 = vmul.f32 %v7526_v28, %v7526_v28 }
 0xf6f   :  { %v3399_v27 = vpop.f32.mrf.mxu3 }
 0xf70   :  { %v7541_v36 = vadd.f32 %v3852_v2, %v3399_v27 }
 0xf72   :  { %v3441_v40 = vmul.f32 %v7541_v36, %v7541_v36 }
 0xf77   :  { %v3402_v20 = vpop.f32.mrf.mxu3 }
 0xf78   :  { %v7502_v9 = vadd.f32 %v3852_v2, %v3402_v20 }
 0xf7a   :  { %v3442_v3 = vmul.f32 %v7502_v9, %v7502_v9 }
 0xf7f   :  { %v3405_v0 = vpop.f32.mrf.mxu3 }
 0xf80   :  { %v7516_v23 = vadd.f32 %v3852_v2, %v3405_v0 }
 0xf82   :  { %v3443_v37 = vmul.f32 %v7516_v23, %v7516_v23 }
 0xf87   :  { %v3408_v5 = vpop.f32.mrf.mxu3 }
 0xf88   :  { %v7528_v43 = vadd.f32 %v3852_v2, %v3408_v5 }
 0xf8a   :  { %v3444_v44 = vmul.f32 %v7528_v43, %v7528_v43 }
 0xf8f   :  { %v3411_v6 = vpop.f32.mrf.mxu3 }
 0xf90   :  { %v7490_v41 = vadd.f32 %v3852_v2, %v3411_v6 }
 0xf92   :  { %v3445_v35 = vmul.f32 %v7490_v41, %v7490_v41 }
 0xf97   :  { %v3414_v22 = vpop.f32.mrf.mxu3 }
 0xf98   :  { %v7504_v14 = vadd.f32 %v3852_v2, %v3414_v22 }
 0xf9a   :  { %v3446_v8 = vmul.f32 %v7504_v14, %v7504_v14 }
 0xf9f   :  { %v3417_v32 = vpop.f32.mrf.mxu3 }
 0xfa0   :  { %v7518_v54 = vadd.f32 %v3852_v2, %v3417_v32 }
 0xfa2   :  { %v3447_v53 = vmul.f32 %v7518_v54, %v7518_v54 }
 0xfa7   :  { %v3420_v18 = vpop.f32.mrf.mxu3 }
 0xfa8   :  { %v7482_v50 = vadd.f32 %v3852_v2, %v3420_v18 }
 0xfaa   :  { %v3448_v46 = vmul.f32 %v7482_v50, %v7482_v50 }
 0xfaf   :  { %v3423_v16 = vpop.f32.mrf.mxu3 }
 0xfb0   :  { %v7492_v31 = vadd.f32 %v3852_v2, %v3423_v16 }
 0xfb2   :  { %v3449_v19 = vmul.f32 %v7492_v31, %v7492_v31 }
 0xfb7   :  { %v3426_v38 = vpop.f32.mrf.mxu3 }
 0xfb8   :  { %v7506_v60 = vadd.f32 %v3852_v2, %v3426_v38 }
 0xfba   :  { %v3450_v34 = vmul.f32 %v7506_v60, %v7506_v60 }
 0xfbf   :  { %v3429_v56 = vpop.f32.mrf.mxu3 }
 0xfc0   :  { %v7478_v58 = vadd.f32 %v3852_v2, %v3429_v56 }
 0xfc2   :  { %v3451_v57 = vmul.f32 %v7478_v58, %v7478_v58 }
 0xfc4   :  { %3480 = vadd.xlane.f32.xlu2 %v3451_v57 }
 0xfc7   :  { %v3432_v59 = vpop.f32.mrf.mxu3 }
 0xfc8   :  { %v7484_v63 = vadd.f32 %v3852_v2, %v3432_v59 }
 0xfca   :  { %v3452_v29 = vmul.f32 %v7484_v63, %v7484_v63 }
 0xfcc   :  { %3474 = vadd.xlane.f32.xlu2 %v3448_v46  ;;  %3482 = vadd.xlane.f32.xlu1 %v3452_v29 }
 0xfcf   :  { %v3435_v10 = vpop.f32.mrf.mxu3 }
 0xfd0   :  { %v7494_v42 = vadd.f32 %v3852_v2, %v3435_v10 }
 0xfd2   :  { %v3453_v47 = vmul.f32 %v7494_v42, %v7494_v42 }
 0xfd4   :  { %3468 = vadd.xlane.f32.xlu2 %v3445_v35  ;;  %3476 = vadd.xlane.f32.xlu1 %v3449_v19 }
 0xfd5   :  { %3484 = vadd.xlane.f32.xlu0 %v3453_v47 }
 0xfdc   :  { %3462 = vadd.xlane.f32.xlu2 %v3442_v3  ;;  %3470 = vadd.xlane.f32.xlu1 %v3446_v8 }
 0xfdd   :  { %3478 = vadd.xlane.f32.xlu0 %v3450_v34 }
 0xfe4   :  { %3456 = vadd.xlane.f32.xlu2 %v3439_v39  ;;  %3464 = vadd.xlane.f32.xlu1 %v3443_v37 }
 0xfe5   :  { %3472 = vadd.xlane.f32.xlu0 %v3447_v53 }
 0xfec   :  { %94 = vadd.xlane.f32.xlu2 %v93_v52  ;;  %3458 = vadd.xlane.f32.xlu1 %v3440_v48 }
 0xfed   :  { %3466 = vadd.xlane.f32.xlu0 %v3444_v44 }
 0xff4   :  { %1842 = vadd.xlane.f32.xlu1 %v1841_v26 }
 0xff5   :  { %3460 = vadd.xlane.f32.xlu0 %v3441_v40 }
 0xffd   :  { %3454 = vadd.xlane.f32.xlu0 %v3438_v1 }
0x1005   :  { %122 = vmax.xlane.f32.xlu0 %v7554_v24 }
0x1037   :  { %v3481_v30 = vpop.xlane.xlu2 %3480 }
0x1038   :  { %v7557_v17 = vmax.f32 %v3481_v30, 1e-24 }
0x103a   :  { %4053 = vrsqrt.f32 %v7557_v17  ;;  %vm3638_vm11 = vweird.f32 %v7557_v17 }
0x103f   :  { %v3483_v62 = vpop.xlane.xlu1 %3482  ;;  %v3475_v55 = vpop.xlane.xlu2 %3474 }
0x1040   :  { %v3500_v33 = vmax.f32 %v3483_v62, 1e-24  ;;  %v7560_v12 = vpop.eup %4053  ;;  %v7569_v6 = vmax.f32 %v3475_v55, 1e-24 }
0x1041   :  { %v3633_v5 = vmul.f32 %v7560_v12, %v7557_v17  ;;  %vm3639_vm9 = vweird.f32 %v7560_v12 }
0x1042   :  { %4055 = vrsqrt.f32 %v3500_v33  ;;  %vm3648_vm5 = vweird.f32 %v3500_v33  ;;  %vm7621_vm7 = vmor %vm3638_vm11, %vm3639_vm9 }
0x1043   :  { %v3634_v32 = vmul.f32 %v7560_v12, %v3633_v5 }
0x1045   :  { %v3635_v29 = vmul.f32 0.5, %v3634_v32 }
0x1047   :  { %v3477_v4 = vpop.xlane.xlu1 %3476  ;;  %v3469_v2 = vpop.xlane.xlu2 %3468  ;;  %v3636_v39 = vsub.f32 1.5, %v3635_v29 }
0x1048   :  { %v3485_v11 = vpop.xlane.xlu0 %3484  ;;  %v7562_v25 = vpop.eup %4055  ;;  %v7564_v20 = vmax.f32 %v3477_v4, 1e-24  ;;  %v7580_v10 = vmax.f32 %v3469_v2, 1e-24 }
0x1049   :  { %v3501_v27 = vmax.f32 %v3485_v11, 1e-24  ;;  %v3643_v0 = vmul.f32 %v7562_v25, %v3500_v33  ;;  %vm3649_vm2 = vweird.f32 %v7562_v25  ;;  %v3637_v55 = vmul.f32 %v7560_v12, %v3636_v39 }
0x104a   :  { %vm7605_vm6 = vmor %vm3648_vm5, %vm3649_vm2  ;;  %vm3618_vm3 = vweird.f32 %v7564_v20 }
0x104b   :  { %4057 = vrsqrt.f32 %v3501_v27  ;;  %v3644_v22 = vmul.f32 %v7562_v25, %v3643_v0  ;;  %vm3658_vm1 = vweird.f32 %v3501_v27  ;;  %v3641_v17 = vsel %vm7621_vm7, %v7560_v12, %v3637_v55 }
0x104c   :  { %4059 = vrsqrt.f32 %v7564_v20  ;;  %vm3578_vm7 = vweird.f32 %v7580_v10 }
0x104d   :  { %4061 = vrsqrt.f32 %v7569_v6  ;;  %v3645_v56 = vmul.f32 0.5, %v3644_v22 }
0x104f   :  { %v3471_v59 = vpop.xlane.xlu1 %3470  ;;  %v3646_v3 = vsub.f32 1.5, %v3645_v56  ;;  %v3463_v22 = vpop.xlane.xlu2 %3462 }
0x1050   :  { %v3479_v18 = vpop.xlane.xlu0 %3478  ;;  %v7582_v19 = vmax.f32 %v3471_v59, 1e-24 }
0x1051   :  { %v7575_v16 = vmax.f32 %v3479_v18, 1e-24  ;;  %v4058_v38 = vpop.eup %4057  ;;  %v3647_v26 = vmul.f32 %v7562_v25, %v3646_v3  ;;  %v7641_v3 = vmax.f32 %v3463_v22, 1e-24 }
0x1052   :  { %v3653_v57 = vmul.f32 %v4058_v38, %v3501_v27  ;;  %v7577_v46 = vpop.eup %4059  ;;  %vm3659_vm0 = vweird.f32 %v4058_v38  ;;  %vm3588_vm11 = vweird.f32 %v7582_v19 }
0x1053   :  { %4063 = vrsqrt.f32 %v7575_v16  ;;  %v7584_v47 = vpop.eup %4061  ;;  %v3613_v8 = vmul.f32 %v7577_v46, %v7564_v20  ;;  %vm3660_vm4 = vmor %vm3658_vm1, %vm3659_vm0  ;;  %v3651_v0 = vsel %vm7605_vm6, %v7562_v25, %v3647_v26  ;;  %vm3628_vm10 = vweird.f32 %v7575_v16 }
0x1054   :  { %v3654_v35 = vmul.f32 %v4058_v38, %v3653_v57  ;;  %4065 = vrsqrt.f32 %v7580_v10  ;;  %v3603_v51 = vmul.f32 %v7584_v47, %v7569_v6  ;;  %v3676_v25 = vmul.f32 %v3651_v0, %v7484_v63 }
0x1055   :  { %4067 = vrsqrt.f32 %v7582_v19  ;;  %v3614_v49 = vmul.f32 %v7577_v46, %v3613_v8  ;;  %vm3619_vm13 = vweird.f32 %v7577_v46  ;;  %vm3609_vm14 = vweird.f32 %v7584_v47 }
0x1056   :  { %v3655_v34 = vmul.f32 0.5, %v3654_v35  ;;  %v3604_v45 = vmul.f32 %v7584_v47, %v3603_v51  ;;  %vm7666_vm15 = vmor %vm3618_vm3, %vm3619_vm13  ;;  %vm3608_vm0 = vweird.f32 %v7569_v6 }
0x1057   :  { %v3465_v62 = vpop.xlane.xlu1 %3464  ;;  %v3615_v33 = vmul.f32 0.5, %v3614_v49  ;;  %vm7684_vm2 = vmor %vm3608_vm0, %vm3609_vm14 }
0x1058   :  { %v3473_v37 = vpop.xlane.xlu0 %3472  ;;  %v3656_v53 = vsub.f32 1.5, %v3655_v34  ;;  %v3605_v56 = vmul.f32 0.5, %v3604_v45 }
0x1059   :  { %v7589_v61 = vmax.f32 %v3473_v37, 1e-24  ;;  %v7591_v48 = vpop.eup %4063  ;;  %v3616_v59 = vsub.f32 1.5, %v3615_v33  ;;  %v3675_v37 = vmul.f32 %v3641_v17, %v7478_v58 }
0x105a   :  { %v3657_v52 = vmul.f32 %v4058_v38, %v3656_v53  ;;  %v3623_v44 = vmul.f32 %v7591_v48, %v7575_v16  ;;  %v7611_v11 = vpop.eup %4065  ;;  %vm3629_vm8 = vweird.f32 %v7591_v48  ;;  %v3606_v8 = vsub.f32 1.5, %v3605_v56 }
0x105b   :  { %4069 = vrsqrt.f32 %v7589_v61  ;;  %v7616_v5 = vpop.eup %4067  ;;  %v3573_v35 = vmul.f32 %v7611_v11, %v7580_v10  ;;  %vm7648_vm12 = vmor %vm3628_vm10, %vm3629_vm8  ;;  %v3617_v16 = vmul.f32 %v7577_v46, %v3616_v59  ;;  %vm3579_vm6 = vweird.f32 %v7611_v11 }
0x105c   :  { %v3661_v40 = vsel %vm3660_vm4, %v4058_v38, %v3657_v52  ;;  %v3624_v1 = vmul.f32 %v7591_v48, %v3623_v44  ;;  %v7625_v38 = vmax.f32 %v3465_v62, 1e-24  ;;  %v3583_v29 = vmul.f32 %v7616_v5, %v7582_v19  ;;  %vm7745_vm10 = vmor %vm3578_vm7, %vm3579_vm6 }
0x105d   :  { %v3677_v4 = vmul.f32 %v3661_v40, %v7494_v42  ;;  %v3574_v49 = vmul.f32 %v7611_v11, %v3573_v35  ;;  %v3607_v30 = vmul.f32 %v7584_v47, %v3606_v8  ;;  %v3621_v33 = vsel %vm7666_vm15, %v7577_v46, %v3617_v16 }
0x105e   :  { %v3625_v27 = vmul.f32 0.5, %v3624_v1  ;;  %v3584_v53 = vmul.f32 %v7616_v5, %v3583_v29  ;;  %v3673_v46 = vmul.f32 %v3621_v33, %v7492_v31  ;;  %vm3598_vm4 = vweird.f32 %v7589_v61 }
0x105f   :  { %3678 = vmatpush.xpose.msrb.mxu1 %v3677_v4  ;;  %v3459_v40 = vpop.xlane.xlu1 %3458  ;;  %v3611_v6 = vsel %vm7684_vm2, %v7584_v47, %v3607_v30  ;;  %vm3589_vm9 = vweird.f32 %v7616_v5  ;;  %vm3558_vm15 = vweird.f32 %v7625_v38 }
0x1060   :  { %v3467_v32 = vpop.xlane.xlu0 %3466  ;;  %v3626_v18 = vsub.f32 1.5, %v3625_v27  ;;  %v3585_v4 = vmul.f32 0.5, %v3584_v53  ;;  %v3575_v27 = vmul.f32 0.5, %v3574_v49  ;;  %v7688_v0 = vmax.f32 %v3459_v40, 1e-24  ;;  %vm7727_vm8 = vmor %vm3588_vm11, %vm3589_vm9 }
0x1061   :  { %v7627_v2 = vmax.f32 %v3467_v32, 1e-24  ;;  %v7633_v57 = vpop.eup %4069  ;;  %v3672_v35 = vmul.f32 %v3611_v6, %v7482_v50 }
0x1062   :  { %v3593_v63 = vmul.f32 %v7633_v57, %v7589_v61  ;;  %v3627_v12 = vmul.f32 %v7591_v48, %v3626_v18  ;;  %v3586_v42 = vsub.f32 1.5, %v3585_v4  ;;  %vm3599_vm1 = vweird.f32 %v7633_v57 }
0x1063   :  { %4071 = vrsqrt.f32 %v7627_v2  ;;  %3679 = vmatpush.xpose.msrb.mxu1 %v3676_v25  ;;  %v3576_v25 = vsub.f32 1.5, %v3575_v27  ;;  %vm7709_vm5 = vmor %vm3598_vm4, %vm3599_vm1  ;;  %vm3568_vm13 = vweird.f32 %v7627_v2  ;;  %vm3548_vm1 = vweird.f32 %v7641_v3 }
0x1064   :  { %4073 = vrsqrt.f32 %v7625_v38  ;;  %v3594_v39 = vmul.f32 %v7633_v57, %v3593_v63  ;;  %v3631_v51 = vsel %vm7648_vm12, %v7591_v48, %v3627_v12  ;;  %v3457_v48 = vpop.xlane.xlu2 %3456  ;;  %v3587_v8 = vmul.f32 %v7616_v5, %v3586_v42 }
0x1065   :  { %4075 = vrsqrt.f32 %v7641_v3  ;;  %v3674_v45 = vmul.f32 %v3631_v51, %v7506_v60  ;;  %v7704_v29 = vmax.f32 %v3457_v48, 1e-24  ;;  %v3577_v50 = vmul.f32 %v7611_v11, %v3576_v25 }
0x1066   :  { %v3595_v52 = vmul.f32 0.5, %v3594_v39  ;;  %v3591_v10 = vsel %vm7727_vm8, %v7616_v5, %v3587_v8  ;;  %vm3528_vm7 = vweird.f32 %v7688_v0 }
0x1067   :  { %3680 = vmatpush.xpose.msrb.mxu1 %v3675_v37  ;;  %v1843_v53 = vpop.xlane.xlu1 %1842  ;;  %v3581_v30 = vsel %vm7745_vm10, %v7611_v11, %v3577_v50 }
0x1068   :  { %v3461_v44 = vpop.xlane.xlu0 %3460  ;;  %v3596_v55 = vsub.f32 1.5, %v3595_v52  ;;  %v7749_v40 = vmax.f32 %v1843_v53, 1e-24 }
0x1069   :  { %v7662_v26 = vpop.eup %4071  ;;  %v7670_v1 = vmax.f32 %v3461_v44, 1e-24 }
0x106a   :  { %v7674_v62 = vpop.eup %4073  ;;  %v3563_v20 = vmul.f32 %v7662_v26, %v7627_v2  ;;  %v3597_v56 = vmul.f32 %v7633_v57, %v3596_v55  ;;  %v3670_v55 = vmul.f32 %v3591_v10, %v7504_v14  ;;  %vm3569_vm12 = vweird.f32 %v7662_v26 }
0x106b   :  { %3681 = vmatpush.xpose.msrb.mxu1 %v3674_v45  ;;  %v7690_v22 = vpop.eup %4075  ;;  %v3553_v32 = vmul.f32 %v7674_v62, %v7625_v38  ;;  %4077 = vrsqrt.f32 %v7670_v1  ;;  %vm3559_vm3 = vweird.f32 %v7674_v62  ;;  %vm3570_vm14 = vmor %vm3568_vm13, %vm3569_vm12  ;;  %vm3538_vm9 = vweird.f32 %v7670_v1 }
0x106c   :  { %v3564_v18 = vmul.f32 %v7662_v26, %v3563_v20  ;;  %v3543_v59 = vmul.f32 %v7690_v22, %v7641_v3  ;;  %4079 = vrsqrt.f32 %v7688_v0  ;;  %v3601_v12 = vsel %vm7709_vm5, %v7633_v57, %v3597_v56  ;;  %v95_v34 = vpop.xlane.xlu2 %94  ;;  %vm3560_vm2 = vmor %vm3558_vm15, %vm3559_vm3 }
0x106d   :  { %v3554_v31 = vmul.f32 %v7674_v62, %v3553_v32  ;;  %4081 = vrsqrt.f32 %v7704_v29  ;;  %v3671_v16 = vmul.f32 %v3601_v12, %v7518_v54  ;;  %v7736_v52 = vmul.f32 10.0, %v95_v34 }
0x106e   :  { %v3565_v63 = vmul.f32 0.5, %v3564_v18  ;;  %v3544_v39 = vmul.f32 %v7690_v22, %v3543_v59  ;;  %vm3549_vm0 = vweird.f32 %v7690_v22  ;;  %vm3518_vm12 = vweird.f32 %v7704_v29 }
0x106f   :  { %3682 = vmatpush.xpose.msrb.mxu1 %v3673_v46  ;;  %v3555_v37 = vmul.f32 0.5, %v3554_v31  ;;  %v3669_v46 = vmul.f32 %v3581_v30, %v7490_v41  ;;  %vm7788_vm4 = vmor %vm3548_vm1, %vm3549_vm0 }
0x1070   :  { %v3455_v17 = vpop.xlane.xlu0 %3454  ;;  %v3566_v19 = vsub.f32 1.5, %v3565_v63  ;;  %v3545_v48 = vmul.f32 0.5, %v3544_v39 }
0x1071   :  { %v7719_v61 = vpop.eup %4077  ;;  %v7731_v51 = vmax.f32 %v3455_v17, 1e-24  ;;  %v3556_v4 = vsub.f32 1.5, %v3555_v37 }
0x1072   :  { %v7734_v49 = vpop.eup %4079  ;;  %v3533_v44 = vmul.f32 %v7719_v61, %v7670_v1  ;;  %v3567_v60 = vmul.f32 %v7662_v26, %v3566_v19  ;;  %v3546_v32 = vsub.f32 1.5, %v3545_v48  ;;  %vm3539_vm5 = vweird.f32 %v7719_v61 }
0x1073   :  { %3683 = vmatpush.xpose.msrb.mxu1 %v3672_v35  ;;  %v3523_v5 = vmul.f32 %v7734_v49, %v7688_v0  ;;  %4083 = vrsqrt.f32 %v7731_v51  ;;  %v7761_v20 = vpop.eup %4081  ;;  %v3557_v18 = vmul.f32 %v7674_v62, %v3556_v4  ;;  %vm3540_vm6 = vmor %vm3538_vm9, %vm3539_vm5  ;;  %vm3529_vm11 = vweird.f32 %v7734_v49 }
0x1074   :  { %v3534_v33 = vmul.f32 %v7719_v61, %v3533_v44  ;;  %4085 = vrsqrt.f32 %v7749_v40  ;;  %v3513_v14 = vmul.f32 %v7761_v20, %v7704_v29  ;;  %v3571_v42 = vsel %vm3570_vm14, %v7662_v26, %v3567_v60  ;;  %vm3530_vm8 = vmor %vm3528_vm7, %vm3529_vm11 }
0x1075   :  { %v3524_v6 = vmul.f32 %v7734_v49, %v3523_v5  ;;  %v3668_v41 = vmul.f32 %v3571_v42, %v7528_v43  ;;  %v3547_v25 = vmul.f32 %v7690_v22, %v3546_v32  ;;  %v3561_v47 = vsel %vm3560_vm2, %v7674_v62, %v3557_v18 }
0x1076   :  { %v3514_v56 = vmul.f32 %v7761_v20, %v3513_v14  ;;  %v3667_v12 = vmul.f32 %v3561_v47, %v7516_v23  ;;  %vm3519_vm10 = vweird.f32 %v7761_v20  ;;  %vm3508_vm14 = vweird.f32 %v7731_v51  ;;  %v8032_v14 = vld [vmem:[#allocation14_spill] sm:$0xff] }
0x1077   :  { %3684 = vmatpush.xpose.msrb.mxu1 %v3671_v16  ;;  %v3525_v59 = vmul.f32 0.5, %v3524_v6  ;;  %v3551_v8 = vsel %vm7788_vm4, %v7690_v22, %v3547_v25  ;;  %vm3520_vm13 = vmor %vm3518_vm12, %vm3519_vm10  ;;  %vm1851_vm2 = vweird.f32 %v7749_v40  ;;  %vm3724_vm4 = vcmask 0  }
0x1078   :  { %v123_v54 = vpop.xlane.xlu0 %122  ;;  %v3515_v63 = vmul.f32 0.5, %v3514_v56  ;;  %v3666_v23 = vmul.f32 %v3551_v8, %v7502_v9  ;;  %vm3699_vm5 = vcmp.eq.s32.totalorder %v8013_v15, %v8032_v14  ;;  %vm3700_vm9 = vcmp.ge.s32.totalorder %v8013_v15, 8 }
0x1079   :  { %v7752_v45 = vmax.f32 %v123_v54, %v7736_v52  ;;  %v7777_v2 = vpop.eup %4083  ;;  %v3526_v34 = vsub.f32 1.5, %v3525_v59 }
0x107a   :  { %v4086_v17 = vpop.eup %4085  ;;  %v3503_v31 = vmul.f32 %v7777_v2, %v7731_v51  ;;  %v3516_v39 = vsub.f32 1.5, %v3515_v63  ;;  %vm3509_vm3 = vweird.f32 %v7777_v2 }
0x107b   :  { %v128_v27 = vsub.f32 %v7554_v24, %v7752_v45  ;;  %3685 = vmatpush.xpose.msrb.mxu1 %v3670_v55  ;;  %v3535_v24 = vmul.f32 0.5, %v3534_v33  ;;  %v1846_v43 = vmul.f32 %v4086_v17, %v7749_v40  ;;  %v3527_v37 = vmul.f32 %v7734_v49, %v3526_v34  ;;  %vm3510_vm0 = vmor %vm3508_vm14, %vm3509_vm3 }
0x107c   :  { %v3504_v3 = vmul.f32 %v7777_v2, %v3503_v31  ;;  %v3517_v9 = vmul.f32 %v7761_v20, %v3516_v39  ;;  %vm1852_vm15 = vweird.f32 %v4086_v17  ;;  %v125_v51 = vsub.f32 %v7736_v52, %v7752_v45 }
0x107d   :  { %v129_v11 = vmul.f32 1.442695, %v128_v27  ;;  %v3536_v26 = vsub.f32 1.5, %v3535_v24  ;;  %v1847_v50 = vmul.f32 %v4086_v17, %v1846_v43  ;;  %v3531_v19 = vsel %vm3530_vm8, %v7734_v49, %v3527_v37  ;;  %vm1853_vm1 = vmor %vm1851_vm2, %vm1852_vm15 }
0x107e   :  { %v3505_v57 = vmul.f32 0.5, %v3504_v3  ;;  %v3664_v44 = vmul.f32 %v3531_v19, %v7526_v28  ;;  %v3521_v0 = vsel %vm3520_vm13, %v7761_v20, %v3517_v9  ;;  %v126_v48 = vmul.f32 1.442695, %v125_v51 }
0x107f   :  { %4087 = vpow2.f32 %v129_v11  ;;  %3686 = vmatpush.xpose.msrb.mxu1 %v3669_v46  ;;  %v3537_v62 = vmul.f32 %v7719_v61, %v3536_v26  ;;  %v1848_v53 = vmul.f32 0.5, %v1847_v50  ;;  %v3663_v49 = vmul.f32 %v3521_v0, %v7514_v7 }
0x1080   :  { %v3506_v1 = vsub.f32 1.5, %v3505_v57  ;;  %4089 = vpow2.f32 %v126_v48 }
0x1081   :  { %v3541_v22 = vsel %vm3540_vm6, %v7719_v61, %v3537_v62  ;;  %v1849_v61 = vsub.f32 1.5, %v1848_v53  ;;  %vm3701_vm6 = vmor %vm3699_vm5, %vm3700_vm9 }
0x1082   :  { %v3665_v16 = vmul.f32 %v3541_v22, %v7541_v36  ;;  %v3507_v36 = vmul.f32 %v7777_v2, %v3506_v1 }
0x1083   :  { %3687 = vmatpush.xpose.msrb.mxu1 %v3668_v41  ;;  %v1850_v10 = vmul.f32 %v4086_v17, %v1849_v61 }
0x1084   :  { %v3511_v29 = vsel %vm3510_vm0, %v7777_v2, %v3507_v36 }
0x1085   :  { %v4088_v35 = vpop.eup %4087  ;;  %v1854_v28 = vsel %vm1853_vm1, %v4086_v17, %v1850_v10  ;;  %v3662_v58 = vmul.f32 %v3511_v29, %v7548_v21 }
0x1086   :  { %131 = vadd.xlane.f32.xlu2 %v4088_v35  ;;  %v1855_v54 = vmul.f32 %v1854_v28, %v7539_v13  ;;  %v4090_v30 = vpop.eup %4089 }
0x1087   :  { %3688 = vmatpush.xpose.msrb.mxu1 %v3667_v12 }
0x108b   :  { %3689 = vmatpush.xpose.msrb.mxu1 %v3666_v23 }
0x108f   :  { %3690 = vmatpush.xpose.msrb.mxu1 %v3665_v16 }
0x1093   :  { %3691 = vmatpush.xpose.msrb.mxu1 %v3664_v44 }
0x1097   :  { %3692 = vmatpush.xpose.msrb.mxu1 %v3663_v49 }
0x109b   :  { %3693 = vmatpush.xpose.msrb.mxu1 %v3662_v58 }
0x109e   :  { %3694 = vmatmul.f32.vlgmr.msrb.gmra.mxu1 %v1855_v54 }
0x10f9   :  { %v132_v7 = vpop.xlane.xlu2 %131 }
0x10fa   :  { %v133_v4 = vadd.f32 %v4090_v30, %v132_v7 }
0x10fc   :  { %4091 = vlog2.f32 %v133_v4 }
0x1102   :  { %v4092_v5 = vpop.eup %4091 }
0x1103   :  { %v135_v40 = vmul.f32 0.6931472, %v4092_v5 }
0x1105   :  { %v136_v55 = vadd.f32 %v135_v40, %v7752_v45 }
0x1107   :  { %v137_v20 = vsub.f32 %v136_v55, %v7736_v52 }
0x1109   :  { %v138_v21 = vrot.slane %v137_v20, 4 }
0x110b   :  { %v139_v33 = vadd.f32 %v138_v21, %v137_v20 }
0x110d   :  { %v140_v27 = vrot.slane %v139_v33, 2 }
0x110f   :  { %v141_v13 = vadd.f32 %v140_v27, %v139_v33 }
0x1111   :  { %v142_v60 = vrot.slane %v141_v13, 1 }
0x1113   :  { %v143_v11 = vadd.f32 %v142_v60, %v141_v13 }
0x1115   :  { %v144_v32 = vmul.f32 0.125, %v143_v11 }
0x1117   :  { %3725 = vst.msk [vmem:[#allocation5] sm:$0x1] %vm3724_vm4, %v144_v32 }
0x1118   :  { %3750 = dma.vmem_to_hbm [thread:$0]  %s3746_s20, 16, %s3748_s19, [#allocation6]  }
0x111b   :  { %v3695_v46 = vpop.f32.mrf.mxu1 }
0x111c   :  { %v3698_v45 = vmul.f32 10.0, %v3695_v46 }
0x111e   :  { %v3705_v6 = vsel %vm3701_vm6, %v3698_v45, -inf  ;;  %v3702_v52 = vsel %vm3699_vm5, %v3698_v45, 0.0 }
0x111f   :  { %3706 = vmax.xlane.f32.xlu1 %v3705_v6 }
0x1127   :  { %3703 = vadd.xlane.f32.xlu1 %v3702_v52 }
0x1192   :  { %v3707_v24 = vpop.xlane.xlu1 %3706 }
0x1193   :  { %v3708_v42 = vsub.f32 %v3705_v6, %v3707_v24 }
0x1195   :  { %v3709_v18 = vmul.f32 1.442695, %v3708_v42 }
0x1197   :  { %4093 = vpow2.f32 %v3709_v18 }
0x119a   :  { %v3704_v17 = vpop.xlane.xlu1 %3703 }
0x119d   :  { %v4094_v2 = vpop.eup %4093 }
0x119e   :  { %3711 = vadd.xlane.f32.xlu0 %v4094_v2 }
0x1211   :  { %v3712_v15 = vpop.xlane.xlu0 %3711 }
0x1212   :  { %4095 = vlog2.f32 %v3712_v15 }
0x1218   :  { %v4096_v56 = vpop.eup %4095 }
0x1219   :  { %v3714_v41 = vmul.f32 0.6931472, %v4096_v56 }
0x121b   :  { %v3715_v25 = vadd.f32 %v3714_v41, %v3707_v24 }
0x121d   :  { %v3716_v59 = vsub.f32 %v3715_v25, %v3704_v17 }
0x121f   :  { %v3717_v26 = vrot.slane %v3716_v59, 4 }
0x1221   :  { %v3718_v31 = vadd.f32 %v3717_v26, %v3716_v59 }
0x1223   :  { %v3719_v47 = vrot.slane %v3718_v31, 2 }
0x1225   :  { %v3720_v38 = vadd.f32 %v3719_v47, %v3718_v31 }
0x1227   :  { %v3721_v35 = vrot.slane %v3720_v38, 1 }
0x1229   :  { %v3722_v63 = vadd.f32 %v3721_v35, %v3720_v38 }
0x122b   :  { %v3723_v43 = vmul.f32 0.125, %v3722_v63 }
0x122d   :  { %v3727_v12 = vadd.f32 %v3723_v43, %v144_v32  ;;  %3726 = vst.msk [vmem:[#allocation7] sm:$0x1] %vm3724_vm4, %v3723_v43 }
0x122e   :  { %3761 = dma.vmem_to_hbm [thread:$0]  %s3757_s14, 16, %s3759_s27, [#allocation6]  }
0x122f   :  { %3728 = vst.msk [vmem:[#allocation3] sm:$0x1] %vm3724_vm4, %v3727_v12 }
0x1230   :  { %3739 = dma.vmem_to_hbm [thread:$0]  %s3735_s4, 16, %s3737_s30, [#allocation4]  }
0x1231   :  { %4209 = dma.done.wait [#allocation4], 16  }
0x1232   :  { %4210 = vsyncadd [#allocation4], 4294967280 }
0x1233   :  { %4211 = dma.done.wait [#allocation6], 32  }
0x1234   :  { %4212 = vsyncadd [#allocation6], 4294967264 }
0x1235   :  { %4213 = dma.done.wait [#allocation9], 2048  }
0x1236   :  { %4214 = vsyncadd [#allocation9], 4294965248 }
0x1237   :  { %3791 = vsyncpa [#allocation4], 1 }
0x1238   :  { %3792 = vsyncpa [#allocation6], 1 }
0x1239   :  { %3793 = vsyncpa [#allocation9], 1 }

</bundles_post_ra>
